<compile_context>
chip_gen: v5e
topology: v5e:2x2
jax: 0.10.0
libtpu: 0.0.40
codegen_flags: <defaults>
</compile_context>

<pallas_src>
import jax
import jax.numpy as jnp
from jax.experimental import pallas as pl
from jax.experimental.pallas import tpu as pltpu


def _lstm_kernel(x_ref,            # (T, B, D)   f32, time-major sequence
                 wih1_ref,         # (D, 4H)     bf16, gate cols [i,f,o|g]
                 whh1_ref,         # (H, 4H)     bf16
                 b1_ref,           # (1, 4H)     f32  (b_ih1 + b_hh1)
                 wih2_ref,         # (H, 4H)     bf16
                 whh2_ref,         # (H, 4H)     bf16
                 b2_ref,           # (1, 4H)     f32  (b_ih2 + b_hh2)
                 wfc_ref,          # (H, O)      f32
                 bfc_ref,          # (1, O)      f32
                 out_ref,          # (B, O)      f32 softmax probabilities
                 xproj_sc):        # (T, B, 4H)  f32 VMEM scratch, time-major
    T, B, D = x_ref.shape
    H = whh1_ref.shape[0]
    f32 = jnp.float32
    cdt = wih1_ref.dtype           # bf16 compute dtype for MXU operands

    # ---- prologue: batched layer-1 input projection for ALL timesteps (one MXU matmul) ----
    x2d = x_ref[...].reshape(T * B, D).astype(cdt)
    xproj = jnp.dot(x2d, wih1_ref[...], preferred_element_type=f32) + b1_ref[...]
    xproj_sc[...] = xproj.reshape(T, B, 4 * H)

    b2v = jnp.broadcast_to(b2_ref[...], (B, 4 * H))     # hoisted out of the time loop

    def gates_to_hc(gates, c_prev):
        # gate columns pre-permuted to [i, f, o | g]: one sigmoid slab + one tanh slab
        ifo = jax.nn.sigmoid(gates[:, :3 * H])
        g = jnp.tanh(gates[:, 3 * H:])
        i = ifo[:, :H]
        f = ifo[:, H:2 * H]
        o = ifo[:, 2 * H:]
        c_new = f * c_prev + i * g
        h_new = o * jnp.tanh(c_new)
        return h_new, c_new

    h1 = jnp.zeros((B, H), f32)
    c1 = jnp.zeros((B, H), f32)
    h2 = jnp.zeros((B, H), f32)
    c2 = jnp.zeros((B, H), f32)

    # ---- recurrence: fully unrolled (T small & static), 3 small MXU dots per step ----
    for t in range(T):
        # Layer-2 recurrent partial depends only on step t-1 state: issue it before the
        # layer-1 nonlinearities so it overlaps with layer-1 EUP/VPU work.
        g2_rec = jnp.dot(h2.astype(cdt), whh2_ref[...], preferred_element_type=f32)

        g1 = xproj_sc[t] + jnp.dot(h1.astype(cdt), whh1_ref[...],
                                   preferred_element_type=f32)
        h1, c1 = gates_to_hc(g1, c1)

        g2 = g2_rec + jnp.dot(h1.astype(cdt), wih2_ref[...],
                              preferred_element_type=f32) + b2v
        h2, c2 = gates_to_hc(g2, c2)

    # ---- last timestep: Linear -> Softmax (runs once; f32, exact reciprocal) ----
    logits = jnp.dot(h2, wfc_ref[...], preferred_element_type=f32) + bfc_ref[...]
    m = jnp.max(logits, axis=1, keepdims=True)
    e = jnp.exp(logits - m)
    probs = e * pl.reciprocal(jnp.sum(e, axis=1, keepdims=True), approx=False)
    out_ref[...] = probs.astype(out_ref.dtype)


def _reorder_gates(w):
    """Permute last-axis gate blocks from PyTorch order [i,f,g,o] to kernel order [i,f,o,g]."""
    i, f, g, o = jnp.split(w, 4, axis=-1)
    return jnp.concatenate([i, f, o, g], axis=-1)


def prepare_params(params, compute_dtype=jnp.bfloat16):
    """One-time param prep: gate-column permutation + bf16 cast of MXU weights."""
    return {
        "wih1": _reorder_gates(params["wih1"]).astype(compute_dtype),
        "whh1": _reorder_gates(params["whh1"]).astype(compute_dtype),
        "b1":   _reorder_gates(params["b1"]),
        "wih2": _reorder_gates(params["wih2"]).astype(compute_dtype),
        "whh2": _reorder_gates(params["whh2"]).astype(compute_dtype),
        "b2":   _reorder_gates(params["b2"]),
        "wfc":  params["wfc"],
        "bfc":  params["bfc"],
    }


def _vmem_budget_bytes(B, T, D, H, O):
    """Resident footprint (x + xproj scratch + weights + out) with headroom."""
    resident = (T * B * D * 4 +                 # x (f32)
                T * B * 4 * H * 4 +             # xproj scratch (f32)
                (D + 3 * H) * 4 * H * 2 +       # wih1, whh1, wih2, whh2 (bf16)
                2 * 4 * H * 4 +                 # b1, b2 (f32)
                H * O * 4 + O * 4 +             # fc (f32)
                B * O * 4)                      # out (f32)
    return int(max(16 << 20, min(3 * resident, 48 << 20)))


@jax.jit
def temporal_lstm_forward(x, kparams):
    """x: (B, T, D) float32, batch_first like the PyTorch module. kparams: prepare_params output."""
    B, T, D = x.shape
    H = kparams["whh1"].shape[0]
    O = kparams["wfc"].shape[1]

    # Layout plumbing (not compute): present the sequence time-major so the kernel's
    # per-step activation read is a contiguous leading-index load.
    x_tm = jnp.transpose(x, (1, 0, 2))          # (T, B, D)

    vmem = pl.BlockSpec(memory_space=pltpu.MemorySpace.VMEM)   # whole array, in VMEM once
    return pl.pallas_call(
        _lstm_kernel,
        out_shape=jax.ShapeDtypeStruct((B, O), jnp.float32),
        in_specs=[vmem] * 9,
        out_specs=vmem,
        scratch_shapes=[pltpu.VMEM((T, B, 4 * H), jnp.float32)],
        compiler_params=pltpu.CompilerParams(
            vmem_limit_bytes=_vmem_budget_bytes(B, T, D, H, O)),
    )(x_tm,
      kparams["wih1"], kparams["whh1"], kparams["b1"],
      kparams["wih2"], kparams["whh2"], kparams["b2"],
      kparams["wfc"], kparams["bfc"])


def make_params(key, input_dim, hidden_dim, output_dim):
    """Deterministic synthetic init (PyTorch-style U(-1/sqrt(H), 1/sqrt(H))).

    Weights are stored pre-transposed (in_features, 4H); b1/b2 correspond to
    (b_ih + b_hh); gate columns are in PyTorch order [i, f, g, o]."""
    k = 1.0 / jnp.sqrt(jnp.float32(hidden_dim))
    keys = jax.random.split(key, 8)
    u = lambda kk, shape: jax.random.uniform(kk, shape, jnp.float32, -k, k)
    return {
        "wih1": u(keys[0], (input_dim, 4 * hidden_dim)),
        "whh1": u(keys[1], (hidden_dim, 4 * hidden_dim)),
        "b1":   u(keys[2], (1, 4 * hidden_dim)),
        "wih2": u(keys[3], (hidden_dim, 4 * hidden_dim)),
        "whh2": u(keys[4], (hidden_dim, 4 * hidden_dim)),
        "b2":   u(keys[5], (1, 4 * hidden_dim)),
        "wfc":  u(keys[6], (hidden_dim, output_dim)),
        "bfc":  u(keys[7], (1, output_dim)),
    }


def temporal_lstm_ref(x, params):
    """Pure-JAX f32 reference mirroring the PyTorch forward (PyTorch gate order)."""
    B, T, D = x.shape
    H = params["whh1"].shape[0]

    def cell(gates, c):
        i, f, g, o = jnp.split(gates, 4, axis=1)
        c = jax.nn.sigmoid(f) * c + jax.nn.sigmoid(i) * jnp.tanh(g)
        h = jax.nn.sigmoid(o) * jnp.tanh(c)
        return h, c

    def step(carry, x_t):
        h1, c1, h2, c2 = carry
        g1 = x_t @ params["wih1"] + h1 @ params["whh1"] + params["b1"]
        h1, c1 = cell(g1, c1)
        g2 = h1 @ params["wih2"] + h2 @ params["whh2"] + params["b2"]
        h2, c2 = cell(g2, c2)
        return (h1, c1, h2, c2), None

    init = tuple(jnp.zeros((B, H), jnp.float32) for _ in range(4))
    (h1, c1, h2, c2), _ = jax.lax.scan(step, init, jnp.transpose(x, (1, 0, 2)))
    logits = h2 @ params["wfc"] + params["bfc"]
    return jax.nn.softmax(logits, axis=1)


if __name__ == "__main__":
    # Small shapes consistent with the module's forward: (B, T, input_dim).
    batch, seq, input_dim, hidden_dim, output_dim = 2, 8, 128, 128, 2

    key = jax.random.PRNGKey(0)
    kx, kp = jax.random.split(key)
    x = jax.random.normal(kx, (batch, seq, input_dim), jnp.float32)
    params = make_params(kp, input_dim, hidden_dim, output_dim)
    kparams = prepare_params(params)

    out = jax.block_until_ready(temporal_lstm_forward(x, kparams))
    ref = jax.block_until_ready(temporal_lstm_ref(x, params))

    assert out.shape == (batch, output_dim)
    assert jnp.allclose(jnp.sum(out, axis=1), 1.0, atol=1e-5)
    # Kernel feeds bf16 operands to the MXU (f32 accumulate / state); compare to the
    # pure-f32 reference with a bf16-appropriate tolerance on the probabilities.
    assert jnp.allclose(out, ref, atol=2e-2)

    print("KERNEL_OK")
</pallas_src>

<mosaic_0001>
module attributes {stable_mosaic.version = 11 : i64} {
  func.func @_lstm_kernel(%arg0: memref<8x2x128xf32, #tpu.memory_space<vmem>>, %arg1: memref<128x512xbf16, #tpu.memory_space<vmem>>, %arg2: memref<128x512xbf16, #tpu.memory_space<vmem>>, %arg3: memref<1x512xf32, #tpu.memory_space<vmem>>, %arg4: memref<128x512xbf16, #tpu.memory_space<vmem>>, %arg5: memref<128x512xbf16, #tpu.memory_space<vmem>>, %arg6: memref<1x512xf32, #tpu.memory_space<vmem>>, %arg7: memref<128x2xf32, #tpu.memory_space<vmem>>, %arg8: memref<1x2xf32, #tpu.memory_space<vmem>>, %arg9: memref<2x2xf32, #tpu.memory_space<vmem>>, %arg10: memref<8x2x512xf32, #tpu.memory_space<vmem>>) attributes {dimension_semantics = [], scalar_prefetch = 0 : i64, scratch_operands = 1 : i64, tpu.core_type = #tpu.core_type<tc>} {
    %c0 = arith.constant 0 : index
    %c0_0 = arith.constant 0 : index
    %c0_1 = arith.constant 0 : index
    %0 = vector.load %arg0[%c0, %c0_0, %c0_1] : memref<8x2x128xf32, #tpu.memory_space<vmem>>, vector<8x2x128xf32>
    %1 = vector.shape_cast %0 : vector<8x2x128xf32> to vector<16x128xf32>
    %2 = arith.truncf %1 : vector<16x128xf32> to vector<16x128xbf16>
    %c0_2 = arith.constant 0 : index
    %c0_3 = arith.constant 0 : index
    %3 = vector.load %arg1[%c0_2, %c0_3] : memref<128x512xbf16, #tpu.memory_space<vmem>>, vector<128x512xbf16>
    %cst = arith.constant dense<0.000000e+00> : vector<16x512xf32>
    %4 = tpu.matmul %2, %3, %cst {dimension_numbers = #tpu.dot_dimension_numbers<[1], [0], [0], [1], [0, 0, 1, 1], [], []>} : vector<16x128xbf16>, vector<128x512xbf16>, vector<16x512xf32> -> vector<16x512xf32>
    %c0_4 = arith.constant 0 : index
    %c0_5 = arith.constant 0 : index
    %5 = vector.load %arg3[%c0_4, %c0_5] : memref<1x512xf32, #tpu.memory_space<vmem>>, vector<1x512xf32>
    %6 = vector.broadcast %5 : vector<1x512xf32> to vector<16x512xf32>
    %7 = arith.addf %4, %6 : vector<16x512xf32>
    %8 = vector.shape_cast %7 : vector<16x512xf32> to vector<8x2x512xf32>
    %c0_6 = arith.constant 0 : index
    %c0_7 = arith.constant 0 : index
    %c0_8 = arith.constant 0 : index
    %9 = vector.load %arg10[%c0_6, %c0_7, %c0_8] : memref<8x2x512xf32, #tpu.memory_space<vmem>>, vector<8x2x512xf32>
    tpu.vector_store %arg10[%c0_6, %c0_7, %c0_8], %8 {strides = array<i32>} : memref<8x2x512xf32, #tpu.memory_space<vmem>>, vector<8x2x512xf32>,
    %c0_9 = arith.constant 0 : index
    %c0_10 = arith.constant 0 : index
    %10 = vector.load %arg6[%c0_9, %c0_10] : memref<1x512xf32, #tpu.memory_space<vmem>>, vector<1x512xf32>
    %11 = vector.shape_cast %10 : vector<1x512xf32> to vector<1x512xf32>
    %12 = vector.broadcast %11 : vector<1x512xf32> to vector<2x512xf32>
    %cst_11 = arith.constant 0.000000e+00 : f32
    %13 = vector.broadcast %cst_11 : f32 to vector<2x128xf32>
    %cst_12 = arith.constant 0.000000e+00 : f32
    %14 = vector.broadcast %cst_12 : f32 to vector<2x128xf32>
    %cst_13 = arith.constant 0.000000e+00 : f32
    %15 = vector.broadcast %cst_13 : f32 to vector<2x128xf32>
    %cst_14 = arith.constant 0.000000e+00 : f32
    %16 = vector.broadcast %cst_14 : f32 to vector<2x128xf32>
    %17 = arith.truncf %15 : vector<2x128xf32> to vector<2x128xbf16>
    %c0_15 = arith.constant 0 : index
    %c0_16 = arith.constant 0 : index
    %18 = vector.load %arg5[%c0_15, %c0_16] : memref<128x512xbf16, #tpu.memory_space<vmem>>, vector<128x512xbf16>
    %cst_17 = arith.constant dense<0.000000e+00> : vector<2x512xf32>
    %19 = tpu.matmul %17, %18, %cst_17 {dimension_numbers = #tpu.dot_dimension_numbers<[1], [0], [0], [1], [0, 0, 1, 1], [], []>} : vector<2x128xbf16>, vector<128x512xbf16>, vector<2x512xf32> -> vector<2x512xf32>
    %c0_18 = arith.constant 0 : index
    %c0_19 = arith.constant 0 : index
    %c0_20 = arith.constant 0 : index
    %20 = vector.load %arg10[%c0_18, %c0_19, %c0_20] : memref<8x2x512xf32, #tpu.memory_space<vmem>>, vector<1x2x512xf32>
    %21 = vector.shape_cast %20 : vector<1x2x512xf32> to vector<2x512xf32>
    %22 = arith.truncf %13 : vector<2x128xf32> to vector<2x128xbf16>
    %c0_21 = arith.constant 0 : index
    %c0_22 = arith.constant 0 : index
    %23 = vector.load %arg2[%c0_21, %c0_22] : memref<128x512xbf16, #tpu.memory_space<vmem>>, vector<128x512xbf16>
    %cst_23 = arith.constant dense<0.000000e+00> : vector<2x512xf32>
    %24 = tpu.matmul %22, %23, %cst_23 {dimension_numbers = #tpu.dot_dimension_numbers<[1], [0], [0], [1], [0, 0, 1, 1], [], []>} : vector<2x128xbf16>, vector<128x512xbf16>, vector<2x512xf32> -> vector<2x512xf32>
    %25 = arith.addf %21, %24 : vector<2x512xf32>
    %26 = vector.extract_strided_slice %25 {offsets = [0, 0], sizes = [2, 384], strides = [1, 1]} : vector<2x512xf32> to vector<2x384xf32>
    %27 = arith.negf %26 : vector<2x384xf32>
    %28 = math.exp %27 : vector<2x384xf32>
    %cst_24 = arith.constant 1.000000e+00 : f32
    %29 = vector.broadcast %cst_24 : f32 to vector<2x384xf32>
    %30 = arith.addf %29, %28 : vector<2x384xf32>
    %31 = arith.divf %29, %30 : vector<2x384xf32>
    %32 = vector.extract_strided_slice %25 {offsets = [0, 384], sizes = [2, 128], strides = [1, 1]} : vector<2x512xf32> to vector<2x128xf32>
    %33 = math.tanh %32 : vector<2x128xf32>
    %34 = vector.extract_strided_slice %31 {offsets = [0, 0], sizes = [2, 128], strides = [1, 1]} : vector<2x384xf32> to vector<2x128xf32>
    %35 = vector.extract_strided_slice %31 {offsets = [0, 128], sizes = [2, 128], strides = [1, 1]} : vector<2x384xf32> to vector<2x128xf32>
    %36 = vector.extract_strided_slice %31 {offsets = [0, 256], sizes = [2, 128], strides = [1, 1]} : vector<2x384xf32> to vector<2x128xf32>
    %37 = arith.mulf %35, %14 : vector<2x128xf32>
    %38 = arith.mulf %34, %33 : vector<2x128xf32>
    %39 = arith.addf %37, %38 : vector<2x128xf32>
    %40 = math.tanh %39 : vector<2x128xf32>
    %41 = arith.mulf %36, %40 : vector<2x128xf32>
    %42 = arith.truncf %41 : vector<2x128xf32> to vector<2x128xbf16>
    %c0_25 = arith.constant 0 : index
    %c0_26 = arith.constant 0 : index
    %43 = vector.load %arg4[%c0_25, %c0_26] : memref<128x512xbf16, #tpu.memory_space<vmem>>, vector<128x512xbf16>
    %cst_27 = arith.constant dense<0.000000e+00> : vector<2x512xf32>
    %44 = tpu.matmul %42, %43, %cst_27 {dimension_numbers = #tpu.dot_dimension_numbers<[1], [0], [0], [1], [0, 0, 1, 1], [], []>} : vector<2x128xbf16>, vector<128x512xbf16>, vector<2x512xf32> -> vector<2x512xf32>
    %45 = arith.addf %19, %44 : vector<2x512xf32>
    %46 = arith.addf %45, %12 : vector<2x512xf32>
    %47 = vector.extract_strided_slice %46 {offsets = [0, 0], sizes = [2, 384], strides = [1, 1]} : vector<2x512xf32> to vector<2x384xf32>
    %48 = arith.negf %47 : vector<2x384xf32>
    %49 = math.exp %48 : vector<2x384xf32>
    %cst_28 = arith.constant 1.000000e+00 : f32
    %50 = vector.broadcast %cst_28 : f32 to vector<2x384xf32>
    %51 = arith.addf %50, %49 : vector<2x384xf32>
    %52 = arith.divf %50, %51 : vector<2x384xf32>
    %53 = vector.extract_strided_slice %46 {offsets = [0, 384], sizes = [2, 128], strides = [1, 1]} : vector<2x512xf32> to vector<2x128xf32>
    %54 = math.tanh %53 : vector<2x128xf32>
    %55 = vector.extract_strided_slice %52 {offsets = [0, 0], sizes = [2, 128], strides = [1, 1]} : vector<2x384xf32> to vector<2x128xf32>
    %56 = vector.extract_strided_slice %52 {offsets = [0, 128], sizes = [2, 128], strides = [1, 1]} : vector<2x384xf32> to vector<2x128xf32>
    %57 = vector.extract_strided_slice %52 {offsets = [0, 256], sizes = [2, 128], strides = [1, 1]} : vector<2x384xf32> to vector<2x128xf32>
    %58 = arith.mulf %56, %16 : vector<2x128xf32>
    %59 = arith.mulf %55, %54 : vector<2x128xf32>
    %60 = arith.addf %58, %59 : vector<2x128xf32>
    %61 = math.tanh %60 : vector<2x128xf32>
    %62 = arith.mulf %57, %61 : vector<2x128xf32>
    %63 = arith.truncf %62 : vector<2x128xf32> to vector<2x128xbf16>
    %c0_29 = arith.constant 0 : index
    %c0_30 = arith.constant 0 : index
    %64 = vector.load %arg5[%c0_29, %c0_30] : memref<128x512xbf16, #tpu.memory_space<vmem>>, vector<128x512xbf16>
    %cst_31 = arith.constant dense<0.000000e+00> : vector<2x512xf32>
    %65 = tpu.matmul %63, %64, %cst_31 {dimension_numbers = #tpu.dot_dimension_numbers<[1], [0], [0], [1], [0, 0, 1, 1], [], []>} : vector<2x128xbf16>, vector<128x512xbf16>, vector<2x512xf32> -> vector<2x512xf32>
    %c1 = arith.constant 1 : index
    %c0_32 = arith.constant 0 : index
    %c0_33 = arith.constant 0 : index
    %66 = vector.load %arg10[%c1, %c0_32, %c0_33] : memref<8x2x512xf32, #tpu.memory_space<vmem>>, vector<1x2x512xf32>
    %67 = vector.shape_cast %66 : vector<1x2x512xf32> to vector<2x512xf32>
    %68 = arith.truncf %41 : vector<2x128xf32> to vector<2x128xbf16>
    %c0_34 = arith.constant 0 : index
    %c0_35 = arith.constant 0 : index
    %69 = vector.load %arg2[%c0_34, %c0_35] : memref<128x512xbf16, #tpu.memory_space<vmem>>, vector<128x512xbf16>
    %cst_36 = arith.constant dense<0.000000e+00> : vector<2x512xf32>
    %70 = tpu.matmul %68, %69, %cst_36 {dimension_numbers = #tpu.dot_dimension_numbers<[1], [0], [0], [1], [0, 0, 1, 1], [], []>} : vector<2x128xbf16>, vector<128x512xbf16>, vector<2x512xf32> -> vector<2x512xf32>
    %71 = arith.addf %67, %70 : vector<2x512xf32>
    %72 = vector.extract_strided_slice %71 {offsets = [0, 0], sizes = [2, 384], strides = [1, 1]} : vector<2x512xf32> to vector<2x384xf32>
    %73 = arith.negf %72 : vector<2x384xf32>
    %74 = math.exp %73 : vector<2x384xf32>
    %cst_37 = arith.constant 1.000000e+00 : f32
    %75 = vector.broadcast %cst_37 : f32 to vector<2x384xf32>
    %76 = arith.addf %75, %74 : vector<2x384xf32>
    %77 = arith.divf %75, %76 : vector<2x384xf32>
    %78 = vector.extract_strided_slice %71 {offsets = [0, 384], sizes = [2, 128], strides = [1, 1]} : vector<2x512xf32> to vector<2x128xf32>
    %79 = math.tanh %78 : vector<2x128xf32>
    %80 = vector.extract_strided_slice %77 {offsets = [0, 0], sizes = [2, 128], strides = [1, 1]} : vector<2x384xf32> to vector<2x128xf32>
    %81 = vector.extract_strided_slice %77 {offsets = [0, 128], sizes = [2, 128], strides = [1, 1]} : vector<2x384xf32> to vector<2x128xf32>
    %82 = vector.extract_strided_slice %77 {offsets = [0, 256], sizes = [2, 128], strides = [1, 1]} : vector<2x384xf32> to vector<2x128xf32>
    %83 = arith.mulf %81, %39 : vector<2x128xf32>
    %84 = arith.mulf %80, %79 : vector<2x128xf32>
    %85 = arith.addf %83, %84 : vector<2x128xf32>
    %86 = math.tanh %85 : vector<2x128xf32>
    %87 = arith.mulf %82, %86 : vector<2x128xf32>
    %88 = arith.truncf %87 : vector<2x128xf32> to vector<2x128xbf16>
    %c0_38 = arith.constant 0 : index
    %c0_39 = arith.constant 0 : index
    %89 = vector.load %arg4[%c0_38, %c0_39] : memref<128x512xbf16, #tpu.memory_space<vmem>>, vector<128x512xbf16>
    %cst_40 = arith.constant dense<0.000000e+00> : vector<2x512xf32>
    %90 = tpu.matmul %88, %89, %cst_40 {dimension_numbers = #tpu.dot_dimension_numbers<[1], [0], [0], [1], [0, 0, 1, 1], [], []>} : vector<2x128xbf16>, vector<128x512xbf16>, vector<2x512xf32> -> vector<2x512xf32>
    %91 = arith.addf %65, %90 : vector<2x512xf32>
    %92 = arith.addf %91, %12 : vector<2x512xf32>
    %93 = vector.extract_strided_slice %92 {offsets = [0, 0], sizes = [2, 384], strides = [1, 1]} : vector<2x512xf32> to vector<2x384xf32>
    %94 = arith.negf %93 : vector<2x384xf32>
    %95 = math.exp %94 : vector<2x384xf32>
    %cst_41 = arith.constant 1.000000e+00 : f32
    %96 = vector.broadcast %cst_41 : f32 to vector<2x384xf32>
    %97 = arith.addf %96, %95 : vector<2x384xf32>
    %98 = arith.divf %96, %97 : vector<2x384xf32>
    %99 = vector.extract_strided_slice %92 {offsets = [0, 384], sizes = [2, 128], strides = [1, 1]} : vector<2x512xf32> to vector<2x128xf32>
    %100 = math.tanh %99 : vector<2x128xf32>
    %101 = vector.extract_strided_slice %98 {offsets = [0, 0], sizes = [2, 128], strides = [1, 1]} : vector<2x384xf32> to vector<2x128xf32>
    %102 = vector.extract_strided_slice %98 {offsets = [0, 128], sizes = [2, 128], strides = [1, 1]} : vector<2x384xf32> to vector<2x128xf32>
    %103 = vector.extract_strided_slice %98 {offsets = [0, 256], sizes = [2, 128], strides = [1, 1]} : vector<2x384xf32> to vector<2x128xf32>
    %104 = arith.mulf %102, %60 : vector<2x128xf32>
    %105 = arith.mulf %101, %100 : vector<2x128xf32>
    %106 = arith.addf %104, %105 : vector<2x128xf32>
    %107 = math.tanh %106 : vector<2x128xf32>
    %108 = arith.mulf %103, %107 : vector<2x128xf32>
    %109 = arith.truncf %108 : vector<2x128xf32> to vector<2x128xbf16>
    %c0_42 = arith.constant 0 : index
    %c0_43 = arith.constant 0 : index
    %110 = vector.load %arg5[%c0_42, %c0_43] : memref<128x512xbf16, #tpu.memory_space<vmem>>, vector<128x512xbf16>
    %cst_44 = arith.constant dense<0.000000e+00> : vector<2x512xf32>
    %111 = tpu.matmul %109, %110, %cst_44 {dimension_numbers = #tpu.dot_dimension_numbers<[1], [0], [0], [1], [0, 0, 1, 1], [], []>} : vector<2x128xbf16>, vector<128x512xbf16>, vector<2x512xf32> -> vector<2x512xf32>
    %c2 = arith.constant 2 : index
    %c0_45 = arith.constant 0 : index
    %c0_46 = arith.constant 0 : index
    %112 = vector.load %arg10[%c2, %c0_45, %c0_46] : memref<8x2x512xf32, #tpu.memory_space<vmem>>, vector<1x2x512xf32>
    %113 = vector.shape_cast %112 : vector<1x2x512xf32> to vector<2x512xf32>
    %114 = arith.truncf %87 : vector<2x128xf32> to vector<2x128xbf16>
    %c0_47 = arith.constant 0 : index
    %c0_48 = arith.constant 0 : index
    %115 = vector.load %arg2[%c0_47, %c0_48] : memref<128x512xbf16, #tpu.memory_space<vmem>>, vector<128x512xbf16>
    %cst_49 = arith.constant dense<0.000000e+00> : vector<2x512xf32>
    %116 = tpu.matmul %114, %115, %cst_49 {dimension_numbers = #tpu.dot_dimension_numbers<[1], [0], [0], [1], [0, 0, 1, 1], [], []>} : vector<2x128xbf16>, vector<128x512xbf16>, vector<2x512xf32> -> vector<2x512xf32>
    %117 = arith.addf %113, %116 : vector<2x512xf32>
    %118 = vector.extract_strided_slice %117 {offsets = [0, 0], sizes = [2, 384], strides = [1, 1]} : vector<2x512xf32> to vector<2x384xf32>
    %119 = arith.negf %118 : vector<2x384xf32>
    %120 = math.exp %119 : vector<2x384xf32>
    %cst_50 = arith.constant 1.000000e+00 : f32
    %121 = vector.broadcast %cst_50 : f32 to vector<2x384xf32>
    %122 = arith.addf %121, %120 : vector<2x384xf32>
    %123 = arith.divf %121, %122 : vector<2x384xf32>
    %124 = vector.extract_strided_slice %117 {offsets = [0, 384], sizes = [2, 128], strides = [1, 1]} : vector<2x512xf32> to vector<2x128xf32>
    %125 = math.tanh %124 : vector<2x128xf32>
    %126 = vector.extract_strided_slice %123 {offsets = [0, 0], sizes = [2, 128], strides = [1, 1]} : vector<2x384xf32> to vector<2x128xf32>
    %127 = vector.extract_strided_slice %123 {offsets = [0, 128], sizes = [2, 128], strides = [1, 1]} : vector<2x384xf32> to vector<2x128xf32>
    %128 = vector.extract_strided_slice %123 {offsets = [0, 256], sizes = [2, 128], strides = [1, 1]} : vector<2x384xf32> to vector<2x128xf32>
    %129 = arith.mulf %127, %85 : vector<2x128xf32>
    %130 = arith.mulf %126, %125 : vector<2x128xf32>
    %131 = arith.addf %129, %130 : vector<2x128xf32>
    %132 = math.tanh %131 : vector<2x128xf32>
    %133 = arith.mulf %128, %132 : vector<2x128xf32>
    %134 = arith.truncf %133 : vector<2x128xf32> to vector<2x128xbf16>
    %c0_51 = arith.constant 0 : index
    %c0_52 = arith.constant 0 : index
    %135 = vector.load %arg4[%c0_51, %c0_52] : memref<128x512xbf16, #tpu.memory_space<vmem>>, vector<128x512xbf16>
    %cst_53 = arith.constant dense<0.000000e+00> : vector<2x512xf32>
    %136 = tpu.matmul %134, %135, %cst_53 {dimension_numbers = #tpu.dot_dimension_numbers<[1], [0], [0], [1], [0, 0, 1, 1], [], []>} : vector<2x128xbf16>, vector<128x512xbf16>, vector<2x512xf32> -> vector<2x512xf32>
    %137 = arith.addf %111, %136 : vector<2x512xf32>
    %138 = arith.addf %137, %12 : vector<2x512xf32>
    %139 = vector.extract_strided_slice %138 {offsets = [0, 0], sizes = [2, 384], strides = [1, 1]} : vector<2x512xf32> to vector<2x384xf32>
    %140 = arith.negf %139 : vector<2x384xf32>
    %141 = math.exp %140 : vector<2x384xf32>
    %cst_54 = arith.constant 1.000000e+00 : f32
    %142 = vector.broadcast %cst_54 : f32 to vector<2x384xf32>
    %143 = arith.addf %142, %141 : vector<2x384xf32>
    %144 = arith.divf %142, %143 : vector<2x384xf32>
    %145 = vector.extract_strided_slice %138 {offsets = [0, 384], sizes = [2, 128], strides = [1, 1]} : vector<2x512xf32> to vector<2x128xf32>
    %146 = math.tanh %145 : vector<2x128xf32>
    %147 = vector.extract_strided_slice %144 {offsets = [0, 0], sizes = [2, 128], strides = [1, 1]} : vector<2x384xf32> to vector<2x128xf32>
    %148 = vector.extract_strided_slice %144 {offsets = [0, 128], sizes = [2, 128], strides = [1, 1]} : vector<2x384xf32> to vector<2x128xf32>
    %149 = vector.extract_strided_slice %144 {offsets = [0, 256], sizes = [2, 128], strides = [1, 1]} : vector<2x384xf32> to vector<2x128xf32>
    %150 = arith.mulf %148, %106 : vector<2x128xf32>
    %151 = arith.mulf %147, %146 : vector<2x128xf32>
    %152 = arith.addf %150, %151 : vector<2x128xf32>
    %153 = math.tanh %152 : vector<2x128xf32>
    %154 = arith.mulf %149, %153 : vector<2x128xf32>
    %155 = arith.truncf %154 : vector<2x128xf32> to vector<2x128xbf16>
    %c0_55 = arith.constant 0 : index
    %c0_56 = arith.constant 0 : index
    %156 = vector.load %arg5[%c0_55, %c0_56] : memref<128x512xbf16, #tpu.memory_space<vmem>>, vector<128x512xbf16>
    %cst_57 = arith.constant dense<0.000000e+00> : vector<2x512xf32>
    %157 = tpu.matmul %155, %156, %cst_57 {dimension_numbers = #tpu.dot_dimension_numbers<[1], [0], [0], [1], [0, 0, 1, 1], [], []>} : vector<2x128xbf16>, vector<128x512xbf16>, vector<2x512xf32> -> vector<2x512xf32>
    %c3 = arith.constant 3 : index
    %c0_58 = arith.constant 0 : index
    %c0_59 = arith.constant 0 : index
    %158 = vector.load %arg10[%c3, %c0_58, %c0_59] : memref<8x2x512xf32, #tpu.memory_space<vmem>>, vector<1x2x512xf32>
    %159 = vector.shape_cast %158 : vector<1x2x512xf32> to vector<2x512xf32>
    %160 = arith.truncf %133 : vector<2x128xf32> to vector<2x128xbf16>
    %c0_60 = arith.constant 0 : index
    %c0_61 = arith.constant 0 : index
    %161 = vector.load %arg2[%c0_60, %c0_61] : memref<128x512xbf16, #tpu.memory_space<vmem>>, vector<128x512xbf16>
    %cst_62 = arith.constant dense<0.000000e+00> : vector<2x512xf32>
    %162 = tpu.matmul %160, %161, %cst_62 {dimension_numbers = #tpu.dot_dimension_numbers<[1], [0], [0], [1], [0, 0, 1, 1], [], []>} : vector<2x128xbf16>, vector<128x512xbf16>, vector<2x512xf32> -> vector<2x512xf32>
    %163 = arith.addf %159, %162 : vector<2x512xf32>
    %164 = vector.extract_strided_slice %163 {offsets = [0, 0], sizes = [2, 384], strides = [1, 1]} : vector<2x512xf32> to vector<2x384xf32>
    %165 = arith.negf %164 : vector<2x384xf32>
    %166 = math.exp %165 : vector<2x384xf32>
    %cst_63 = arith.constant 1.000000e+00 : f32
    %167 = vector.broadcast %cst_63 : f32 to vector<2x384xf32>
    %168 = arith.addf %167, %166 : vector<2x384xf32>
    %169 = arith.divf %167, %168 : vector<2x384xf32>
    %170 = vector.extract_strided_slice %163 {offsets = [0, 384], sizes = [2, 128], strides = [1, 1]} : vector<2x512xf32> to vector<2x128xf32>
    %171 = math.tanh %170 : vector<2x128xf32>
    %172 = vector.extract_strided_slice %169 {offsets = [0, 0], sizes = [2, 128], strides = [1, 1]} : vector<2x384xf32> to vector<2x128xf32>
    %173 = vector.extract_strided_slice %169 {offsets = [0, 128], sizes = [2, 128], strides = [1, 1]} : vector<2x384xf32> to vector<2x128xf32>
    %174 = vector.extract_strided_slice %169 {offsets = [0, 256], sizes = [2, 128], strides = [1, 1]} : vector<2x384xf32> to vector<2x128xf32>
    %175 = arith.mulf %173, %131 : vector<2x128xf32>
    %176 = arith.mulf %172, %171 : vector<2x128xf32>
    %177 = arith.addf %175, %176 : vector<2x128xf32>
    %178 = math.tanh %177 : vector<2x128xf32>
    %179 = arith.mulf %174, %178 : vector<2x128xf32>
    %180 = arith.truncf %179 : vector<2x128xf32> to vector<2x128xbf16>
    %c0_64 = arith.constant 0 : index
    %c0_65 = arith.constant 0 : index
    %181 = vector.load %arg4[%c0_64, %c0_65] : memref<128x512xbf16, #tpu.memory_space<vmem>>, vector<128x512xbf16>
    %cst_66 = arith.constant dense<0.000000e+00> : vector<2x512xf32>
    %182 = tpu.matmul %180, %181, %cst_66 {dimension_numbers = #tpu.dot_dimension_numbers<[1], [0], [0], [1], [0, 0, 1, 1], [], []>} : vector<2x128xbf16>, vector<128x512xbf16>, vector<2x512xf32> -> vector<2x512xf32>
    %183 = arith.addf %157, %182 : vector<2x512xf32>
    %184 = arith.addf %183, %12 : vector<2x512xf32>
    %185 = vector.extract_strided_slice %184 {offsets = [0, 0], sizes = [2, 384], strides = [1, 1]} : vector<2x512xf32> to vector<2x384xf32>
    %186 = arith.negf %185 : vector<2x384xf32>
    %187 = math.exp %186 : vector<2x384xf32>
    %cst_67 = arith.constant 1.000000e+00 : f32
    %188 = vector.broadcast %cst_67 : f32 to vector<2x384xf32>
    %189 = arith.addf %188, %187 : vector<2x384xf32>
    %190 = arith.divf %188, %189 : vector<2x384xf32>
    %191 = vector.extract_strided_slice %184 {offsets = [0, 384], sizes = [2, 128], strides = [1, 1]} : vector<2x512xf32> to vector<2x128xf32>
    %192 = math.tanh %191 : vector<2x128xf32>
    %193 = vector.extract_strided_slice %190 {offsets = [0, 0], sizes = [2, 128], strides = [1, 1]} : vector<2x384xf32> to vector<2x128xf32>
    %194 = vector.extract_strided_slice %190 {offsets = [0, 128], sizes = [2, 128], strides = [1, 1]} : vector<2x384xf32> to vector<2x128xf32>
    %195 = vector.extract_strided_slice %190 {offsets = [0, 256], sizes = [2, 128], strides = [1, 1]} : vector<2x384xf32> to vector<2x128xf32>
    %196 = arith.mulf %194, %152 : vector<2x128xf32>
    %197 = arith.mulf %193, %192 : vector<2x128xf32>
    %198 = arith.addf %196, %197 : vector<2x128xf32>
    %199 = math.tanh %198 : vector<2x128xf32>
    %200 = arith.mulf %195, %199 : vector<2x128xf32>
    %201 = arith.truncf %200 : vector<2x128xf32> to vector<2x128xbf16>
    %c0_68 = arith.constant 0 : index
    %c0_69 = arith.constant 0 : index
    %202 = vector.load %arg5[%c0_68, %c0_69] : memref<128x512xbf16, #tpu.memory_space<vmem>>, vector<128x512xbf16>
    %cst_70 = arith.constant dense<0.000000e+00> : vector<2x512xf32>
    %203 = tpu.matmul %201, %202, %cst_70 {dimension_numbers = #tpu.dot_dimension_numbers<[1], [0], [0], [1], [0, 0, 1, 1], [], []>} : vector<2x128xbf16>, vector<128x512xbf16>, vector<2x512xf32> -> vector<2x512xf32>
    %c4 = arith.constant 4 : index
    %c0_71 = arith.constant 0 : index
    %c0_72 = arith.constant 0 : index
    %204 = vector.load %arg10[%c4, %c0_71, %c0_72] : memref<8x2x512xf32, #tpu.memory_space<vmem>>, vector<1x2x512xf32>
    %205 = vector.shape_cast %204 : vector<1x2x512xf32> to vector<2x512xf32>
    %206 = arith.truncf %179 : vector<2x128xf32> to vector<2x128xbf16>
    %c0_73 = arith.constant 0 : index
    %c0_74 = arith.constant 0 : index
    %207 = vector.load %arg2[%c0_73, %c0_74] : memref<128x512xbf16, #tpu.memory_space<vmem>>, vector<128x512xbf16>
    %cst_75 = arith.constant dense<0.000000e+00> : vector<2x512xf32>
    %208 = tpu.matmul %206, %207, %cst_75 {dimension_numbers = #tpu.dot_dimension_numbers<[1], [0], [0], [1], [0, 0, 1, 1], [], []>} : vector<2x128xbf16>, vector<128x512xbf16>, vector<2x512xf32> -> vector<2x512xf32>
    %209 = arith.addf %205, %208 : vector<2x512xf32>
    %210 = vector.extract_strided_slice %209 {offsets = [0, 0], sizes = [2, 384], strides = [1, 1]} : vector<2x512xf32> to vector<2x384xf32>
    %211 = arith.negf %210 : vector<2x384xf32>
    %212 = math.exp %211 : vector<2x384xf32>
    %cst_76 = arith.constant 1.000000e+00 : f32
    %213 = vector.broadcast %cst_76 : f32 to vector<2x384xf32>
    %214 = arith.addf %213, %212 : vector<2x384xf32>
    %215 = arith.divf %213, %214 : vector<2x384xf32>
    %216 = vector.extract_strided_slice %209 {offsets = [0, 384], sizes = [2, 128], strides = [1, 1]} : vector<2x512xf32> to vector<2x128xf32>
    %217 = math.tanh %216 : vector<2x128xf32>
    %218 = vector.extract_strided_slice %215 {offsets = [0, 0], sizes = [2, 128], strides = [1, 1]} : vector<2x384xf32> to vector<2x128xf32>
    %219 = vector.extract_strided_slice %215 {offsets = [0, 128], sizes = [2, 128], strides = [1, 1]} : vector<2x384xf32> to vector<2x128xf32>
    %220 = vector.extract_strided_slice %215 {offsets = [0, 256], sizes = [2, 128], strides = [1, 1]} : vector<2x384xf32> to vector<2x128xf32>
    %221 = arith.mulf %219, %177 : vector<2x128xf32>
    %222 = arith.mulf %218, %217 : vector<2x128xf32>
    %223 = arith.addf %221, %222 : vector<2x128xf32>
    %224 = math.tanh %223 : vector<2x128xf32>
    %225 = arith.mulf %220, %224 : vector<2x128xf32>
    %226 = arith.truncf %225 : vector<2x128xf32> to vector<2x128xbf16>
    %c0_77 = arith.constant 0 : index
    %c0_78 = arith.constant 0 : index
    %227 = vector.load %arg4[%c0_77, %c0_78] : memref<128x512xbf16, #tpu.memory_space<vmem>>, vector<128x512xbf16>
    %cst_79 = arith.constant dense<0.000000e+00> : vector<2x512xf32>
    %228 = tpu.matmul %226, %227, %cst_79 {dimension_numbers = #tpu.dot_dimension_numbers<[1], [0], [0], [1], [0, 0, 1, 1], [], []>} : vector<2x128xbf16>, vector<128x512xbf16>, vector<2x512xf32> -> vector<2x512xf32>
    %229 = arith.addf %203, %228 : vector<2x512xf32>
    %230 = arith.addf %229, %12 : vector<2x512xf32>
    %231 = vector.extract_strided_slice %230 {offsets = [0, 0], sizes = [2, 384], strides = [1, 1]} : vector<2x512xf32> to vector<2x384xf32>
    %232 = arith.negf %231 : vector<2x384xf32>
    %233 = math.exp %232 : vector<2x384xf32>
    %cst_80 = arith.constant 1.000000e+00 : f32
    %234 = vector.broadcast %cst_80 : f32 to vector<2x384xf32>
    %235 = arith.addf %234, %233 : vector<2x384xf32>
    %236 = arith.divf %234, %235 : vector<2x384xf32>
    %237 = vector.extract_strided_slice %230 {offsets = [0, 384], sizes = [2, 128], strides = [1, 1]} : vector<2x512xf32> to vector<2x128xf32>
    %238 = math.tanh %237 : vector<2x128xf32>
    %239 = vector.extract_strided_slice %236 {offsets = [0, 0], sizes = [2, 128], strides = [1, 1]} : vector<2x384xf32> to vector<2x128xf32>
    %240 = vector.extract_strided_slice %236 {offsets = [0, 128], sizes = [2, 128], strides = [1, 1]} : vector<2x384xf32> to vector<2x128xf32>
    %241 = vector.extract_strided_slice %236 {offsets = [0, 256], sizes = [2, 128], strides = [1, 1]} : vector<2x384xf32> to vector<2x128xf32>
    %242 = arith.mulf %240, %198 : vector<2x128xf32>
    %243 = arith.mulf %239, %238 : vector<2x128xf32>
    %244 = arith.addf %242, %243 : vector<2x128xf32>
    %245 = math.tanh %244 : vector<2x128xf32>
    %246 = arith.mulf %241, %245 : vector<2x128xf32>
    %247 = arith.truncf %246 : vector<2x128xf32> to vector<2x128xbf16>
    %c0_81 = arith.constant 0 : index
    %c0_82 = arith.constant 0 : index
    %248 = vector.load %arg5[%c0_81, %c0_82] : memref<128x512xbf16, #tpu.memory_space<vmem>>, vector<128x512xbf16>
    %cst_83 = arith.constant dense<0.000000e+00> : vector<2x512xf32>
    %249 = tpu.matmul %247, %248, %cst_83 {dimension_numbers = #tpu.dot_dimension_numbers<[1], [0], [0], [1], [0, 0, 1, 1], [], []>} : vector<2x128xbf16>, vector<128x512xbf16>, vector<2x512xf32> -> vector<2x512xf32>
    %c5 = arith.constant 5 : index
    %c0_84 = arith.constant 0 : index
    %c0_85 = arith.constant 0 : index
    %250 = vector.load %arg10[%c5, %c0_84, %c0_85] : memref<8x2x512xf32, #tpu.memory_space<vmem>>, vector<1x2x512xf32>
    %251 = vector.shape_cast %250 : vector<1x2x512xf32> to vector<2x512xf32>
    %252 = arith.truncf %225 : vector<2x128xf32> to vector<2x128xbf16>
    %c0_86 = arith.constant 0 : index
    %c0_87 = arith.constant 0 : index
    %253 = vector.load %arg2[%c0_86, %c0_87] : memref<128x512xbf16, #tpu.memory_space<vmem>>, vector<128x512xbf16>
    %cst_88 = arith.constant dense<0.000000e+00> : vector<2x512xf32>
    %254 = tpu.matmul %252, %253, %cst_88 {dimension_numbers = #tpu.dot_dimension_numbers<[1], [0], [0], [1], [0, 0, 1, 1], [], []>} : vector<2x128xbf16>, vector<128x512xbf16>, vector<2x512xf32> -> vector<2x512xf32>
    %255 = arith.addf %251, %254 : vector<2x512xf32>
    %256 = vector.extract_strided_slice %255 {offsets = [0, 0], sizes = [2, 384], strides = [1, 1]} : vector<2x512xf32> to vector<2x384xf32>
    %257 = arith.negf %256 : vector<2x384xf32>
    %258 = math.exp %257 : vector<2x384xf32>
    %cst_89 = arith.constant 1.000000e+00 : f32
    %259 = vector.broadcast %cst_89 : f32 to vector<2x384xf32>
    %260 = arith.addf %259, %258 : vector<2x384xf32>
    %261 = arith.divf %259, %260 : vector<2x384xf32>
    %262 = vector.extract_strided_slice %255 {offsets = [0, 384], sizes = [2, 128], strides = [1, 1]} : vector<2x512xf32> to vector<2x128xf32>
    %263 = math.tanh %262 : vector<2x128xf32>
    %264 = vector.extract_strided_slice %261 {offsets = [0, 0], sizes = [2, 128], strides = [1, 1]} : vector<2x384xf32> to vector<2x128xf32>
    %265 = vector.extract_strided_slice %261 {offsets = [0, 128], sizes = [2, 128], strides = [1, 1]} : vector<2x384xf32> to vector<2x128xf32>
    %266 = vector.extract_strided_slice %261 {offsets = [0, 256], sizes = [2, 128], strides = [1, 1]} : vector<2x384xf32> to vector<2x128xf32>
    %267 = arith.mulf %265, %223 : vector<2x128xf32>
    %268 = arith.mulf %264, %263 : vector<2x128xf32>
    %269 = arith.addf %267, %268 : vector<2x128xf32>
    %270 = math.tanh %269 : vector<2x128xf32>
    %271 = arith.mulf %266, %270 : vector<2x128xf32>
    %272 = arith.truncf %271 : vector<2x128xf32> to vector<2x128xbf16>
    %c0_90 = arith.constant 0 : index
    %c0_91 = arith.constant 0 : index
    %273 = vector.load %arg4[%c0_90, %c0_91] : memref<128x512xbf16, #tpu.memory_space<vmem>>, vector<128x512xbf16>
    %cst_92 = arith.constant dense<0.000000e+00> : vector<2x512xf32>
    %274 = tpu.matmul %272, %273, %cst_92 {dimension_numbers = #tpu.dot_dimension_numbers<[1], [0], [0], [1], [0, 0, 1, 1], [], []>} : vector<2x128xbf16>, vector<128x512xbf16>, vector<2x512xf32> -> vector<2x512xf32>
    %275 = arith.addf %249, %274 : vector<2x512xf32>
    %276 = arith.addf %275, %12 : vector<2x512xf32>
    %277 = vector.extract_strided_slice %276 {offsets = [0, 0], sizes = [2, 384], strides = [1, 1]} : vector<2x512xf32> to vector<2x384xf32>
    %278 = arith.negf %277 : vector<2x384xf32>
    %279 = math.exp %278 : vector<2x384xf32>
    %cst_93 = arith.constant 1.000000e+00 : f32
    %280 = vector.broadcast %cst_93 : f32 to vector<2x384xf32>
    %281 = arith.addf %280, %279 : vector<2x384xf32>
    %282 = arith.divf %280, %281 : vector<2x384xf32>
    %283 = vector.extract_strided_slice %276 {offsets = [0, 384], sizes = [2, 128], strides = [1, 1]} : vector<2x512xf32> to vector<2x128xf32>
    %284 = math.tanh %283 : vector<2x128xf32>
    %285 = vector.extract_strided_slice %282 {offsets = [0, 0], sizes = [2, 128], strides = [1, 1]} : vector<2x384xf32> to vector<2x128xf32>
    %286 = vector.extract_strided_slice %282 {offsets = [0, 128], sizes = [2, 128], strides = [1, 1]} : vector<2x384xf32> to vector<2x128xf32>
    %287 = vector.extract_strided_slice %282 {offsets = [0, 256], sizes = [2, 128], strides = [1, 1]} : vector<2x384xf32> to vector<2x128xf32>
    %288 = arith.mulf %286, %244 : vector<2x128xf32>
    %289 = arith.mulf %285, %284 : vector<2x128xf32>
    %290 = arith.addf %288, %289 : vector<2x128xf32>
    %291 = math.tanh %290 : vector<2x128xf32>
    %292 = arith.mulf %287, %291 : vector<2x128xf32>
    %293 = arith.truncf %292 : vector<2x128xf32> to vector<2x128xbf16>
    %c0_94 = arith.constant 0 : index
    %c0_95 = arith.constant 0 : index
    %294 = vector.load %arg5[%c0_94, %c0_95] : memref<128x512xbf16, #tpu.memory_space<vmem>>, vector<128x512xbf16>
    %cst_96 = arith.constant dense<0.000000e+00> : vector<2x512xf32>
    %295 = tpu.matmul %293, %294, %cst_96 {dimension_numbers = #tpu.dot_dimension_numbers<[1], [0], [0], [1], [0, 0, 1, 1], [], []>} : vector<2x128xbf16>, vector<128x512xbf16>, vector<2x512xf32> -> vector<2x512xf32>
    %c6 = arith.constant 6 : index
    %c0_97 = arith.constant 0 : index
    %c0_98 = arith.constant 0 : index
    %296 = vector.load %arg10[%c6, %c0_97, %c0_98] : memref<8x2x512xf32, #tpu.memory_space<vmem>>, vector<1x2x512xf32>
    %297 = vector.shape_cast %296 : vector<1x2x512xf32> to vector<2x512xf32>
    %298 = arith.truncf %271 : vector<2x128xf32> to vector<2x128xbf16>
    %c0_99 = arith.constant 0 : index
    %c0_100 = arith.constant 0 : index
    %299 = vector.load %arg2[%c0_99, %c0_100] : memref<128x512xbf16, #tpu.memory_space<vmem>>, vector<128x512xbf16>
    %cst_101 = arith.constant dense<0.000000e+00> : vector<2x512xf32>
    %300 = tpu.matmul %298, %299, %cst_101 {dimension_numbers = #tpu.dot_dimension_numbers<[1], [0], [0], [1], [0, 0, 1, 1], [], []>} : vector<2x128xbf16>, vector<128x512xbf16>, vector<2x512xf32> -> vector<2x512xf32>
    %301 = arith.addf %297, %300 : vector<2x512xf32>
    %302 = vector.extract_strided_slice %301 {offsets = [0, 0], sizes = [2, 384], strides = [1, 1]} : vector<2x512xf32> to vector<2x384xf32>
    %303 = arith.negf %302 : vector<2x384xf32>
    %304 = math.exp %303 : vector<2x384xf32>
    %cst_102 = arith.constant 1.000000e+00 : f32
    %305 = vector.broadcast %cst_102 : f32 to vector<2x384xf32>
    %306 = arith.addf %305, %304 : vector<2x384xf32>
    %307 = arith.divf %305, %306 : vector<2x384xf32>
    %308 = vector.extract_strided_slice %301 {offsets = [0, 384], sizes = [2, 128], strides = [1, 1]} : vector<2x512xf32> to vector<2x128xf32>
    %309 = math.tanh %308 : vector<2x128xf32>
    %310 = vector.extract_strided_slice %307 {offsets = [0, 0], sizes = [2, 128], strides = [1, 1]} : vector<2x384xf32> to vector<2x128xf32>
    %311 = vector.extract_strided_slice %307 {offsets = [0, 128], sizes = [2, 128], strides = [1, 1]} : vector<2x384xf32> to vector<2x128xf32>
    %312 = vector.extract_strided_slice %307 {offsets = [0, 256], sizes = [2, 128], strides = [1, 1]} : vector<2x384xf32> to vector<2x128xf32>
    %313 = arith.mulf %311, %269 : vector<2x128xf32>
    %314 = arith.mulf %310, %309 : vector<2x128xf32>
    %315 = arith.addf %313, %314 : vector<2x128xf32>
    %316 = math.tanh %315 : vector<2x128xf32>
    %317 = arith.mulf %312, %316 : vector<2x128xf32>
    %318 = arith.truncf %317 : vector<2x128xf32> to vector<2x128xbf16>
    %c0_103 = arith.constant 0 : index
    %c0_104 = arith.constant 0 : index
    %319 = vector.load %arg4[%c0_103, %c0_104] : memref<128x512xbf16, #tpu.memory_space<vmem>>, vector<128x512xbf16>
    %cst_105 = arith.constant dense<0.000000e+00> : vector<2x512xf32>
    %320 = tpu.matmul %318, %319, %cst_105 {dimension_numbers = #tpu.dot_dimension_numbers<[1], [0], [0], [1], [0, 0, 1, 1], [], []>} : vector<2x128xbf16>, vector<128x512xbf16>, vector<2x512xf32> -> vector<2x512xf32>
    %321 = arith.addf %295, %320 : vector<2x512xf32>
    %322 = arith.addf %321, %12 : vector<2x512xf32>
    %323 = vector.extract_strided_slice %322 {offsets = [0, 0], sizes = [2, 384], strides = [1, 1]} : vector<2x512xf32> to vector<2x384xf32>
    %324 = arith.negf %323 : vector<2x384xf32>
    %325 = math.exp %324 : vector<2x384xf32>
    %cst_106 = arith.constant 1.000000e+00 : f32
    %326 = vector.broadcast %cst_106 : f32 to vector<2x384xf32>
    %327 = arith.addf %326, %325 : vector<2x384xf32>
    %328 = arith.divf %326, %327 : vector<2x384xf32>
    %329 = vector.extract_strided_slice %322 {offsets = [0, 384], sizes = [2, 128], strides = [1, 1]} : vector<2x512xf32> to vector<2x128xf32>
    %330 = math.tanh %329 : vector<2x128xf32>
    %331 = vector.extract_strided_slice %328 {offsets = [0, 0], sizes = [2, 128], strides = [1, 1]} : vector<2x384xf32> to vector<2x128xf32>
    %332 = vector.extract_strided_slice %328 {offsets = [0, 128], sizes = [2, 128], strides = [1, 1]} : vector<2x384xf32> to vector<2x128xf32>
    %333 = vector.extract_strided_slice %328 {offsets = [0, 256], sizes = [2, 128], strides = [1, 1]} : vector<2x384xf32> to vector<2x128xf32>
    %334 = arith.mulf %332, %290 : vector<2x128xf32>
    %335 = arith.mulf %331, %330 : vector<2x128xf32>
    %336 = arith.addf %334, %335 : vector<2x128xf32>
    %337 = math.tanh %336 : vector<2x128xf32>
    %338 = arith.mulf %333, %337 : vector<2x128xf32>
    %339 = arith.truncf %338 : vector<2x128xf32> to vector<2x128xbf16>
    %c0_107 = arith.constant 0 : index
    %c0_108 = arith.constant 0 : index
    %340 = vector.load %arg5[%c0_107, %c0_108] : memref<128x512xbf16, #tpu.memory_space<vmem>>, vector<128x512xbf16>
    %cst_109 = arith.constant dense<0.000000e+00> : vector<2x512xf32>
    %341 = tpu.matmul %339, %340, %cst_109 {dimension_numbers = #tpu.dot_dimension_numbers<[1], [0], [0], [1], [0, 0, 1, 1], [], []>} : vector<2x128xbf16>, vector<128x512xbf16>, vector<2x512xf32> -> vector<2x512xf32>
    %c7 = arith.constant 7 : index
    %c0_110 = arith.constant 0 : index
    %c0_111 = arith.constant 0 : index
    %342 = vector.load %arg10[%c7, %c0_110, %c0_111] : memref<8x2x512xf32, #tpu.memory_space<vmem>>, vector<1x2x512xf32>
    %343 = vector.shape_cast %342 : vector<1x2x512xf32> to vector<2x512xf32>
    %344 = arith.truncf %317 : vector<2x128xf32> to vector<2x128xbf16>
    %c0_112 = arith.constant 0 : index
    %c0_113 = arith.constant 0 : index
    %345 = vector.load %arg2[%c0_112, %c0_113] : memref<128x512xbf16, #tpu.memory_space<vmem>>, vector<128x512xbf16>
    %cst_114 = arith.constant dense<0.000000e+00> : vector<2x512xf32>
    %346 = tpu.matmul %344, %345, %cst_114 {dimension_numbers = #tpu.dot_dimension_numbers<[1], [0], [0], [1], [0, 0, 1, 1], [], []>} : vector<2x128xbf16>, vector<128x512xbf16>, vector<2x512xf32> -> vector<2x512xf32>
    %347 = arith.addf %343, %346 : vector<2x512xf32>
    %348 = vector.extract_strided_slice %347 {offsets = [0, 0], sizes = [2, 384], strides = [1, 1]} : vector<2x512xf32> to vector<2x384xf32>
    %349 = arith.negf %348 : vector<2x384xf32>
    %350 = math.exp %349 : vector<2x384xf32>
    %cst_115 = arith.constant 1.000000e+00 : f32
    %351 = vector.broadcast %cst_115 : f32 to vector<2x384xf32>
    %352 = arith.addf %351, %350 : vector<2x384xf32>
    %353 = arith.divf %351, %352 : vector<2x384xf32>
    %354 = vector.extract_strided_slice %347 {offsets = [0, 384], sizes = [2, 128], strides = [1, 1]} : vector<2x512xf32> to vector<2x128xf32>
    %355 = math.tanh %354 : vector<2x128xf32>
    %356 = vector.extract_strided_slice %353 {offsets = [0, 0], sizes = [2, 128], strides = [1, 1]} : vector<2x384xf32> to vector<2x128xf32>
    %357 = vector.extract_strided_slice %353 {offsets = [0, 128], sizes = [2, 128], strides = [1, 1]} : vector<2x384xf32> to vector<2x128xf32>
    %358 = vector.extract_strided_slice %353 {offsets = [0, 256], sizes = [2, 128], strides = [1, 1]} : vector<2x384xf32> to vector<2x128xf32>
    %359 = arith.mulf %357, %315 : vector<2x128xf32>
    %360 = arith.mulf %356, %355 : vector<2x128xf32>
    %361 = arith.addf %359, %360 : vector<2x128xf32>
    %362 = math.tanh %361 : vector<2x128xf32>
    %363 = arith.mulf %358, %362 : vector<2x128xf32>
    %364 = arith.truncf %363 : vector<2x128xf32> to vector<2x128xbf16>
    %c0_116 = arith.constant 0 : index
    %c0_117 = arith.constant 0 : index
    %365 = vector.load %arg4[%c0_116, %c0_117] : memref<128x512xbf16, #tpu.memory_space<vmem>>, vector<128x512xbf16>
    %cst_118 = arith.constant dense<0.000000e+00> : vector<2x512xf32>
    %366 = tpu.matmul %364, %365, %cst_118 {dimension_numbers = #tpu.dot_dimension_numbers<[1], [0], [0], [1], [0, 0, 1, 1], [], []>} : vector<2x128xbf16>, vector<128x512xbf16>, vector<2x512xf32> -> vector<2x512xf32>
    %367 = arith.addf %341, %366 : vector<2x512xf32>
    %368 = arith.addf %367, %12 : vector<2x512xf32>
    %369 = vector.extract_strided_slice %368 {offsets = [0, 0], sizes = [2, 384], strides = [1, 1]} : vector<2x512xf32> to vector<2x384xf32>
    %370 = arith.negf %369 : vector<2x384xf32>
    %371 = math.exp %370 : vector<2x384xf32>
    %cst_119 = arith.constant 1.000000e+00 : f32
    %372 = vector.broadcast %cst_119 : f32 to vector<2x384xf32>
    %373 = arith.addf %372, %371 : vector<2x384xf32>
    %374 = arith.divf %372, %373 : vector<2x384xf32>
    %375 = vector.extract_strided_slice %368 {offsets = [0, 384], sizes = [2, 128], strides = [1, 1]} : vector<2x512xf32> to vector<2x128xf32>
    %376 = math.tanh %375 : vector<2x128xf32>
    %377 = vector.extract_strided_slice %374 {offsets = [0, 0], sizes = [2, 128], strides = [1, 1]} : vector<2x384xf32> to vector<2x128xf32>
    %378 = vector.extract_strided_slice %374 {offsets = [0, 128], sizes = [2, 128], strides = [1, 1]} : vector<2x384xf32> to vector<2x128xf32>
    %379 = vector.extract_strided_slice %374 {offsets = [0, 256], sizes = [2, 128], strides = [1, 1]} : vector<2x384xf32> to vector<2x128xf32>
    %380 = arith.mulf %378, %336 : vector<2x128xf32>
    %381 = arith.mulf %377, %376 : vector<2x128xf32>
    %382 = arith.addf %380, %381 : vector<2x128xf32>
    %383 = math.tanh %382 : vector<2x128xf32>
    %384 = arith.mulf %379, %383 : vector<2x128xf32>
    %c0_120 = arith.constant 0 : index
    %c0_121 = arith.constant 0 : index
    %385 = vector.load %arg7[%c0_120, %c0_121] : memref<128x2xf32, #tpu.memory_space<vmem>>, vector<128x2xf32>
    %cst_122 = arith.constant dense<0.000000e+00> : vector<2x2xf32>
    %386 = tpu.matmul %384, %385, %cst_122 {dimension_numbers = #tpu.dot_dimension_numbers<[1], [0], [0], [1], [0, 0, 1, 1], [], []>} : vector<2x128xf32>, vector<128x2xf32>, vector<2x2xf32> -> vector<2x2xf32>
    %c0_123 = arith.constant 0 : index
    %c0_124 = arith.constant 0 : index
    %387 = vector.load %arg8[%c0_123, %c0_124] : memref<1x2xf32, #tpu.memory_space<vmem>>, vector<1x2xf32>
    %388 = vector.broadcast %387 : vector<1x2xf32> to vector<2x2xf32>
    %389 = arith.addf %386, %388 : vector<2x2xf32>
    %cst_125 = arith.constant dense<0xFF800000> : vector<2xf32>
    %390 = vector.multi_reduction <maximumf>, %389, %cst_125 [1] : vector<2x2xf32> to vector<2xf32>
    %391 = vector.shape_cast %390 : vector<2xf32> to vector<2x1xf32>
    %392 = vector.broadcast %391 : vector<2x1xf32> to vector<2x2xf32>
    %393 = arith.subf %389, %392 : vector<2x2xf32>
    %394 = math.exp %393 : vector<2x2xf32>
    %cst_126 = arith.constant dense<0.000000e+00> : vector<2xf32>
    %395 = vector.multi_reduction <add>, %394, %cst_126 [1] : vector<2x2xf32> to vector<2xf32>
    %396 = vector.shape_cast %395 : vector<2xf32> to vector<2x1xf32>
    %397 = tpu.reciprocal %396 : vector<2x1xf32> -> vector<2x1xf32>
    %398 = vector.broadcast %397 : vector<2x1xf32> to vector<2x2xf32>
    %399 = arith.mulf %394, %398 : vector<2x2xf32>
    %c0_127 = arith.constant 0 : index
    %c0_128 = arith.constant 0 : index
    %400 = vector.load %arg9[%c0_127, %c0_128] : memref<2x2xf32, #tpu.memory_space<vmem>>, vector<2x2xf32>
    tpu.vector_store %arg9[%c0_127, %c0_128], %399 {strides = array<i32>} : memref<2x2xf32, #tpu.memory_space<vmem>>, vector<2x2xf32>,
    return
  }
}

</mosaic_0001>

<bundles_post_ra>
// kernel: temporal_lstm_forward.1
= control target key start
LH: loop header
LB: loop body
LE: loop exit
PB: predicated region body
PF: predicated region fallthrough
CT: control target
= control target key end

     0   :  { %14 = vsyncpa [#allocation4], 0  ;;  %s5818_s0 = inlined_call_operand.vmem [shape: f32[8,2,128], index: 0, kind: input, shape index: {}]   ;;  %s5819_s1 = inlined_call_operand.hbm [shape: bf16[128,512], index: 1, kind: input, shape index: {}]   ;;  %s5820_s2 = inlined_call_operand.hbm [shape: bf16[128,512], index: 2, kind: input, shape index: {}]   ;;  %s5821_s3 = inlined_call_operand.vmem [shape: f32[1,512], index: 3, kind: input, shape index: {}]   ;;  %s5822_s4 = inlined_call_operand.hbm [shape: bf16[128,512], index: 4, kind: input, shape index: {}]   ;;  %s5823_s5 = inlined_call_operand.hbm [shape: bf16[128,512], index: 5, kind: input, shape index: {}]   ;;  %s5824_s6 = inlined_call_operand.vmem [shape: f32[1,512], index: 6, kind: input, shape index: {}]   ;;  %s5825_s7 = inlined_call_operand.vmem [shape: f32[128,2], index: 7, kind: input, shape index: {}]   ;;  %s5826_s8 = inlined_call_operand.vmem [shape: f32[1,2], index: 8, kind: input, shape index: {}]   ;;  %s5827_s9 = inlined_call_operand.hbm [shape: f32[2,2], index: 9, kind: output, shape index: {}]  }
   0x1   :  { %15 = vsyncpa [#allocation7], 0 }
   0x2   :  { %16 = vsyncpa [#allocation10], 0 }
   0x3   :  { %17 = vsyncpa [#allocation5], 0  ;;  %s37_s11 = sshll.u32 %s5820_s2, 4  ;;  %s4307_s12 = smov [#allocation6]   ;;  %s38_s11 = int_to_ptr.hbm [resolvable:$true] %s37_s11 }
   0x4   :  { %s39_s13 = sshll.u32 %s4307_s12, 4  ;;  %s24_s16 = sshll.u32 %s5819_s1, 4  ;;  %s40_s13 = int_to_ptr.vmem [resolvable:$true] %s39_s13  ;;  %s25_s16 = int_to_ptr.hbm [resolvable:$true] %s24_s16 }
   0x5   :  { %s4308_s17 = smov 256   ;;  %s4309_s18 = smov 16  }
   0x6   :  { %45 = dma.hbm_to_vmem [thread:$0]  %s38_s11, 4096, %s40_s13, [#allocation7], %s4308_s17, %s4308_s17, %s4309_s18  }
   0x7   :  { %s4310_s19 = smov [#allocation3]   ;;  %s52_s23 = sshll.u32 %s5822_s4, 4  ;;  %s53_s23 = int_to_ptr.hbm [resolvable:$true] %s52_s23 }
   0x8   :  { %s26_s20 = sshll.u32 %s4310_s19, 4  ;;  %s65_s25 = sshll.u32 %s5823_s5, 4  ;;  %s27_s20 = int_to_ptr.vmem [resolvable:$true] %s26_s20  ;;  %s66_s25 = int_to_ptr.hbm [resolvable:$true] %s65_s25 }
   0x9   :  { %32 = dma.hbm_to_vmem [thread:$0]  %s25_s16, 4096, %s27_s20, [#allocation4], %s4308_s17, %s4308_s17, %s4309_s18  }
   0xa   :  { %s4311_s26 = smov [#allocation8]   ;;  %s4312_s1 = smov [#allocation9]  }
   0xb   :  { %s54_s27 = sshll.u32 %s4311_s26, 4  ;;  %s67_s28 = sshll.u32 %s4312_s1, 4  ;;  %s55_s27 = int_to_ptr.vmem [resolvable:$true] %s54_s27  ;;  %s68_s28 = int_to_ptr.vmem [resolvable:$true] %s67_s28 }
   0xc   :  { %60 = dma.hbm_to_vmem [thread:$0]  %s53_s23, 4096, %s55_s27, [#allocation7], %s4308_s17, %s4308_s17, %s4309_s18  }
   0xd   :  { %73 = dma.hbm_to_vmem [thread:$0]  %s66_s25, 4096, %s68_s28, [#allocation10], %s4308_s17, %s4308_s17, %s4309_s18  }
   0xe   :  { %4299 = dma.done.wait [#allocation4], 4096  }
   0xf   :  { %4300 = vsyncadd [#allocation4], 4294963200 }
  0x10   :  { %4301 = dma.done.wait [#allocation7], 8192  }
  0x11   :  { %4302 = vsyncadd [#allocation7], 4294959104 }
  0x12   :  { %4303 = dma.done.wait [#allocation10], 4096  }
  0x13   :  { %4304 = vsyncadd [#allocation10], 4294963200  ;;  %v3416_v0 = vld [vmem:[#allocation3 + $0xe0] sm:$0xf]  ;;  %v3876_v1 = vld [vmem:[#allocation3 + $0xec] sm:$0xf0] }
  0x14   :  { %v3874_v2 = vld [vmem:[#allocation3 + $0xe4] sm:$0xf]  ;;  %v3417_v3 = vor.u32 %v3876_v1, %v3416_v0  ;;  %v3418_v4 = vld [vmem:[#allocation3 + $0xf0] sm:$0xf0]  ;;  %v3424_v5 = vld [vmem:[#allocation3 + $0xe8] sm:$0xf] }
  0x15   :  { %v3877_v6 = vld [vmem:[#allocation3 + $0xf4] sm:$0xf0]  ;;  %v3421_v7 = vor.u32 %v3874_v2, %v3418_v4  ;;  %v3875_v9 = vld [vmem:[#allocation3 + $0xec] sm:$0xf]  ;;  %v3426_v10 = vld [vmem:[#allocation3 + $0xf8] sm:$0xf0] }
  0x16   :  { %v3425_v8 = vor.u32 %v3877_v6, %v3424_v5  ;;  %v3400_v11 = vld [vmem:[#allocation3 + $0xc0] sm:$0xf]  ;;  %335 = vmatpush.bf16.msra.mxu0 %v3417_v3  ;;  %v3429_v12 = vor.u32 %v3875_v9, %v3426_v10  ;;  %v3872_v13 = vld [vmem:[#allocation3 + $0xcc] sm:$0xf0]  ;;  %v3870_v14 = vld [vmem:[#allocation3 + $0xc4] sm:$0xf] }
  0x17   :  { %v3402_v15 = vld [vmem:[#allocation3 + $0xd0] sm:$0xf0]  ;;  %349 = vmatpush.bf16.msra.mxu1 %v3421_v7  ;;  %v3401_v16 = vor.u32 %v3872_v13, %v3400_v11  ;;  %v3408_v18 = vld [vmem:[#allocation3 + $0xc8] sm:$0xf]  ;;  %v3873_v19 = vld [vmem:[#allocation3 + $0xd4] sm:$0xf0] }
  0x18   :  { %363 = vmatpush.bf16.msra.mxu2 %v3425_v8  ;;  %v3405_v17 = vor.u32 %v3870_v14, %v3402_v15  ;;  %v3871_v20 = vld [vmem:[#allocation3 + $0xcc] sm:$0xf]  ;;  %377 = vmatpush.bf16.msra.mxu3 %v3429_v12  ;;  %v3409_v21 = vor.u32 %v3873_v19, %v3408_v18  ;;  %v3410_v22 = vld [vmem:[#allocation3 + $0xd8] sm:$0xf0]  ;;  %v3384_v23 = vld [vmem:[#allocation3 + $0xa0] sm:$0xf] }
  0x19   :  { %v3868_v24 = vld [vmem:[#allocation3 + $0xac] sm:$0xf0]  ;;  %v3413_v25 = vor.u32 %v3871_v20, %v3410_v22  ;;  %v3866_v26 = vld [vmem:[#allocation3 + $0xa4] sm:$0xf]  ;;  %v3386_v27 = vld [vmem:[#allocation3 + $0xb0] sm:$0xf0] }
  0x1a   :  { %v3392_v28 = vld [vmem:[#allocation3 + $0xa8] sm:$0xf]  ;;  %336 = vmatpush.bf16.msra.mxu0 %v3401_v16  ;;  %v3385_v29 = vor.u32 %v3868_v24, %v3384_v23  ;;  %v3869_v30 = vld [vmem:[#allocation3 + $0xb4] sm:$0xf0]  ;;  %v3867_v31 = vld [vmem:[#allocation3 + $0xac] sm:$0xf]  ;;  %v3389_v33 = vor.u32 %v3866_v26, %v3386_v27 }
  0x1b   :  { %v3394_v32 = vld [vmem:[#allocation3 + $0xb8] sm:$0xf0]  ;;  %350 = vmatpush.bf16.msra.mxu1 %v3405_v17  ;;  %v3393_v34 = vor.u32 %v3869_v30, %v3392_v28  ;;  %v3368_v35 = vld [vmem:[#allocation3 + $0x80] sm:$0xf]  ;;  %v3864_v36 = vld [vmem:[#allocation3 + $0x8c] sm:$0xf0] }
  0x1c   :  { %364 = vmatpush.bf16.msra.mxu2 %v3409_v21  ;;  %v3862_v37 = vld [vmem:[#allocation3 + $0x84] sm:$0xf]  ;;  %378 = vmatpush.bf16.msra.mxu3 %v3413_v25  ;;  %v3397_v38 = vor.u32 %v3867_v31, %v3394_v32  ;;  %v3370_v39 = vld [vmem:[#allocation3 + $0x90] sm:$0xf0]  ;;  %v3376_v40 = vld [vmem:[#allocation3 + $0x88] sm:$0xf]  ;;  %v3369_v44 = vor.u32 %v3864_v36, %v3368_v35 }
  0x1d   :  { %v3865_v41 = vld [vmem:[#allocation3 + $0x94] sm:$0xf0]  ;;  %v3863_v42 = vld [vmem:[#allocation3 + $0x8c] sm:$0xf]  ;;  %v3378_v43 = vld [vmem:[#allocation3 + $0x98] sm:$0xf0]  ;;  %v3373_v45 = vor.u32 %v3862_v37, %v3370_v39 }
  0x1e   :  { %337 = vmatpush.bf16.msra.mxu0 %v3385_v29  ;;  %v3377_v46 = vor.u32 %v3865_v41, %v3376_v40  ;;  %v3352_v47 = vld [vmem:[#allocation3 + $0x60] sm:$0xf]  ;;  %v3860_v48 = vld [vmem:[#allocation3 + $0x6c] sm:$0xf0]  ;;  %v3858_v49 = vld [vmem:[#allocation3 + $0x64] sm:$0xf]  ;;  %v3381_v50 = vor.u32 %v3863_v42, %v3378_v43 }
  0x1f   :  { %351 = vmatpush.bf16.msra.mxu1 %v3389_v33  ;;  %v3354_v51 = vld [vmem:[#allocation3 + $0x70] sm:$0xf0]  ;;  %v3360_v52 = vld [vmem:[#allocation3 + $0x68] sm:$0xf]  ;;  %v3861_v53 = vld [vmem:[#allocation3 + $0x74] sm:$0xf0]  ;;  %v3353_v56 = vor.u32 %v3860_v48, %v3352_v47 }
  0x20   :  { %365 = vmatpush.bf16.msra.mxu2 %v3393_v34  ;;  %379 = vmatpush.bf16.msra.mxu3 %v3397_v38  ;;  %v3859_v54 = vld [vmem:[#allocation3 + $0x6c] sm:$0xf]  ;;  %v3362_v55 = vld [vmem:[#allocation3 + $0x78] sm:$0xf0]  ;;  %v3357_v57 = vor.u32 %v3858_v49, %v3354_v51  ;;  %v3361_v58 = vor.u32 %v3861_v53, %v3360_v52  ;;  %v3336_v59 = vld [vmem:[#allocation3 + $0x40] sm:$0xf] }
  0x21   :  { %v3856_v60 = vld [vmem:[#allocation3 + $0x4c] sm:$0xf0]  ;;  %v3854_v61 = vld [vmem:[#allocation3 + $0x44] sm:$0xf]  ;;  %v3365_v62 = vor.u32 %v3859_v54, %v3362_v55  ;;  %v3338_v63 = vld [vmem:[#allocation3 + $0x50] sm:$0xf0] }
  0x22   :  { %338 = vmatpush.bf16.msra.mxu0 %v3369_v44  ;;  %v3344_v0 = vld [vmem:[#allocation3 + $0x48] sm:$0xf]  ;;  %v3857_v1 = vld [vmem:[#allocation3 + $0x54] sm:$0xf0]  ;;  %v3855_v2 = vld [vmem:[#allocation3 + $0x4c] sm:$0xf]  ;;  %v3337_v4 = vor.u32 %v3856_v60, %v3336_v59  ;;  %v3341_v6 = vor.u32 %v3854_v61, %v3338_v63 }
  0x23   :  { %352 = vmatpush.bf16.msra.mxu1 %v3373_v45  ;;  %v3346_v3 = vld [vmem:[#allocation3 + $0x58] sm:$0xf0]  ;;  %v3320_v5 = vld [vmem:[#allocation3 + $0x20] sm:$0xf]  ;;  %v3345_v7 = vor.u32 %v3857_v1, %v3344_v0  ;;  %v3852_v8 = vld [vmem:[#allocation3 + $0x2c] sm:$0xf0] }
  0x24   :  { %366 = vmatpush.bf16.msra.mxu2 %v3377_v46  ;;  %380 = vmatpush.bf16.msra.mxu3 %v3381_v50  ;;  %v3850_v9 = vld [vmem:[#allocation3 + $0x24] sm:$0xf]  ;;  %v3322_v10 = vld [vmem:[#allocation3 + $0x30] sm:$0xf0]  ;;  %v3349_v11 = vor.u32 %v3855_v2, %v3346_v3  ;;  %v3328_v12 = vld [vmem:[#allocation3 + $0x28] sm:$0xf]  ;;  %v3321_v18 = vor.u32 %v3852_v8, %v3320_v5 }
  0x25   :  { %v3853_v13 = vld [vmem:[#allocation3 + $0x34] sm:$0xf0]  ;;  %v3851_v14 = vld [vmem:[#allocation3 + $0x2c] sm:$0xf]  ;;  %v3330_v15 = vld [vmem:[#allocation3 + $0x38] sm:$0xf0]  ;;  %v3325_v23 = vor.u32 %v3850_v9, %v3322_v10 }
  0x26   :  { %339 = vmatpush.bf16.msra.mxu0 %v3353_v56  ;;  %v3304_v16 = vld [vmem:[#allocation3] sm:$0xf]  ;;  %v3848_v17 = vld [vmem:[#allocation3 + $0xc] sm:$0xf0]  ;;  %v3846_v19 = vld [vmem:[#allocation3 + $0x4] sm:$0xf]  ;;  %v3329_v24 = vor.u32 %v3853_v13, %v3328_v12  ;;  %v3333_v28 = vor.u32 %v3851_v14, %v3330_v15 }
  0x27   :  { %353 = vmatpush.bf16.msra.mxu1 %v3357_v57  ;;  %v3306_v20 = vld [vmem:[#allocation3 + $0x10] sm:$0xf0]  ;;  %v3312_v21 = vld [vmem:[#allocation3 + $0x8] sm:$0xf]  ;;  %v3849_v22 = vld [vmem:[#allocation3 + $0x14] sm:$0xf0]  ;;  %v3305_v35 = vor.u32 %v3848_v17, %v3304_v16 }
  0x28   :  { %367 = vmatpush.bf16.msra.mxu2 %v3361_v58  ;;  %381 = vmatpush.bf16.msra.mxu3 %v3365_v62  ;;  %v3847_v25 = vld [vmem:[#allocation3 + $0xc] sm:$0xf]  ;;  %v3314_v26 = vld [vmem:[#allocation3 + $0x18] sm:$0xf0]  ;;  %v3544_v27 = vld [vmem:[#allocation6 + $0xe0] sm:$0xf]  ;;  %v3309_v39 = vor.u32 %v3846_v19, %v3306_v20  ;;  %v3313_v40 = vor.u32 %v3849_v22, %v3312_v21 }
  0x29   :  { %v3940_v29 = vld [vmem:[#allocation6 + $0xec] sm:$0xf0]  ;;  %v3938_v30 = vld [vmem:[#allocation6 + $0xe4] sm:$0xf]  ;;  %v3546_v31 = vld [vmem:[#allocation6 + $0xf0] sm:$0xf0]  ;;  %v3317_v44 = vor.u32 %v3847_v25, %v3314_v26 }
  0x2a   :  { %340 = vmatpush.bf16.msra.mxu0 %v3337_v4  ;;  %v3552_v32 = vld [vmem:[#allocation6 + $0xe8] sm:$0xf]  ;;  %v3941_v33 = vld [vmem:[#allocation6 + $0xf4] sm:$0xf0]  ;;  %v3939_v36 = vld [vmem:[#allocation6 + $0xec] sm:$0xf]  ;;  %v4386_v45 = vor.u32 %v3940_v29, %v3544_v27  ;;  %v4391_v51 = vor.u32 %v3938_v30, %v3546_v31 }
  0x2b   :  { %354 = vmatpush.bf16.msra.mxu1 %v3341_v6  ;;  %v97_v34 = vld [vmem:[%s5818_s0] sm:$0x3]  ;;  %v3554_v37 = vld [vmem:[#allocation6 + $0xf8] sm:$0xf0]  ;;  %v98_v38 = vld [vmem:[%s5818_s0 + $0x2] sm:$0x3]  ;;  %v4393_v52 = vor.u32 %v3941_v33, %v3552_v32 }
  0x2c   :  { %368 = vmatpush.bf16.msra.mxu2 %v3345_v7  ;;  %382 = vmatpush.bf16.msra.mxu3 %v3349_v11  ;;  %v3528_v41 = vld [vmem:[#allocation6 + $0xc0] sm:$0xf]  ;;  %v3936_v42 = vld [vmem:[#allocation6 + $0xcc] sm:$0xf0]  ;;  %v99_v43 = vld [vmem:[%s5818_s0 + $0x4] sm:$0x3]  ;;  %v4398_v55 = vor.u32 %v3939_v36, %v3554_v37 }
  0x2d   :  { %v3934_v46 = vld [vmem:[#allocation6 + $0xc4] sm:$0xf]  ;;  %v3530_v47 = vld [vmem:[#allocation6 + $0xd0] sm:$0xf0]  ;;  %v3536_v48 = vld [vmem:[#allocation6 + $0xc8] sm:$0xf]  ;;  %v4410_v60 = vor.u32 %v3936_v42, %v3528_v41 }
  0x2e   :  { %341 = vmatpush.bf16.msra.mxu0 %v3321_v18  ;;  %v3937_v49 = vld [vmem:[#allocation6 + $0xd4] sm:$0xf0]  ;;  %v100_v50 = vld [vmem:[%s5818_s0 + $0x6] sm:$0x3]  ;;  %113 = vst [vmem:[#allocation1] ss:$4 sm:$0xff] %v97_v34  ;;  %v4414_v63 = vor.u32 %v3934_v46, %v3530_v47 }
  0x2f   :  { %355 = vmatpush.bf16.msra.mxu1 %v3325_v23  ;;  %v3935_v53 = vld [vmem:[#allocation6 + $0xcc] sm:$0xf]  ;;  %v101_v54 = vld [vmem:[%s5818_s0 + $0x8] sm:$0x3]  ;;  %115 = vst [vmem:[#allocation1 + $0x1] ss:$4 sm:$0xff] %v98_v38  ;;  %v4416_v0 = vor.u32 %v3937_v49, %v3536_v48 }
  0x30   :  { %369 = vmatpush.bf16.msra.mxu2 %v3329_v24  ;;  %383 = vmatpush.bf16.msra.mxu3 %v3333_v28  ;;  %v3538_v56 = vld [vmem:[#allocation6 + $0xd8] sm:$0xf0]  ;;  %v102_v57 = vld [vmem:[%s5818_s0 + $0xa] sm:$0x3]  ;;  %117 = vst [vmem:[#allocation1 + $0x2] ss:$4 sm:$0xff] %v99_v43 }
  0x31   :  { %v103_v58 = vld [vmem:[%s5818_s0 + $0xc] sm:$0x3]  ;;  %v104_v59 = vld [vmem:[%s5818_s0 + $0xe] sm:$0x3]  ;;  %119 = vst [vmem:[#allocation1 + $0x3] ss:$4 sm:$0xff] %v100_v50  ;;  %v4419_v3 = vor.u32 %v3935_v53, %v3538_v56 }
  0x32   :  { %342 = vmatpush.bf16.msra.mxu0 %v3305_v35  ;;  %121 = vst [vmem:[#allocation1 + $0x20] ss:$4 sm:$0xff] %v101_v54  ;;  %v3512_v61 = vld [vmem:[#allocation6 + $0xa0] sm:$0xf]  ;;  %v3932_v62 = vld [vmem:[#allocation6 + $0xac] sm:$0xf0] }
  0x33   :  { %356 = vmatpush.bf16.msra.mxu1 %v3309_v39  ;;  %123 = vst [vmem:[#allocation1 + $0x21] ss:$4 sm:$0xff] %v102_v57  ;;  %v3930_v1 = vld [vmem:[#allocation6 + $0xa4] sm:$0xf]  ;;  %v3514_v2 = vld [vmem:[#allocation6 + $0xb0] sm:$0xf0]  ;;  %v4422_v8 = vor.u32 %v3932_v62, %v3512_v61 }
  0x34   :  { %370 = vmatpush.bf16.msra.mxu2 %v3313_v40  ;;  %384 = vmatpush.bf16.msra.mxu3 %v3317_v44  ;;  %125 = vst [vmem:[#allocation1 + $0x22] ss:$4 sm:$0xff] %v103_v58  ;;  %v3520_v4 = vld [vmem:[#allocation6 + $0xa8] sm:$0xf]  ;;  %v3933_v5 = vld [vmem:[#allocation6 + $0xb4] sm:$0xf0]  ;;  %v4426_v9 = vor.u32 %v3930_v1, %v3514_v2 }
  0x35   :  { %127 = vst [vmem:[#allocation1 + $0x23] ss:$4 sm:$0xff] %v104_v59  ;;  %v3931_v6 = vld [vmem:[#allocation6 + $0xac] sm:$0xf]  ;;  %v3522_v7 = vld [vmem:[#allocation6 + $0xb8] sm:$0xf0]  ;;  %v4428_v10 = vor.u32 %v3933_v5, %v3520_v4 }
  0x36   :  { %692 = vmatpush.bf16.msrb.mxu0 %v4386_v45  ;;  %v3496_v11 = vld [vmem:[#allocation6 + $0x80] sm:$0xf]  ;;  %v3928_v12 = vld [vmem:[#allocation6 + $0x8c] sm:$0xf0]  ;;  %v4431_v13 = vor.u32 %v3931_v6, %v3522_v7  ;;  %v3926_v14 = vld [vmem:[#allocation6 + $0x84] sm:$0xf] }
  0x37   :  { %705 = vmatpush.bf16.msrb.mxu1 %v4391_v51  ;;  %v3498_v15 = vld [vmem:[#allocation6 + $0x90] sm:$0xf0]  ;;  %v3504_v16 = vld [vmem:[#allocation6 + $0x88] sm:$0xf]  ;;  %v3929_v17 = vld [vmem:[#allocation6 + $0x94] sm:$0xf0]  ;;  %v4434_v20 = vor.u32 %v3928_v12, %v3496_v11 }
  0x38   :  { %718 = vmatpush.bf16.msrb.mxu2 %v4393_v52  ;;  %731 = vmatpush.bf16.msrb.mxu3 %v4398_v55  ;;  %v3927_v18 = vld [vmem:[#allocation6 + $0x8c] sm:$0xf]  ;;  %v128_v19 = vld.sshfl [vmem:[#allocation1] sm:$0xff pattern:$0x73625140]  ;;  %v4439_v25 = vor.u32 %v3926_v14, %v3498_v15  ;;  %v4441_v26 = vor.u32 %v3929_v17, %v3504_v16  ;;  %vm405_vm0 = vcmask 1041408  }
  0x39   :  { %v3506_v21 = vld [vmem:[#allocation6 + $0x98] sm:$0xf0]  ;;  %v3480_v22 = vld [vmem:[#allocation6 + $0x60] sm:$0xf]  ;;  %v3924_v23 = vld [vmem:[#allocation6 + $0x6c] sm:$0xf0] }
  0x3a   :  { %693 = vmatpush.bf16.msrb.mxu0 %v4410_v60  ;;  %v3922_v27 = vld [vmem:[#allocation6 + $0x64] sm:$0xf]  ;;  %v4443_v29 = vor.u32 %v3927_v18, %v3506_v21  ;;  %v3482_v30 = vld [vmem:[#allocation6 + $0x70] sm:$0xf0]  ;;  %v3488_v31 = vld [vmem:[#allocation6 + $0x68] sm:$0xf]  ;;  %v4446_v35 = vor.u32 %v3924_v23, %v3480_v22 }
  0x3b   :  { %706 = vmatpush.bf16.msrb.mxu1 %v4414_v63  ;;  %v3925_v32 = vld [vmem:[#allocation6 + $0x74] sm:$0xf0]  ;;  %v3923_v33 = vld [vmem:[#allocation6 + $0x6c] sm:$0xf]  ;;  %v3490_v34 = vld [vmem:[#allocation6 + $0x78] sm:$0xf0]  ;;  %v4450_v36 = vor.u32 %v3922_v27, %v3482_v30 }
  0x3c   :  { %719 = vmatpush.bf16.msrb.mxu2 %v4416_v0  ;;  %732 = vmatpush.bf16.msrb.mxu3 %v4419_v3  ;;  %v129_v24 = vld.sshfl [vmem:[#allocation1 + $0x20] sm:$0xff pattern:$0x73625140]  ;;  %v4452_v37 = vor.u32 %v3925_v32, %v3488_v31  ;;  %v3464_v38 = vld [vmem:[#allocation6 + $0x40] sm:$0xf]  ;;  %v4455_v41 = vor.u32 %v3923_v33, %v3490_v34  ;;  %vm407_vm1 = vcmask 1045508  }
  0x3d   :  { %v132_v28 = vpack.c.bf16 %v129_v24, %v128_v19  ;;  %v3920_v39 = vld [vmem:[#allocation6 + $0x4c] sm:$0xf0]  ;;  %v3918_v40 = vld [vmem:[#allocation6 + $0x44] sm:$0xf]  ;;  %v3466_v42 = vld [vmem:[#allocation6 + $0x50] sm:$0xf0] }
  0x3e   :  { %694 = vmatpush.bf16.msrb.mxu0 %v4422_v8  ;;  %v3472_v43 = vld [vmem:[#allocation6 + $0x48] sm:$0xf]  ;;  %v3921_v44 = vld [vmem:[#allocation6 + $0x54] sm:$0xf0]  ;;  %v3919_v46 = vld [vmem:[#allocation6 + $0x4c] sm:$0xf]  ;;  %v4458_v48 = vor.u32 %v3920_v39, %v3464_v38  ;;  %v4462_v49 = vor.u32 %v3918_v40, %v3466_v42 }
  0x3f   :  { %707 = vmatpush.bf16.msrb.mxu1 %v4426_v9  ;;  %371 = vmatmul.bf16.vlgmr.msra.gmra.mxu2 %v132_v28  ;;  %v3474_v47 = vld [vmem:[#allocation6 + $0x58] sm:$0xf0]  ;;  %v4464_v50 = vor.u32 %v3921_v44, %v3472_v43  ;;  %v3448_v53 = vld [vmem:[#allocation6 + $0x20] sm:$0xf]  ;;  %v3916_v54 = vld [vmem:[#allocation6 + $0x2c] sm:$0xf0] }
  0x40   :  { %720 = vmatpush.bf16.msrb.mxu2 %v4428_v10  ;;  %733 = vmatpush.bf16.msrb.mxu3 %v4431_v13  ;;  %v3914_v56 = vld [vmem:[#allocation6 + $0x24] sm:$0xf]  ;;  %v4467_v57 = vor.u32 %v3919_v46, %v3474_v47  ;;  %v3450_v58 = vld [vmem:[#allocation6 + $0x30] sm:$0xf0]  ;;  %v3456_v59 = vld [vmem:[#allocation6 + $0x28] sm:$0xf]  ;;  %v4470_v2 = vor.u32 %v3916_v54, %v3448_v53 }
  0x41   :  { %385 = vmatmul.bf16.vlgmr.msra.gmra.mxu3 %v132_v28  ;;  %357 = vmatmul.bf16.vlgmr.msra.gmra.mxu1 %v132_v28  ;;  %v3917_v61 = vld [vmem:[#allocation6 + $0x34] sm:$0xf0]  ;;  %v3915_v62 = vld [vmem:[#allocation6 + $0x2c] sm:$0xf]  ;;  %v3458_v1 = vld [vmem:[#allocation6 + $0x38] sm:$0xf0]  ;;  %v4474_v4 = vor.u32 %v3914_v56, %v3450_v58 }
  0x42   :  { %695 = vmatpush.bf16.msrb.mxu0 %v4434_v20  ;;  %v4476_v5 = vor.u32 %v3917_v61, %v3456_v59  ;;  %v3432_v6 = vld [vmem:[#allocation6] sm:$0xf]  ;;  %v3912_v7 = vld [vmem:[#allocation6 + $0xc] sm:$0xf0]  ;;  %v3910_v11 = vld [vmem:[#allocation6 + $0x4] sm:$0xf]  ;;  %v4479_v12 = vor.u32 %v3915_v62, %v3458_v1 }
  0x43   :  { %708 = vmatpush.bf16.msrb.mxu1 %v4439_v25  ;;  %343 = vmatmul.bf16.vlgmr.msra.gmra.mxu0 %v132_v28  ;;  %v3434_v14 = vld [vmem:[#allocation6 + $0x10] sm:$0xf0]  ;;  %v3440_v15 = vld [vmem:[#allocation6 + $0x8] sm:$0xf]  ;;  %v3913_v16 = vld [vmem:[#allocation6 + $0x14] sm:$0xf0]  ;;  %v4482_v19 = vor.u32 %v3912_v7, %v3432_v6 }
  0x44   :  { %721 = vmatpush.bf16.msrb.mxu2 %v4441_v26  ;;  %734 = vmatpush.bf16.msrb.mxu3 %v4443_v29  ;;  %v3911_v17 = vld [vmem:[#allocation6 + $0xc] sm:$0xf]  ;;  %v3442_v18 = vld [vmem:[#allocation6 + $0x18] sm:$0xf0]  ;;  %v4486_v21 = vor.u32 %v3910_v11, %v3434_v14  ;;  %v4488_v22 = vor.u32 %v3913_v16, %v3440_v15  ;;  %v5828_v24 = vmov 0   ;;  %vm411_vm2 = vcmask 1043458  }
  0x45   :  { %v4491_v23 = vor.u32 %v3911_v17, %v3442_v18  ;;  %v3673_v27 = vld [vmem:[#allocation8 + $0xe0] sm:$0xf]  ;;  %v3972_v28 = vld [vmem:[#allocation8 + $0xec] sm:$0xf0]  ;;  %v3970_v30 = vld [vmem:[#allocation8 + $0xe4] sm:$0xf] }
  0x46   :  { %696 = vmatpush.bf16.msrb.mxu0 %v4446_v35  ;;  %v4501_v31 = vor.u32 %v3972_v28, %v3673_v27  ;;  %v3675_v32 = vld [vmem:[#allocation8 + $0xf0] sm:$0xf0]  ;;  %v3681_v33 = vld [vmem:[#allocation8 + $0xe8] sm:$0xf]  ;;  %v3973_v34 = vld [vmem:[#allocation8 + $0xf4] sm:$0xf0] }
  0x47   :  { %709 = vmatpush.bf16.msrb.mxu1 %v4450_v36  ;;  %5971 = vst [vmem:[#allocation16_spill] sm:$0xff] %v4491_v23  ;;  %v4506_v38 = vld [vmem:[%s5821_s3] sm:$0xf]  ;;  %v4508_v39 = vor.u32 %v3970_v30, %v3675_v32  ;;  %v4510_v40 = vor.u32 %v3973_v34, %v3681_v33  ;;  %v3971_v42 = vld [vmem:[#allocation8 + $0xec] sm:$0xf]  ;;  %vm413_vm3 = vcmask 1045504  }
  0x48   :  { %722 = vmatpush.bf16.msrb.mxu2 %v4452_v37  ;;  %735 = vmatpush.bf16.msrb.mxu3 %v4455_v41  ;;  %5972 = vst [vmem:[#allocation17_spill] sm:$0xff] %v4501_v31  ;;  %v3683_v43 = vld [vmem:[#allocation8 + $0xf8] sm:$0xf0]  ;;  %v3657_v44 = vld [vmem:[#allocation8 + $0xc0] sm:$0xf]  ;;  %v5830_v11 = vperm.slane %v4506_v38, 1 }
  0x49   :  { %5973 = vst [vmem:[#allocation18_spill] sm:$0xff] %v4508_v39  ;;  %v4513_v46 = vor.u32 %v3971_v42, %v3683_v43  ;;  %v3968_v47 = vld [vmem:[#allocation8 + $0xcc] sm:$0xf0]  ;;  %v3966_v53 = vld [vmem:[#allocation8 + $0xc4] sm:$0xf]  ;;  %v5834_v14 = vperm.slane %v4506_v38, 2 }
  0x4a   :  { %697 = vmatpush.bf16.msrb.mxu0 %v4458_v48  ;;  %5974 = vst [vmem:[#allocation19_spill] sm:$0xff] %v4510_v40  ;;  %v3659_v54 = vld [vmem:[#allocation8 + $0xd0] sm:$0xf0]  ;;  %v4517_v56 = vor.u32 %v3968_v47, %v3657_v44  ;;  %v3665_v59 = vld [vmem:[#allocation8 + $0xc8] sm:$0xf]  ;;  %v5835_v32 = vperm.slane %v4506_v38, 3 }
  0x4b   :  { %710 = vmatpush.bf16.msrb.mxu1 %v4462_v49  ;;  %5975 = vst [vmem:[#allocation20_spill] sm:$0xff] %v4513_v46  ;;  %v4519_v58 = vor.u32 %v3966_v53, %v3659_v54  ;;  %v3969_v61 = vld [vmem:[#allocation8 + $0xd4] sm:$0xf0]  ;;  %v3967_v62 = vld [vmem:[#allocation8 + $0xcc] sm:$0xf]  ;;  %v5831_v33 = vperm.slane %v4506_v38, 0 }
  0x4c   :  { %723 = vmatpush.bf16.msrb.mxu2 %v4464_v50  ;;  %736 = vmatpush.bf16.msrb.mxu3 %v4467_v57  ;;  %5976 = vst [vmem:[#allocation21_spill] sm:$0xff] %v4517_v56  ;;  %v4522_v1 = vor.u32 %v3969_v61, %v3665_v59  ;;  %v3667_v6 = vld [vmem:[#allocation8 + $0xd8] sm:$0xf0]  ;;  %v3641_v15 = vld [vmem:[#allocation8 + $0xa0] sm:$0xf]  ;;  %vm409_vm4 = vcmask 1043456  }
  0x4d   :  { %5977 = vst [vmem:[#allocation22_spill] sm:$0xff] %v4519_v58  ;;  %v4524_v7 = vor.u32 %v3967_v62, %v3667_v6  ;;  %v3964_v16 = vld [vmem:[#allocation8 + $0xac] sm:$0xf0]  ;;  %v3962_v17 = vld [vmem:[#allocation8 + $0xa4] sm:$0xf]  ;;  %vm415_vm5 = vcmask 1045506  }
  0x4e   :  { %698 = vmatpush.bf16.msrb.mxu0 %v4470_v2  ;;  %5978 = vst [vmem:[#allocation23_spill] sm:$0xff] %v4522_v1  ;;  %v4532_v18 = vor.u32 %v3964_v16, %v3641_v15  ;;  %v3643_v27 = vld [vmem:[#allocation8 + $0xb0] sm:$0xf0]  ;;  %v3649_v28 = vld [vmem:[#allocation8 + $0xa8] sm:$0xf]  ;;  %s3290_s4 = sshll.u32 %s5827_s9, 4  ;;  %s3291_s4 = int_to_ptr.hbm [resolvable:$true] %s3290_s4 }
  0x4f   :  { %711 = vmatpush.bf16.msrb.mxu1 %v4474_v4  ;;  %5979 = vst [vmem:[#allocation24_spill] sm:$0xff] %v4524_v7  ;;  %v3965_v30 = vld [vmem:[#allocation8 + $0xb4] sm:$0xf0]  ;;  %v4536_v34 = vor.u32 %v3962_v17, %v3643_v27  ;;  %v3963_v43 = vld [vmem:[#allocation8 + $0xac] sm:$0xf] }
  0x50   :  { %724 = vmatpush.bf16.msrb.mxu2 %v4476_v5  ;;  %737 = vmatpush.bf16.msrb.mxu3 %v4479_v12  ;;  %5980 = vst [vmem:[#allocation25_spill] sm:$0xff] %v4532_v18  ;;  %v4538_v42 = vor.u32 %v3965_v30, %v3649_v28  ;;  %v3651_v44 = vld [vmem:[#allocation8 + $0xb8] sm:$0xf0]  ;;  %v3625_v54 = vld [vmem:[#allocation8 + $0x80] sm:$0xf] }
  0x51   :  { %5981 = vst [vmem:[#allocation26_spill] sm:$0xff] %v4536_v34  ;;  %v4541_v47 = vor.u32 %v3963_v43, %v3651_v44  ;;  %v3960_v59 = vld [vmem:[#allocation8 + $0x8c] sm:$0xf0]  ;;  %v3958_v61 = vld [vmem:[#allocation8 + $0x84] sm:$0xf] }
  0x52   :  { %699 = vmatpush.bf16.msrb.mxu0 %v4482_v19  ;;  %5982 = vst [vmem:[#allocation27_spill] sm:$0xff] %v4538_v42  ;;  %v4548_v15 = vor.u32 %v3960_v59, %v3625_v54  ;;  %v3627_v16 = vld [vmem:[#allocation8 + $0x90] sm:$0xf0]  ;;  %v3633_v17 = vld [vmem:[#allocation8 + $0x88] sm:$0xf] }
  0x53   :  { %712 = vmatpush.bf16.msrb.mxu1 %v4486_v21  ;;  %5983 = vst [vmem:[#allocation28_spill] sm:$0xff] %v4541_v47  ;;  %v3961_v27 = vld [vmem:[#allocation8 + $0x94] sm:$0xf0]  ;;  %v4554_v30 = vor.u32 %v3958_v61, %v3627_v16  ;;  %v3959_v44 = vld [vmem:[#allocation8 + $0x8c] sm:$0xf] }
  0x54   :  { %725 = vmatpush.bf16.msrb.mxu2 %v4488_v22  ;;  %738 = vmatpush.bf16.msrb.mxu3 %v4491_v23  ;;  %5984 = vst [vmem:[#allocation29_spill] sm:$0xff] %v4548_v15  ;;  %v4556_v43 = vor.u32 %v3961_v27, %v3633_v17  ;;  %v3609_v61 = vld [vmem:[#allocation8 + $0x60] sm:$0xf]  ;;  %v3954_v16 = vld [vmem:[#allocation8 + $0x64] sm:$0xf] }
  0x55   :  { %700 = vmatmul.bf16.vlgmr.msrb.gmra.mxu0 %v5828_v24  ;;  %5985 = vst [vmem:[#allocation30_spill] sm:$0xff] %v4554_v30  ;;  %v3611_v27 = vld [vmem:[#allocation8 + $0x70] sm:$0xf0] }
  0x56   :  { %713 = vmatmul.bf16.vlgmr.msrb.gmra.mxu1 %v5828_v24  ;;  %982 = vmatpush.bf16.msra.mxu0 %v4501_v31  ;;  %5986 = vst [vmem:[#allocation31_spill] sm:$0xff] %v4556_v43 }
  0x57   :  { %726 = vmatmul.bf16.vlgmr.msrb.gmra.mxu2 %v5828_v24  ;;  %739 = vmatmul.bf16.vlgmr.msrb.gmra.mxu3 %v5828_v24  ;;  %v3635_v24 = vld [vmem:[#allocation8 + $0x98] sm:$0xf0] }
  0x58   :  { %995 = vmatpush.bf16.msra.mxu1 %v4508_v39  ;;  %1008 = vmatpush.bf16.msra.mxu2 %v4510_v40  ;;  %v4561_v54 = vor.u32 %v3959_v44, %v3635_v24  ;;  %v3617_v44 = vld [vmem:[#allocation8 + $0x68] sm:$0xf] }
  0x59   :  { %1021 = vmatpush.bf16.msra.mxu3 %v4513_v46 }
  0x5a   :  { %983 = vmatpush.bf16.msra.mxu0 %v4517_v56  ;;  %5987 = vst [vmem:[#allocation32_spill] sm:$0xff] %v4561_v54  ;;  %v3603_v56 = vld [vmem:[#allocation8 + $0x58] sm:$0xf0] }
  0x5c   :  { %996 = vmatpush.bf16.msra.mxu1 %v4519_v58  ;;  %1009 = vmatpush.bf16.msra.mxu2 %v4522_v1  ;;  %v3951_v58 = vld [vmem:[#allocation8 + $0x4c] sm:$0xf] }
  0x5d   :  { %1022 = vmatpush.bf16.msra.mxu3 %v4524_v7 }
  0x5e   :  { %984 = vmatpush.bf16.msra.mxu0 %v4532_v18  ;;  %v3593_v18 = vld [vmem:[#allocation8 + $0x40] sm:$0xf] }
  0x60   :  { %997 = vmatpush.bf16.msra.mxu1 %v4536_v34  ;;  %1010 = vmatpush.bf16.msra.mxu2 %v4538_v42 }
  0x61   :  { %1023 = vmatpush.bf16.msra.mxu3 %v4541_v47 }
  0x62   :  { %985 = vmatpush.bf16.msra.mxu0 %v4548_v15 }
  0x64   :  { %998 = vmatpush.bf16.msra.mxu1 %v4554_v30  ;;  %1011 = vmatpush.bf16.msra.mxu2 %v4556_v43  ;;  %v3619_v30 = vld [vmem:[#allocation8 + $0x78] sm:$0xf0] }
  0x65   :  { %1024 = vmatpush.bf16.msra.mxu3 %v4561_v54 }
  0xbe   :  { %v358_v53 = vpop.f32.mrf.mxu1 }
  0xbf   :  { %v359_v62 = vadd.f32 %v358_v53, %v5830_v11 }
  0xc0   :  { %v344_v6 = vpop.f32.mrf.mxu0 }
  0xc1   :  { %v4552_v28 = vadd.f32 %v344_v6, %v5831_v33  ;;  %v4558_v53 = vrot.slane %v359_v62, 6  ;;  %v3956_v6 = vld [vmem:[#allocation8 + $0x6c] sm:$0xf0]  ;;  %v3957_v33 = vld [vmem:[#allocation8 + $0x74] sm:$0xf0] }
  0xc2   :  { %v372_v59 = vpop.f32.mrf.mxu2  ;;  %v4587_v47 = vor.u32 %v3957_v33, %v3617_v44  ;;  %v5992_v44 = vperm.slane %v4506_v38, 1 }
  0xc3   :  { %v373_v17 = vadd.f32 %v372_v59, %v5834_v14  ;;  %v412_v24 = vsel %vm411_vm2, %v4552_v28, %v4558_v53  ;;  %v418_v43 = vsel %vm407_vm1, %v4552_v28, %v4558_v53  ;;  %v422_v59 = vsel %vm413_vm3, %v4558_v53, %v4552_v28 }
  0xc4   :  { %v386_v11 = vpop.f32.mrf.mxu3  ;;  %v4579_v14 = vor.u32 %v3956_v6, %v3609_v61  ;;  %5990 = vst [vmem:[#allocation35_spill] sm:$0xff] %v4587_v47  ;;  %v3952_v61 = vld [vmem:[#allocation8 + $0x4c] sm:$0xf0]  ;;  %v3950_v6 = vld [vmem:[#allocation8 + $0x44] sm:$0xf]  ;;  %1012 = vmatpush.bf16.msra.mxu2 %v4587_v47  ;;  %v4614_v47 = vor.u32 %v3951_v58, %v3603_v56  ;;  %v6002_v58 = vperm.slane %v4506_v38, 3 }
  0xc5   :  { %v387_v62 = vadd.f32 %v386_v11, %v5835_v32  ;;  %v4581_v11 = vor.u32 %v3954_v16, %v3611_v27  ;;  %v3955_v32 = vld [vmem:[#allocation8 + $0x6c] sm:$0xf]  ;;  %v4583_v15 = vrot.slane %v373_v17, 4  ;;  %v3953_v27 = vld [vmem:[#allocation8 + $0x54] sm:$0xf0]  ;;  %v4608_v1 = vor.u32 %v3952_v61, %v3593_v18 }
  0xc6   :  { %5988 = vst [vmem:[#allocation33_spill] sm:$0xff] %v4579_v14  ;;  %v4589_v42 = vor.u32 %v3955_v32, %v3619_v30  ;;  %v360_v34 = vpop.f32.mrf.mxu1  ;;  %986 = vmatpush.bf16.msra.mxu0 %v4579_v14  ;;  %v3595_v30 = vld [vmem:[#allocation8 + $0x50] sm:$0xf0]  ;;  %v5993_v14 = vperm.slane %v4506_v38, 0 }
  0xc7   :  { %5989 = vst [vmem:[#allocation34_spill] sm:$0xff] %v4581_v11  ;;  %v4585_v54 = vrot.slane %v387_v62, 2  ;;  %999 = vmatpush.bf16.msra.mxu1 %v4581_v11  ;;  %v3601_v62 = vld [vmem:[#allocation8 + $0x48] sm:$0xf]  ;;  %v361_v11 = vadd.f32 %v360_v34, %v5992_v44  ;;  %v4610_v46 = vor.u32 %v3950_v6, %v3595_v30  ;;  %v6001_v6 = vperm.slane %v4506_v38, 2 }
  0xc8   :  { %5991 = vst [vmem:[#allocation36_spill] sm:$0xff] %v4589_v42  ;;  %v346_v33 = vpop.f32.mrf.mxu0  ;;  %1025 = vmatpush.bf16.msra.mxu3 %v4589_v42  ;;  %v4612_v40 = vor.u32 %v3953_v27, %v3601_v62  ;;  %v3579_v30 = vld [vmem:[#allocation8 + $0x30] sm:$0xf0]  ;;  %v3585_v62 = vld [vmem:[#allocation8 + $0x28] sm:$0xf] }
  0xc9   :  { %v414_v16 = vsel %vm413_vm3, %v4585_v54, %v4583_v15  ;;  %v419_v17 = vsel %vm405_vm0, %v4583_v15, %v4585_v54  ;;  %v423_v32 = vsel %vm411_vm2, %v4583_v15, %v4585_v54  ;;  %v347_v7 = vadd.f32 %v346_v33, %v5993_v14  ;;  %5994 = vst [vmem:[#allocation37_spill] sm:$0xff] %v4608_v1  ;;  %v3577_v14 = vld [vmem:[#allocation8 + $0x20] sm:$0xf]  ;;  %v3948_v33 = vld [vmem:[#allocation8 + $0x2c] sm:$0xf0] }
  0xca   :  { %5995 = vst [vmem:[#allocation38_spill] sm:$0xff] %v4610_v46  ;;  %v4617_v39 = vsel %vm415_vm5, %v412_v24, %v414_v16  ;;  %v402_v31 = vrot.slane %v361_v11, 6  ;;  %v374_v34 = vpop.f32.mrf.mxu2  ;;  %987 = vmatpush.bf16.msra.mxu0 %v4608_v1  ;;  %v4621_v18 = vsel %vm409_vm4, %v419_v17, %v418_v43  ;;  %v4624_v61 = vsel %vm415_vm5, %v423_v32, %v422_v59  ;;  %v3946_v16 = vld [vmem:[#allocation8 + $0x24] sm:$0xf]  ;;  %v3949_v38 = vld [vmem:[#allocation8 + $0x34] sm:$0xf0] }
  0xcb   :  { %5996 = vst [vmem:[#allocation39_spill] sm:$0xff] %v4612_v40  ;;  %v375_v56 = vadd.f32 %v374_v34, %v6001_v6  ;;  %1000 = vmatpush.bf16.msra.mxu1 %v4610_v46  ;;  %1013 = vmatpush.bf16.msra.mxu2 %v4612_v40  ;;  %v4632_v11 = vor.u32 %v3948_v33, %v3577_v14  ;;  %v3947_v27 = vld [vmem:[#allocation8 + $0x2c] sm:$0xf]  ;;  %v3587_v34 = vld [vmem:[#allocation8 + $0x38] sm:$0xf0] }
  0xcc   :  { %5997 = vst [vmem:[#allocation40_spill] sm:$0xff] %v4614_v47  ;;  %v388_v44 = vpop.f32.mrf.mxu3  ;;  %v426_v43 = vsel %vm405_vm0, %v347_v7, %v402_v31  ;;  %v429_v59 = vsel %vm411_vm2, %v347_v7, %v402_v31  ;;  %v433_v17 = vsel %vm407_vm1, %v347_v7, %v402_v31  ;;  %v437_v32 = vsel %vm413_vm3, %v402_v31, %v347_v7  ;;  %v3943_v40 = vld [vmem:[#allocation8 + $0xc] sm:$0xf]  ;;  %v3571_v46 = vld [vmem:[#allocation8 + $0x18] sm:$0xf0] }
  0xcd   :  { %5998 = vst [vmem:[#allocation41_spill] sm:$0xff] %v4617_v39  ;;  %v389_v24 = vadd.f32 %v388_v44, %v6002_v58  ;;  %1026 = vmatpush.bf16.msra.mxu3 %v4614_v47  ;;  %v403_v44 = vrot.slane %v375_v56, 4  ;;  %v4639_v14 = vor.u32 %v3946_v16, %v3579_v30  ;;  %v4641_v33 = vor.u32 %v3949_v38, %v3585_v62  ;;  %v3942_v39 = vld [vmem:[#allocation8 + $0x4] sm:$0xf]  ;;  %v3563_v16 = vld [vmem:[#allocation8 + $0x10] sm:$0xf0] }
  0xce   :  { %5999 = vst [vmem:[#allocation42_spill] sm:$0xff] %v4621_v18  ;;  %988 = vmatpush.bf16.msra.mxu0 %v4632_v11  ;;  %v4644_v58 = vor.u32 %v3947_v27, %v3587_v34  ;;  %v3944_v18 = vld [vmem:[#allocation8 + $0xc] sm:$0xf0]  ;;  %v3569_v30 = vld [vmem:[#allocation8 + $0x8] sm:$0xf]  ;;  %v4655_v34 = vor.u32 %v3942_v39, %v3563_v16  ;;  %v4659_v1 = vor.u32 %v3943_v40, %v3571_v46 }
  0xcf   :  { %6000 = vst [vmem:[#allocation43_spill] sm:$0xff] %v4624_v61  ;;  %v404_v6 = vrot.slane %v389_v24, 2  ;;  %v3561_v61 = vld [vmem:[#allocation8] sm:$0xf]  ;;  %1001 = vmatpush.bf16.msra.mxu1 %v4639_v14  ;;  %v3945_v62 = vld [vmem:[#allocation8 + $0x14] sm:$0xf0]  ;;  %1014 = vmatpush.bf16.msra.mxu2 %v4641_v33 }
  0xd0   :  { %6003 = vst [vmem:[#allocation44_spill] sm:$0xff] %v4632_v11  ;;  %v4653_v27 = vor.u32 %v3944_v18, %v3561_v61  ;;  %v4657_v11 = vor.u32 %v3945_v62, %v3569_v30  ;;  %v3906_v42 = vld [vmem:[#allocation9 + $0xe4] sm:$0xf]  ;;  %v3803_v18 = vld [vmem:[#allocation9 + $0xf0] sm:$0xf0] }
  0xd1   :  { %6004 = vst [vmem:[#allocation45_spill] sm:$0xff] %v4639_v14  ;;  %v427_v31 = vsel %vm407_vm1, %v403_v44, %v404_v6  ;;  %v430_v7 = vsel %vm413_vm3, %v404_v6, %v403_v44  ;;  %v434_v47 = vsel %vm405_vm0, %v403_v44, %v404_v6  ;;  %v438_v56 = vsel %vm411_vm2, %v403_v44, %v404_v6  ;;  %v3801_v44 = vld [vmem:[#allocation9 + $0xe0] sm:$0xf]  ;;  %v3908_v14 = vld [vmem:[#allocation9 + $0xec] sm:$0xf0] }
  0xd2   :  { %6005 = vst [vmem:[#allocation46_spill] sm:$0xff] %v4641_v33  ;;  %v701_v24 = vpop.f32.mrf.mxu0  ;;  %1027 = vmatpush.bf16.msra.mxu3 %v4644_v58  ;;  %v4662_v23 = vsel %vm409_vm4, %v426_v43, %v427_v31  ;;  %989 = vmatpush.bf16.msra.mxu0 %v4653_v27  ;;  %v3809_v39 = vld [vmem:[#allocation9 + $0xe8] sm:$0xf]  ;;  %v3909_v61 = vld [vmem:[#allocation9 + $0xf4] sm:$0xf0]  ;;  %v4668_v16 = vsel %vm415_vm5, %v429_v59, %v430_v7 }
  0xd3   :  { %6006 = vst [vmem:[#allocation47_spill] sm:$0xff] %v4644_v58  ;;  %v714_v38 = vpop.f32.mrf.mxu1  ;;  %v4665_v58 = vor.u32 %v3908_v14, %v3801_v44  ;;  %v4671_v30 = vsel %vm409_vm4, %v434_v47, %v433_v17  ;;  %v4674_v40 = vsel %vm415_vm5, %v438_v56, %v437_v32  ;;  %1002 = vmatpush.bf16.msra.mxu1 %v4655_v34  ;;  %v3907_v14 = vld [vmem:[#allocation9 + $0xec] sm:$0xf]  ;;  %v3811_v31 = vld [vmem:[#allocation9 + $0xf8] sm:$0xf0] }
  0xd4   :  { %6007 = vst [vmem:[#allocation48_spill] sm:$0xff] %v4653_v27  ;;  %v748_v6 = vrot.slane %v714_v38, 6  ;;  %v4677_v46 = vor.u32 %v3906_v42, %v3803_v18  ;;  %v4679_v43 = vor.u32 %v3909_v61, %v3809_v39  ;;  %v3785_v62 = vld [vmem:[#allocation9 + $0xc0] sm:$0xf]  ;;  %1015 = vmatpush.bf16.msra.mxu2 %v4657_v11  ;;  %v4683_v59 = vor.u32 %v3907_v14, %v3811_v31  ;;  %v3904_v47 = vld [vmem:[#allocation9 + $0xcc] sm:$0xf0] }
  0xd5   :  { %6008 = vst [vmem:[#allocation49_spill] sm:$0xff] %v4655_v34  ;;  %v3902_v17 = vld [vmem:[#allocation9 + $0xc4] sm:$0xf]  ;;  %v3787_v7 = vld [vmem:[#allocation9 + $0xd0] sm:$0xf0]  ;;  %v4687_v42 = vor.u32 %v3904_v47, %v3785_v62 }
  0xd6   :  { %6009 = vst [vmem:[#allocation50_spill] sm:$0xff] %v4657_v11  ;;  %1028 = vmatpush.bf16.msra.mxu3 %v4659_v1  ;;  %1194 = vmatpush.bf16.msrb.mxu0 %v4665_v58  ;;  %v4689_v32 = vor.u32 %v3902_v17, %v3787_v7  ;;  %v3793_v56 = vld [vmem:[#allocation9 + $0xc8] sm:$0xf]  ;;  %v3905_v38 = vld [vmem:[#allocation9 + $0xd4] sm:$0xf0]  ;;  %v408_v17 = vsel %vm407_vm1, %v4583_v15, %v4585_v54 }
  0xd7   :  { %6010 = vst [vmem:[#allocation51_spill] sm:$0xff] %v4659_v1  ;;  %1207 = vmatpush.bf16.msrb.mxu1 %v4677_v46  ;;  %v3903_v44 = vld [vmem:[#allocation9 + $0xcc] sm:$0xf]  ;;  %v4693_v39 = vor.u32 %v3905_v38, %v3793_v56  ;;  %v3795_v61 = vld [vmem:[#allocation9 + $0xd8] sm:$0xf0]  ;;  %v406_v7 = vsel %vm405_vm0, %v4552_v28, %v4558_v53 }
  0xd8   :  { %6011 = vst [vmem:[#allocation52_spill] sm:$0xff] %v4662_v23  ;;  %1220 = vmatpush.bf16.msrb.mxu2 %v4679_v43  ;;  %v3769_v62 = vld [vmem:[#allocation9 + $0xa0] sm:$0xf]  ;;  %v3900_v47 = vld [vmem:[#allocation9 + $0xac] sm:$0xf0] }
  0xd9   :  { %6012 = vst [vmem:[#allocation53_spill] sm:$0xff] %v4665_v58  ;;  %v3898_v23 = vld [vmem:[#allocation9 + $0xa4] sm:$0xf]  ;;  %v3901_v15 = vld [vmem:[#allocation9 + $0xb4] sm:$0xf0] }
  0xda   :  { %6013 = vst [vmem:[#allocation54_spill] sm:$0xff] %v4668_v16  ;;  %v727_v18 = vpop.f32.mrf.mxu2  ;;  %1233 = vmatpush.bf16.msrb.mxu3 %v4683_v59  ;;  %v740_v31 = vpop.f32.mrf.mxu3  ;;  %v751_v16 = vsel %vm405_vm0, %v701_v24, %v748_v6  ;;  %1195 = vmatpush.bf16.msrb.mxu0 %v4687_v42  ;;  %v3899_v54 = vld [vmem:[#allocation9 + $0xac] sm:$0xf]  ;;  %v3779_v53 = vld [vmem:[#allocation9 + $0xb8] sm:$0xf0]  ;;  %v410_v24 = vsel %vm409_vm4, %v406_v7, %v408_v17 }
  0xdb   :  { %6014 = vst [vmem:[#allocation55_spill] sm:$0xff] %v4671_v30  ;;  %v749_v14 = vrot.slane %v727_v18, 4  ;;  %v4695_v30 = vor.u32 %v3903_v44, %v3795_v61  ;;  %v750_v56 = vrot.slane %v740_v31, 2  ;;  %v716_v38 = vpop.f32.mrf.mxu1  ;;  %v3771_v18 = vld [vmem:[#allocation9 + $0xb0] sm:$0xf0]  ;;  %1208 = vmatpush.bf16.msrb.mxu1 %v4689_v32  ;;  %v4717_v31 = vor.u32 %v3899_v54, %v3779_v53 }
  0xdc   :  { %6015 = vst [vmem:[#allocation56_spill] sm:$0xff] %v4674_v40  ;;  %v703_v40 = vpop.f32.mrf.mxu0  ;;  %v4708_v44 = vor.u32 %v3898_v23, %v3771_v18  ;;  %v3777_v61 = vld [vmem:[#allocation9 + $0xa8] sm:$0xf]  ;;  %1221 = vmatpush.bf16.msrb.mxu2 %v4693_v39  ;;  %v3753_v23 = vld [vmem:[#allocation9 + $0x80] sm:$0xf] }
  0xdd   :  { %6016 = vst [vmem:[#allocation57_spill] sm:$0xff] %v4677_v46  ;;  %v4706_v40 = vor.u32 %v3900_v47, %v3769_v62  ;;  %v4713_v28 = vor.u32 %v3901_v15, %v3777_v61  ;;  %v3896_v62 = vld [vmem:[#allocation9 + $0x8c] sm:$0xf0]  ;;  %v3894_v47 = vld [vmem:[#allocation9 + $0x84] sm:$0xf] }
  0xde   :  { %6017 = vst [vmem:[#allocation58_spill] sm:$0xff] %v4679_v43  ;;  %1234 = vmatpush.bf16.msrb.mxu3 %v4695_v30  ;;  %v3755_v18 = vld [vmem:[#allocation9 + $0x90] sm:$0xf0]  ;;  %v4723_v61 = vor.u32 %v3896_v62, %v3753_v23  ;;  %v3895_v17 = vld [vmem:[#allocation9 + $0x8c] sm:$0xf] }
  0xdf   :  { %6018 = vst [vmem:[#allocation59_spill] sm:$0xff] %v4683_v59  ;;  %v752_v59 = vsel %vm407_vm1, %v749_v14, %v750_v56  ;;  %v3761_v14 = vld [vmem:[#allocation9 + $0x88] sm:$0xf]  ;;  %v3897_v56 = vld [vmem:[#allocation9 + $0x94] sm:$0xf0]  ;;  %1196 = vmatpush.bf16.msrb.mxu0 %v4706_v40  ;;  %1209 = vmatpush.bf16.msrb.mxu1 %v4708_v44  ;;  %v4725_v15 = vor.u32 %v3894_v47, %v3755_v18 }
  0xe0   :  { %6019 = vst [vmem:[#allocation60_spill] sm:$0xff] %v4687_v42  ;;  %v753_v6 = vsel %vm409_vm4, %v751_v16, %v752_v59  ;;  %v3763_v16 = vld [vmem:[#allocation9 + $0x98] sm:$0xf0]  ;;  %1222 = vmatpush.bf16.msrb.mxu2 %v4713_v28  ;;  %v4730_v54 = vor.u32 %v3897_v56, %v3761_v14  ;;  %v3890_v23 = vld [vmem:[#allocation9 + $0x64] sm:$0xf] }
  0xe1   :  { %6020 = vst [vmem:[#allocation61_spill] sm:$0xff] %v4689_v32  ;;  %v4719_v38 = vadd.f32 %v753_v6, %v410_v24  ;;  %v4732_v53 = vor.u32 %v3895_v17, %v3763_v16  ;;  %v3737_v6 = vld [vmem:[#allocation9 + $0x60] sm:$0xf]  ;;  %v3739_v62 = vld [vmem:[#allocation9 + $0x70] sm:$0xf0] }
  0xe2   :  { %6021 = vst [vmem:[#allocation62_spill] sm:$0xff] %v4693_v39  ;;  %v729_v7 = vpop.f32.mrf.mxu2  ;;  %1235 = vmatpush.bf16.msrb.mxu3 %v4717_v31  ;;  %v742_v24 = vpop.f32.mrf.mxu3  ;;  %v3745_v47 = vld [vmem:[#allocation9 + $0x68] sm:$0xf]  ;;  %v3893_v18 = vld [vmem:[#allocation9 + $0x74] sm:$0xf0] }
  0xe3   :  { %6022 = vst [vmem:[#allocation63_spill] sm:$0xff] %v4695_v30  ;;  %v3558_v59 = vmul.f32 -1.442695, %v4719_v38  ;;  %1197 = vmatpush.bf16.msrb.mxu0 %v4723_v61  ;;  %1210 = vmatpush.bf16.msrb.mxu1 %v4725_v15  ;;  %v3891_v14 = vld [vmem:[#allocation9 + $0x6c] sm:$0xf]  ;;  %v4742_v17 = vor.u32 %v3893_v18, %v3745_v47 }
  0xe4   :  { %6023 = vst [vmem:[#allocation64_spill] sm:$0xff] %v4706_v40  ;;  %v3747_v56 = vld [vmem:[#allocation9 + $0x78] sm:$0xf0]  ;;  %1223 = vmatpush.bf16.msrb.mxu2 %v4730_v54  ;;  %v3888_v24 = vld [vmem:[#allocation9 + $0x4c] sm:$0xf0] }
  0xe5   :  { %6024 = vst [vmem:[#allocation65_spill] sm:$0xff] %v4708_v44  ;;  %v3892_v44 = vld [vmem:[#allocation9 + $0x6c] sm:$0xf0]  ;;  %3983 = vpow2.f32 %v3558_v59  ;;  %v4744_v16 = vor.u32 %v3891_v14, %v3747_v56  ;;  %v3721_v59 = vld [vmem:[#allocation9 + $0x40] sm:$0xf] }
  0xe6   :  { %6025 = vst [vmem:[#allocation66_spill] sm:$0xff] %v4713_v28  ;;  %v4736_v7 = vor.u32 %v3892_v44, %v3737_v6  ;;  %v4738_v28 = vor.u32 %v3890_v23, %v3739_v62  ;;  %1236 = vmatpush.bf16.msrb.mxu3 %v4732_v53  ;;  %v3729_v40 = vld [vmem:[#allocation9 + $0x48] sm:$0xf]  ;;  %v4748_v44 = vor.u32 %v3888_v24, %v3721_v59  ;;  %v3887_v23 = vld [vmem:[#allocation9 + $0x4c] sm:$0xf] }
  0xe7   :  { %6026 = vst [vmem:[#allocation67_spill] sm:$0xff] %v4717_v31  ;;  %v3886_v31 = vld [vmem:[#allocation9 + $0x44] sm:$0xf]  ;;  %v3731_v62 = vld [vmem:[#allocation9 + $0x58] sm:$0xf0] }
  0xe8   :  { %6027 = vst [vmem:[#allocation68_spill] sm:$0xff] %v4723_v61  ;;  %v3723_v61 = vld [vmem:[#allocation9 + $0x50] sm:$0xf0]  ;;  %1198 = vmatpush.bf16.msrb.mxu0 %v4736_v7  ;;  %1211 = vmatpush.bf16.msrb.mxu1 %v4738_v28  ;;  %v4756_v14 = vor.u32 %v3887_v23, %v3731_v62  ;;  %v3713_v59 = vld [vmem:[#allocation9 + $0x28] sm:$0xf] }
  0xe9   :  { %6028 = vst [vmem:[#allocation69_spill] sm:$0xff] %v4725_v15  ;;  %v3889_v15 = vld [vmem:[#allocation9 + $0x54] sm:$0xf0]  ;;  %v4750_v6 = vor.u32 %v3886_v31, %v3723_v61  ;;  %1224 = vmatpush.bf16.msrb.mxu2 %v4742_v17  ;;  %v3883_v24 = vld [vmem:[#allocation9 + $0x2c] sm:$0xf] }
  0xea   :  { %6029 = vst [vmem:[#allocation70_spill] sm:$0xff] %v4730_v54  ;;  %1237 = vmatpush.bf16.msrb.mxu3 %v4744_v16  ;;  %v4754_v18 = vor.u32 %v3889_v15, %v3729_v40  ;;  %v3882_v54 = vld [vmem:[#allocation9 + $0x24] sm:$0xf]  ;;  %v3885_v61 = vld [vmem:[#allocation9 + $0x34] sm:$0xf0] }
  0xeb   :  { %6030 = vst [vmem:[#allocation71_spill] sm:$0xff] %v4732_v53  ;;  %v3984_v47 = vpop.eup %3983  ;;  %v3705_v53 = vld [vmem:[#allocation9 + $0x20] sm:$0xf]  ;;  %v4766_v15 = vor.u32 %v3885_v61, %v3713_v59  ;;  %v3715_v23 = vld [vmem:[#allocation9 + $0x38] sm:$0xf0] }
  0xec   :  { %6031 = vst [vmem:[#allocation72_spill] sm:$0xff] %v4736_v7  ;;  %v759_v56 = vadd.f32 1.0, %v3984_v47  ;;  %v3884_v7 = vld [vmem:[#allocation9 + $0x2c] sm:$0xf0]  ;;  %1199 = vmatpush.bf16.msrb.mxu0 %v4748_v44  ;;  %1212 = vmatpush.bf16.msrb.mxu1 %v4750_v6  ;;  %v4768_v62 = vor.u32 %v3883_v24, %v3715_v23  ;;  %v3689_v47 = vld [vmem:[#allocation9] sm:$0xf] }
  0xed   :  { %6032 = vst [vmem:[#allocation73_spill] sm:$0xff] %v4738_v28  ;;  %v3707_v28 = vld [vmem:[#allocation9 + $0x30] sm:$0xf0]  ;;  %v4760_v31 = vor.u32 %v3884_v7, %v3705_v53  ;;  %1225 = vmatpush.bf16.msrb.mxu2 %v4754_v18  ;;  %v3699_v59 = vld [vmem:[#allocation9 + $0x18] sm:$0xf0] }
  0xee   :  { %6033 = vst [vmem:[#allocation74_spill] sm:$0xff] %v4742_v17  ;;  %3985 = vrcp.f32 %v759_v56  ;;  %1238 = vmatpush.bf16.msrb.mxu3 %v4756_v14  ;;  %v4764_v40 = vor.u32 %v3882_v54, %v3707_v28  ;;  %v3691_v17 = vld [vmem:[#allocation9 + $0x10] sm:$0xf0]  ;;  %v3881_v28 = vld [vmem:[#allocation9 + $0x14] sm:$0xf0]  ;;  %vm765_vm7 = vweird.f32 %v759_v56 }
  0xef   :  { %6034 = vst [vmem:[#allocation75_spill] sm:$0xff] %v4744_v16  ;;  %v3880_v16 = vld [vmem:[#allocation9 + $0xc] sm:$0xf0]  ;;  %v3879_v54 = vld [vmem:[#allocation9 + $0xc] sm:$0xf] }
  0xf0   :  { %6035 = vst [vmem:[#allocation76_spill] sm:$0xff] %v4748_v44  ;;  %v3878_v44 = vld [vmem:[#allocation9 + $0x4] sm:$0xf]  ;;  %1200 = vmatpush.bf16.msrb.mxu0 %v4760_v31  ;;  %1213 = vmatpush.bf16.msrb.mxu1 %v4764_v40  ;;  %v4772_v53 = vor.u32 %v3880_v16, %v3689_v47  ;;  %v4780_v24 = vor.u32 %v3879_v54, %v3699_v59  ;;  %v771_v16 = vand.u32 2147483648, %v759_v56 }
  0xf1   :  { %6036 = vst [vmem:[#allocation77_spill] sm:$0xff] %v4750_v6  ;;  %v3697_v6 = vld [vmem:[#allocation9 + $0x8] sm:$0xf]  ;;  %v4774_v7 = vor.u32 %v3878_v44, %v3691_v17  ;;  %1226 = vmatpush.bf16.msrb.mxu2 %v4766_v15 }
  0xf2   :  { %6037 = vst [vmem:[#allocation78_spill] sm:$0xff] %v4754_v18  ;;  %1239 = vmatpush.bf16.msrb.mxu3 %v4768_v62  ;;  %v4778_v61 = vor.u32 %v3881_v28, %v3697_v6  ;;  %v769_v6 = vand.u32 2147483647, %v759_v56  ;;  %v772_v28 = vor.u32 1.1754944e-38, %v771_v16  ;;  %v6054_v16 = vld [vmem:[#allocation22_spill] sm:$0xff] }
  0xf3   :  { %6038 = vst [vmem:[#allocation79_spill] sm:$0xff] %v4756_v14 }
  0xf4   :  { %6039 = vst [vmem:[#allocation80_spill] sm:$0xff] %v4760_v31  ;;  %v3986_v23 = vpop.eup %3985  ;;  %v776_v31 = vrot.slane %v4719_v38, 6  ;;  %1201 = vmatpush.bf16.msrb.mxu0 %v4772_v53  ;;  %1214 = vmatpush.bf16.msrb.mxu1 %v4774_v7  ;;  %vm770_vm9 = vcmp.eq.f32.partialorder %v769_v6, 8.507059e+37  ;;  %v6056_v6 = vld [vmem:[#allocation24_spill] sm:$0xff] }
  0xf5   :  { %6040 = vst [vmem:[#allocation81_spill] sm:$0xff] %v4764_v40  ;;  %v761_v14 = vmul.f32 %v3986_v23, %v759_v56  ;;  %1227 = vmatpush.bf16.msrb.mxu2 %v4778_v61  ;;  %vm766_vm6 = vweird.f32 %v3986_v23  ;;  %v6047_v56 = vmov 0  }
  0xf6   :  { %6041 = vst [vmem:[#allocation82_spill] sm:$0xff] %v4766_v15  ;;  %1240 = vmatpush.bf16.msrb.mxu3 %v4780_v24  ;;  %3987 = vtanh.f32 %v776_v31  ;;  %vm767_vm8 = vmor %vm765_vm7, %vm766_vm6  ;;  %v6048_v31 = vld [vmem:[#allocation16_spill] sm:$0xff] }
  0xf7   :  { %6042 = vst [vmem:[#allocation83_spill] sm:$0xff] %v4768_v62  ;;  %v762_v17 = vsub.f32 1.0, %v761_v14 }
  0xf8   :  { %6043 = vst [vmem:[#allocation84_spill] sm:$0xff] %v4772_v53 }
  0xf9   :  { %6044 = vst [vmem:[#allocation85_spill] sm:$0xff] %v4774_v7  ;;  %v763_v44 = vmul.f32 %v3986_v23, %v762_v17 }
  0xfa   :  { %6045 = vst [vmem:[#allocation86_spill] sm:$0xff] %v4778_v61 }
  0xfb   :  { %6046 = vst [vmem:[#allocation87_spill] sm:$0xff] %v4780_v24  ;;  %v764_v47 = vadd.f32 %v3986_v23, %v763_v44  ;;  %v6055_v44 = vld [vmem:[#allocation23_spill] sm:$0xff] }
  0xfc   :  { %v3988_v53 = vpop.eup %3987 }
  0xfd   :  { %v768_v54 = vsel %vm767_vm8, %v3986_v23, %v764_v47  ;;  %v6053_v23 = vld [vmem:[#allocation21_spill] sm:$0xff] }
  0xfe   :  { %v773_v38 = vsel %vm770_vm9, %v772_v28, %v768_v54  ;;  %v6057_v47 = vld [vmem:[#allocation25_spill] sm:$0xff]  ;;  %v6058_v28 = vld [vmem:[#allocation26_spill] sm:$0xff]  ;;  %v6059_v54 = vld [vmem:[#allocation27_spill] sm:$0xff] }
  0xff   :  { %v780_v59 = vrot.slane %v773_v38, 2  ;;  %v783_v14 = vmul.f32 %v3988_v53, %v773_v38  ;;  %v786_v24 = vrot.slane %v773_v38, 4  ;;  %v6049_v53 = vld [vmem:[#allocation17_spill] sm:$0xff]  ;;  %v6060_v38 = vld [vmem:[#allocation28_spill] sm:$0xff] }
 0x101   :  { %v782_v7 = vmul.f32 0.0, %v780_v59  ;;  %v6062_v59 = vld [vmem:[#allocation30_spill] sm:$0xff] }
 0x103   :  { %v4787_v62 = vadd.f32 %v783_v14, %v782_v7  ;;  %v6050_v7 = vld [vmem:[#allocation18_spill] sm:$0xff]  ;;  %v6063_v14 = vld [vmem:[#allocation31_spill] sm:$0xff] }
 0x105   :  { %3989 = vtanh.f32 %v4787_v62 }
 0x10b   :  { %v3990_v17 = vpop.eup %3989 }
 0x10c   :  { %v788_v61 = vmul.f32 %v3990_v17, %v786_v24  ;;  %v6052_v24 = vld [vmem:[#allocation20_spill] sm:$0xff] }
 0x10d   :  { %v6064_v17 = vld [vmem:[#allocation32_spill] sm:$0xff] }
 0x10e   :  { %v789_v15 = vpack.c.bf16 %v788_v61, %v788_v61  ;;  %v6051_v61 = vld [vmem:[#allocation19_spill] sm:$0xff] }
 0x110   :  { %990 = vmatmul.bf16.vlgmr.msra.gmra.mxu0 %v789_v15  ;;  %1003 = vmatmul.bf16.vlgmr.msra.gmra.mxu1 %v789_v15 }
 0x111   :  { %1016 = vmatmul.bf16.vlgmr.msra.gmra.mxu2 %v789_v15  ;;  %1029 = vmatmul.bf16.vlgmr.msra.gmra.mxu3 %v789_v15 }
 0x112   :  { %1316 = vmatpush.bf16.msra.mxu0 %v4386_v45  ;;  %1329 = vmatpush.bf16.msra.mxu1 %v4391_v51 }
 0x113   :  { %1342 = vmatpush.bf16.msra.mxu2 %v4393_v52  ;;  %1355 = vmatpush.bf16.msra.mxu3 %v4398_v55 }
 0x116   :  { %1317 = vmatpush.bf16.msra.mxu0 %v4410_v60  ;;  %1330 = vmatpush.bf16.msra.mxu1 %v4414_v63 }
 0x117   :  { %1343 = vmatpush.bf16.msra.mxu2 %v4416_v0  ;;  %1356 = vmatpush.bf16.msra.mxu3 %v4419_v3 }
 0x11a   :  { %1318 = vmatpush.bf16.msra.mxu0 %v4422_v8  ;;  %1331 = vmatpush.bf16.msra.mxu1 %v4426_v9 }
 0x11b   :  { %1344 = vmatpush.bf16.msra.mxu2 %v4428_v10  ;;  %1357 = vmatpush.bf16.msra.mxu3 %v4431_v13 }
 0x11e   :  { %1319 = vmatpush.bf16.msra.mxu0 %v4434_v20  ;;  %1332 = vmatpush.bf16.msra.mxu1 %v4439_v25 }
 0x11f   :  { %1345 = vmatpush.bf16.msra.mxu2 %v4441_v26  ;;  %1358 = vmatpush.bf16.msra.mxu3 %v4443_v29 }
 0x120   :  { %1202 = vmatmul.bf16.vlgmr.msrb.gmra.mxu0 %v6047_v56  ;;  %1215 = vmatmul.bf16.vlgmr.msrb.gmra.mxu1 %v6047_v56 }
 0x121   :  { %1228 = vmatmul.bf16.vlgmr.msrb.gmra.mxu2 %v6047_v56  ;;  %1241 = vmatmul.bf16.vlgmr.msrb.gmra.mxu3 %v6047_v56  ;;  %v6065_v56 = vld [vmem:[#allocation33_spill] sm:$0xff] }
 0x122   :  { %1320 = vmatpush.bf16.msra.mxu0 %v4446_v35  ;;  %1333 = vmatpush.bf16.msra.mxu1 %v4450_v36 }
 0x123   :  { %1346 = vmatpush.bf16.msra.mxu2 %v4452_v37  ;;  %1359 = vmatpush.bf16.msra.mxu3 %v4455_v41 }
 0x126   :  { %1321 = vmatpush.bf16.msra.mxu0 %v4458_v48  ;;  %1334 = vmatpush.bf16.msra.mxu1 %v4462_v49 }
 0x127   :  { %1347 = vmatpush.bf16.msra.mxu2 %v4464_v50  ;;  %1360 = vmatpush.bf16.msra.mxu3 %v4467_v57 }
 0x12a   :  { %1322 = vmatpush.bf16.msra.mxu0 %v4470_v2  ;;  %1335 = vmatpush.bf16.msra.mxu1 %v4474_v4 }
 0x12b   :  { %1348 = vmatpush.bf16.msra.mxu2 %v4476_v5  ;;  %1361 = vmatpush.bf16.msra.mxu3 %v4479_v12 }
 0x12e   :  { %1323 = vmatpush.bf16.msra.mxu0 %v4482_v19  ;;  %1336 = vmatpush.bf16.msra.mxu1 %v4486_v21 }
 0x12f   :  { %1349 = vmatpush.bf16.msra.mxu2 %v4488_v22  ;;  %1362 = vmatpush.bf16.msra.mxu3 %v6048_v31 }
 0x131   :  { %1324 = vmatmul.bf16.vlgmr.msra.gmra.mxu0 %v789_v15  ;;  %1337 = vmatmul.bf16.vlgmr.msra.gmra.mxu1 %v789_v15 }
 0x132   :  { %1414 = vmatpush.bf16.msrb.mxu0 %v6049_v53  ;;  %1427 = vmatpush.bf16.msrb.mxu1 %v6050_v7 }
 0x133   :  { %1350 = vmatmul.bf16.vlgmr.msra.gmra.mxu2 %v789_v15  ;;  %1363 = vmatmul.bf16.vlgmr.msra.gmra.mxu3 %v789_v15  ;;  %v6061_v15 = vld [vmem:[#allocation29_spill] sm:$0xff] }
 0x134   :  { %1440 = vmatpush.bf16.msrb.mxu2 %v6051_v61  ;;  %1453 = vmatpush.bf16.msrb.mxu3 %v6052_v24 }
 0x136   :  { %1415 = vmatpush.bf16.msrb.mxu0 %v6053_v23  ;;  %1428 = vmatpush.bf16.msrb.mxu1 %v6054_v16 }
 0x138   :  { %1441 = vmatpush.bf16.msrb.mxu2 %v6055_v44  ;;  %1454 = vmatpush.bf16.msrb.mxu3 %v6056_v6  ;;  %v6066_v44 = vld [vmem:[#allocation34_spill] sm:$0xff]  ;;  %v6067_v6 = vld [vmem:[#allocation35_spill] sm:$0xff] }
 0x13a   :  { %1416 = vmatpush.bf16.msrb.mxu0 %v6057_v47  ;;  %1429 = vmatpush.bf16.msrb.mxu1 %v6058_v28  ;;  %v6068_v47 = vld [vmem:[#allocation36_spill] sm:$0xff]  ;;  %v6069_v28 = vld [vmem:[#allocation37_spill] sm:$0xff] }
 0x13c   :  { %1442 = vmatpush.bf16.msrb.mxu2 %v6059_v54  ;;  %1455 = vmatpush.bf16.msrb.mxu3 %v6060_v38  ;;  %v6070_v54 = vld [vmem:[#allocation38_spill] sm:$0xff]  ;;  %v6071_v38 = vld [vmem:[#allocation39_spill] sm:$0xff] }
 0x13e   :  { %1417 = vmatpush.bf16.msrb.mxu0 %v6061_v15  ;;  %1430 = vmatpush.bf16.msrb.mxu1 %v6062_v59  ;;  %v6072_v15 = vld [vmem:[#allocation40_spill] sm:$0xff] }
 0x13f   :  { %v6073_v59 = vld [vmem:[#allocation44_spill] sm:$0xff] }
 0x140   :  { %1443 = vmatpush.bf16.msrb.mxu2 %v6063_v14  ;;  %1456 = vmatpush.bf16.msrb.mxu3 %v6064_v17  ;;  %v6074_v14 = vld [vmem:[#allocation45_spill] sm:$0xff] }
 0x142   :  { %1418 = vmatpush.bf16.msrb.mxu0 %v6065_v56  ;;  %1431 = vmatpush.bf16.msrb.mxu1 %v6066_v44  ;;  %v6075_v56 = vld [vmem:[#allocation47_spill] sm:$0xff] }
 0x144   :  { %1444 = vmatpush.bf16.msrb.mxu2 %v6067_v6  ;;  %1457 = vmatpush.bf16.msrb.mxu3 %v6068_v47 }
 0x146   :  { %1419 = vmatpush.bf16.msrb.mxu0 %v6069_v28  ;;  %1432 = vmatpush.bf16.msrb.mxu1 %v6070_v54 }
 0x148   :  { %1445 = vmatpush.bf16.msrb.mxu2 %v6071_v38  ;;  %1458 = vmatpush.bf16.msrb.mxu3 %v6072_v15 }
 0x14a   :  { %1420 = vmatpush.bf16.msrb.mxu0 %v6073_v59  ;;  %1433 = vmatpush.bf16.msrb.mxu1 %v6074_v14  ;;  %v6076_v59 = vld [vmem:[#allocation59_spill] sm:$0xff] }
 0x14c   :  { %1446 = vmatpush.bf16.msrb.mxu2 %v4641_v33  ;;  %1459 = vmatpush.bf16.msrb.mxu3 %v6075_v56 }
 0x14e   :  { %1421 = vmatpush.bf16.msrb.mxu0 %v4653_v27  ;;  %1434 = vmatpush.bf16.msrb.mxu1 %v4655_v34  ;;  %v6077_v34 = vld [vmem:[#allocation64_spill] sm:$0xff] }
 0x150   :  { %1447 = vmatpush.bf16.msrb.mxu2 %v4657_v11  ;;  %1460 = vmatpush.bf16.msrb.mxu3 %v4659_v1  ;;  %v6080_v11 = vld [vmem:[#allocation67_spill] sm:$0xff]  ;;  %v6081_v1 = vld [vmem:[#allocation68_spill] sm:$0xff] }
 0x152   :  { %1466 = vmatpush.bf16.msra.mxu0 %v4665_v58  ;;  %1479 = vmatpush.bf16.msra.mxu1 %v4677_v46  ;;  %v6078_v58 = vld [vmem:[#allocation65_spill] sm:$0xff]  ;;  %v6079_v46 = vld [vmem:[#allocation66_spill] sm:$0xff] }
 0x154   :  { %1492 = vmatpush.bf16.msra.mxu2 %v4679_v43  ;;  %1505 = vmatpush.bf16.msra.mxu3 %v6076_v59  ;;  %v6082_v43 = vld [vmem:[#allocation69_spill] sm:$0xff]  ;;  %v6083_v59 = vld [vmem:[#allocation70_spill] sm:$0xff] }
 0x156   :  { %1467 = vmatpush.bf16.msra.mxu0 %v4687_v42  ;;  %1480 = vmatpush.bf16.msra.mxu1 %v4689_v32  ;;  %v6084_v42 = vld [vmem:[#allocation71_spill] sm:$0xff]  ;;  %v6085_v32 = vld [vmem:[#allocation72_spill] sm:$0xff] }
 0x158   :  { %1493 = vmatpush.bf16.msra.mxu2 %v4693_v39  ;;  %1506 = vmatpush.bf16.msra.mxu3 %v4695_v30  ;;  %v6086_v39 = vld [vmem:[#allocation73_spill] sm:$0xff]  ;;  %v6087_v30 = vld [vmem:[#allocation74_spill] sm:$0xff] }
 0x15a   :  { %1468 = vmatpush.bf16.msra.mxu0 %v6077_v34  ;;  %1481 = vmatpush.bf16.msra.mxu1 %v6078_v58  ;;  %v6088_v34 = vld [vmem:[#allocation75_spill] sm:$0xff]  ;;  %v6089_v58 = vld [vmem:[#allocation76_spill] sm:$0xff] }
 0x15c   :  { %1494 = vmatpush.bf16.msra.mxu2 %v6079_v46  ;;  %1507 = vmatpush.bf16.msra.mxu3 %v6080_v11  ;;  %v6090_v46 = vld [vmem:[#allocation77_spill] sm:$0xff] }
 0x15e   :  { %1469 = vmatpush.bf16.msra.mxu0 %v6081_v1  ;;  %1482 = vmatpush.bf16.msra.mxu1 %v6082_v43  ;;  %v6091_v1 = vld [vmem:[#allocation79_spill] sm:$0xff]  ;;  %v6092_v43 = vld [vmem:[#allocation80_spill] sm:$0xff] }
 0x160   :  { %1495 = vmatpush.bf16.msra.mxu2 %v6083_v59  ;;  %1508 = vmatpush.bf16.msra.mxu3 %v6084_v42  ;;  %v6093_v42 = vld [vmem:[#allocation82_spill] sm:$0xff] }
 0x162   :  { %1470 = vmatpush.bf16.msra.mxu0 %v6085_v32  ;;  %1483 = vmatpush.bf16.msra.mxu1 %v6086_v39  ;;  %v6094_v32 = vld [vmem:[#allocation83_spill] sm:$0xff]  ;;  %v6095_v39 = vld [vmem:[#allocation84_spill] sm:$0xff] }
 0x164   :  { %1496 = vmatpush.bf16.msra.mxu2 %v6087_v30  ;;  %1509 = vmatpush.bf16.msra.mxu3 %v6088_v34  ;;  %v6096_v30 = vld [vmem:[#allocation85_spill] sm:$0xff]  ;;  %v6097_v34 = vld [vmem:[#allocation86_spill] sm:$0xff] }
 0x166   :  { %1471 = vmatpush.bf16.msra.mxu0 %v6089_v58  ;;  %1484 = vmatpush.bf16.msra.mxu1 %v6090_v46  ;;  %v6098_v58 = vld [vmem:[#allocation87_spill] sm:$0xff] }
 0x168   :  { %1497 = vmatpush.bf16.msra.mxu2 %v4754_v18  ;;  %1510 = vmatpush.bf16.msra.mxu3 %v6091_v1 }
 0x16a   :  { %1472 = vmatpush.bf16.msra.mxu0 %v6092_v43  ;;  %1485 = vmatpush.bf16.msra.mxu1 %v4764_v40 }
 0x16c   :  { %1498 = vmatpush.bf16.msra.mxu2 %v6093_v42  ;;  %1511 = vmatpush.bf16.msra.mxu3 %v6094_v32 }
 0x16e   :  { %1473 = vmatpush.bf16.msra.mxu0 %v6095_v39  ;;  %1486 = vmatpush.bf16.msra.mxu1 %v6096_v30 }
 0x170   :  { %1499 = vmatpush.bf16.msra.mxu2 %v6097_v34  ;;  %1512 = vmatpush.bf16.msra.mxu3 %v6098_v58  ;;  %v457_v58 = vld [vmem:[%s5824_s6] sm:$0xf] }
 0x171   :  { %v4897_v34 = vperm.slane %v457_v58, 0  ;;  %v4899_v15 = vperm.slane %v457_v58, 1 }
 0x173   :  { %6099 = vst [vmem:[#allocation16_spill] sm:$0xff] %v4897_v34 }
 0x174   :  { %6100 = vst [vmem:[#allocation17_spill] sm:$0xff] %v4899_v15 }
 0x18d   :  { %v991_v46 = vpop.f32.mrf.mxu0  ;;  %v1004_v18 = vpop.f32.mrf.mxu1 }
 0x194   :  { %v1017_v59 = vpop.f32.mrf.mxu2  ;;  %v4890_v1 = vpop.f32.mrf.mxu3 }
 0x195   :  { %v993_v43 = vpop.f32.mrf.mxu0  ;;  %v1006_v11 = vpop.f32.mrf.mxu1 }
 0x19c   :  { %v1019_v40 = vpop.f32.mrf.mxu2  ;;  %v1032_v27 = vpop.f32.mrf.mxu3 }
 0x19d   :  { %v1203_v42 = vpop.f32.mrf.mxu0  ;;  %v1216_v56 = vpop.f32.mrf.mxu1 }
 0x19e   :  { %v1204_v14 = vadd.f32 %v1203_v42, %v991_v46  ;;  %v1217_v43 = vadd.f32 %v1216_v56, %v1004_v18  ;;  %v6101_v56 = vld [vmem:[#allocation41_spill] sm:$0xff] }
 0x1a0   :  { %v1246_v27 = vadd.f32 %v1204_v14, %v4897_v34  ;;  %v1247_v38 = vadd.f32 %v1217_v43, %v4899_v15 }
 0x1a4   :  { %v1229_v32 = vpop.f32.mrf.mxu2  ;;  %v4892_v33 = vpop.f32.mrf.mxu3 }
 0x1a5   :  { %v1205_v39 = vpop.f32.mrf.mxu0  ;;  %v1218_v30 = vpop.f32.mrf.mxu1  ;;  %v1230_v15 = vadd.f32 %v1229_v32, %v1017_v59 }
 0x1a6   :  { %v3815_v39 = vmul.f32 -1.442695, %v1246_v27  ;;  %v3816_v30 = vmul.f32 -1.442695, %v1247_v38 }
 0x1a8   :  { %3991 = vpow2.f32 %v3815_v39  ;;  %v4907_v39 = vperm.slane %v457_v58, 2 }
 0x1a9   :  { %3993 = vpow2.f32 %v3816_v30 }
 0x1aa   :  { %6102 = vst [vmem:[#allocation18_spill] sm:$0xff] %v4907_v39 }
 0x1ac   :  { %v1231_v11 = vpop.f32.mrf.mxu2  ;;  %v1244_v40 = vpop.f32.mrf.mxu3 }
 0x1ad   :  { %v417_v11 = vrot.slane %v6101_v56, 2 }
 0x1ae   :  { %v1325_v54 = vpop.f32.mrf.mxu0  ;;  %v1338_v28 = vpop.f32.mrf.mxu1 }
 0x1af   :  { %v1372_v47 = vrot.slane %v1338_v28, 6  ;;  %v3992_v27 = vpop.eup %3991 }
 0x1b0   :  { %v3994_v38 = vpop.eup %3993 }
 0x1b1   :  { %v1375_v18 = vsel %vm405_vm0, %v1325_v54, %v1372_v47  ;;  %v1248_v47 = vadd.f32 %v1230_v15, %v4907_v39 }
 0x1b6   :  { %v1351_v6 = vpop.f32.mrf.mxu2  ;;  %v1364_v44 = vpop.f32.mrf.mxu3 }
 0x1b7   :  { %v1373_v17 = vrot.slane %v1351_v6, 4  ;;  %v1374_v46 = vrot.slane %v1364_v44, 2  ;;  %v1327_v42 = vpop.f32.mrf.mxu0  ;;  %v1340_v16 = vpop.f32.mrf.mxu1  ;;  %v4909_v44 = vadd.f32 1.0, %v3992_v27 }
 0x1b8   :  { %v4911_v16 = vadd.f32 1.0, %v3994_v38 }
 0x1b9   :  { %v1376_v14 = vsel %vm407_vm1, %v1373_v17, %v1374_v46  ;;  %v3817_v17 = vmul.f32 -1.442695, %v1248_v47  ;;  %vm1267_vm2 = vweird.f32 %v4909_v44 }
 0x1ba   :  { %v1377_v43 = vsel %vm409_vm4, %v1375_v18, %v1376_v14  ;;  %vm1282_vm3 = vweird.f32 %v4911_v16 }
 0x1bb   :  { %v1379_v40 = vadd.f32 %v1377_v43, %v417_v11 }
 0x1bd   :  { %v3818_v28 = vmul.f32 -1.442695, %v1379_v40  ;;  %v1400_v43 = vrot.slane %v1379_v40, 6 }
 0x1be   :  { %v1353_v30 = vpop.f32.mrf.mxu2  ;;  %v1366_v6 = vpop.f32.mrf.mxu3 }
 0x1bf   :  { %3995 = vpow2.f32 %v3818_v28 }
 0x1c0   :  { %3997 = vrcp.f32 %v4909_v44 }
 0x1c1   :  { %3999 = vrcp.f32 %v4911_v16 }
 0x1c5   :  { %v3996_v54 = vpop.eup %3995 }
 0x1c6   :  { %v1383_v46 = vadd.f32 1.0, %v3996_v54  ;;  %v3998_v42 = vpop.eup %3997  ;;  %v4920_v54 = vperm.slane %v457_v58, 3 }
 0x1c7   :  { %v4000_v18 = vpop.eup %3999  ;;  %v1263_v32 = vmul.f32 %v3998_v42, %v4909_v44  ;;  %vm1268_vm14 = vweird.f32 %v3998_v42 }
 0x1c8   :  { %4001 = vrcp.f32 %v1383_v46  ;;  %v1278_v59 = vmul.f32 %v4000_v18, %v4911_v16  ;;  %v1395_v28 = vand.u32 2147483648, %v1383_v46  ;;  %v1393_v47 = vand.u32 2147483647, %v1383_v46  ;;  %vm4931_vm5 = vmor %vm1267_vm2, %vm1268_vm14 }
 0x1c9   :  { %4003 = vpow2.f32 %v3817_v17  ;;  %v1264_v15 = vsub.f32 1.0, %v1263_v32  ;;  %v1243_v17 = vadd.f32 %v4892_v33, %v4890_v1  ;;  %vm1389_vm11 = vweird.f32 %v1383_v46 }
 0x1ca   :  { %v1279_v27 = vsub.f32 1.0, %v1278_v59  ;;  %4005 = vtanh.f32 %v1400_v43  ;;  %v1396_v40 = vor.u32 1.1754944e-38, %v1395_v28  ;;  %vm1394_vm13 = vcmp.eq.f32.partialorder %v1393_v47, 8.507059e+37 }
 0x1cb   :  { %v1265_v34 = vmul.f32 %v3998_v42, %v1264_v15  ;;  %v1249_v59 = vadd.f32 %v1243_v17, %v4920_v54  ;;  %vm1283_vm15 = vweird.f32 %v4000_v18  ;;  %v1288_v33 = vand.u32 2147483648, %v4911_v16 }
 0x1cc   :  { %v1280_v39 = vmul.f32 %v4000_v18, %v1279_v27  ;;  %v1273_v43 = vand.u32 2147483648, %v4909_v44  ;;  %vm1284_vm6 = vmor %vm1282_vm3, %vm1283_vm15 }
 0x1cd   :  { %v1266_v58 = vadd.f32 %v3998_v42, %v1265_v34  ;;  %v1286_v34 = vand.u32 2147483647, %v4911_v16 }
 0x1ce   :  { %v4002_v56 = vpop.eup %4001  ;;  %v1274_v47 = vor.u32 1.1754944e-38, %v1273_v43 }
 0x1cf   :  { %v1385_v11 = vmul.f32 %v4002_v56, %v1383_v46  ;;  %v4004_v14 = vpop.eup %4003  ;;  %vm1390_vm10 = vweird.f32 %v4002_v56  ;;  %v1271_v46 = vand.u32 2147483647, %v4909_v44  ;;  %v1270_v27 = vsel %vm4931_vm5, %v3998_v42, %v1266_v58 }
 0x1d0   :  { %v4918_v30 = vadd.f32 1.0, %v4004_v14  ;;  %vm1391_vm12 = vmor %vm1389_vm11, %vm1390_vm10  ;;  %v1281_v14 = vadd.f32 %v4000_v18, %v1280_v39  ;;  %v4006_v1 = vpop.eup %4005  ;;  %v1289_v44 = vor.u32 1.1754944e-38, %v1288_v33  ;;  %vm1287_vm8 = vcmp.eq.f32.partialorder %v1286_v34, 8.507059e+37 }
 0x1d1   :  { %v1386_v38 = vsub.f32 1.0, %v1385_v11  ;;  %vm1272_vm7 = vcmp.eq.f32.partialorder %v1271_v46, 8.507059e+37 }
 0x1d2   :  { %4007 = vrcp.f32 %v4918_v30  ;;  %v1285_v28 = vsel %vm1284_vm6, %v4000_v18, %v1281_v14  ;;  %v1275_v17 = vsel %vm1272_vm7, %v1274_v47, %v1270_v27  ;;  %vm1297_vm10 = vweird.f32 %v4918_v30  ;;  %v6108_v47 = vld [vmem:[#allocation24_spill] sm:$0xff] }
 0x1d3   :  { %v1387_v6 = vmul.f32 %v4002_v56, %v1386_v38  ;;  %4009 = vtanh.f32 %v1249_v59  ;;  %v1301_v46 = vand.u32 2147483647, %v4918_v30 }
 0x1d5   :  { %v1388_v23 = vadd.f32 %v4002_v56, %v1387_v6 }
 0x1d7   :  { %v1392_v32 = vsel %vm1391_vm12, %v4002_v56, %v1388_v23  ;;  %vm1302_vm12 = vcmp.eq.f32.partialorder %v1301_v46, 8.507059e+37  ;;  %v6123_v46 = vld [vmem:[#allocation39_spill] sm:$0xff] }
 0x1d8   :  { %v1397_v11 = vsel %vm1394_vm13, %v1396_v40, %v1392_v32  ;;  %v4008_v15 = vpop.eup %4007 }
 0x1d9   :  { %v1404_v38 = vrot.slane %v1397_v11, 2  ;;  %v1407_v56 = vmul.f32 %v4006_v1, %v1397_v11  ;;  %v1293_v16 = vmul.f32 %v4008_v15, %v4918_v30  ;;  %v4010_v40 = vpop.eup %4009  ;;  %v1410_v1 = vrot.slane %v1397_v11, 4 }
 0x1da   :  { %v1309_v59 = vmul.f32 %v4010_v40, %v1275_v17  ;;  %vm1298_vm9 = vweird.f32 %v4008_v15  ;;  %v1303_v11 = vand.u32 2147483648, %v4918_v30  ;;  %v6110_v17 = vld [vmem:[#allocation26_spill] sm:$0xff]  ;;  %v6112_v40 = vld [vmem:[#allocation28_spill] sm:$0xff] }
 0x1db   :  { %v1406_v39 = vmul.f32 %v1404_v38, %v4787_v62  ;;  %v1290_v62 = vsel %vm1287_vm8, %v1289_v44, %v1285_v28  ;;  %v1294_v38 = vsub.f32 1.0, %v1293_v16  ;;  %vm1299_vm11 = vmor %vm1297_vm10, %vm1298_vm9  ;;  %v6106_v28 = vld [vmem:[#allocation22_spill] sm:$0xff]  ;;  %v6107_v44 = vld [vmem:[#allocation23_spill] sm:$0xff] }
 0x1dc   :  { %v1308_v32 = vmul.f32 0.0, %v1290_v62  ;;  %v6109_v16 = vld [vmem:[#allocation25_spill] sm:$0xff]  ;;  %v6111_v62 = vld [vmem:[#allocation27_spill] sm:$0xff] }
 0x1dd   :  { %v4939_v6 = vadd.f32 %v1407_v56, %v1406_v39  ;;  %v1295_v14 = vmul.f32 %v4008_v15, %v1294_v38  ;;  %v1304_v39 = vor.u32 1.1754944e-38, %v1303_v11  ;;  %v6115_v38 = vld [vmem:[#allocation31_spill] sm:$0xff]  ;;  %v6122_v11 = vld [vmem:[#allocation38_spill] sm:$0xff] }
 0x1de   :  { %v4943_v18 = vadd.f32 %v1309_v59, %v1308_v32  ;;  %v6113_v32 = vld [vmem:[#allocation29_spill] sm:$0xff]  ;;  %v6114_v59 = vld [vmem:[#allocation30_spill] sm:$0xff] }
 0x1df   :  { %4011 = vtanh.f32 %v4939_v6  ;;  %v1296_v33 = vadd.f32 %v4008_v15, %v1295_v14  ;;  %v6120_v14 = vld [vmem:[#allocation36_spill] sm:$0xff] }
 0x1e0   :  { %4013 = vtanh.f32 %v4943_v18 }
 0x1e1   :  { %v1300_v43 = vsel %vm1299_vm11, %v4008_v15, %v1296_v33  ;;  %v6105_v15 = vld [vmem:[#allocation21_spill] sm:$0xff] }
 0x1e2   :  { %v1305_v56 = vsel %vm1302_vm12, %v1304_v39, %v1300_v43  ;;  %v6121_v33 = vld [vmem:[#allocation37_spill] sm:$0xff]  ;;  %v6124_v43 = vld [vmem:[#allocation40_spill] sm:$0xff] }
 0x1e3   :  { %v6126_v39 = vld [vmem:[#allocation45_spill] sm:$0xff] }
 0x1e5   :  { %v4012_v23 = vpop.eup %4011 }
 0x1e6   :  { %v1412_v42 = vmul.f32 %v4012_v23, %v1410_v1  ;;  %v4014_v34 = vpop.eup %4013  ;;  %v6116_v1 = vld [vmem:[#allocation32_spill] sm:$0xff]  ;;  %v6117_v23 = vld [vmem:[#allocation33_spill] sm:$0xff] }
 0x1e7   :  { %v1312_v27 = vmul.f32 %v4014_v34, %v1305_v56  ;;  %v6125_v34 = vld [vmem:[#allocation44_spill] sm:$0xff]  ;;  %v6127_v56 = vld [vmem:[#allocation46_spill] sm:$0xff] }
 0x1e8   :  { %v1413_v58 = vpack.c.bf16 %v1412_v42, %v1412_v42  ;;  %v6118_v42 = vld [vmem:[#allocation34_spill] sm:$0xff] }
 0x1e9   :  { %v1313_v30 = vpack.c.bf16 %v1312_v27, %v1312_v27  ;;  %v6128_v27 = vld [vmem:[#allocation47_spill] sm:$0xff] }
 0x1ea   :  { %1422 = vmatmul.bf16.vlgmr.msrb.gmra.mxu0 %v1413_v58  ;;  %1435 = vmatmul.bf16.vlgmr.msrb.gmra.mxu1 %v1413_v58 }
 0x1eb   :  { %1448 = vmatmul.bf16.vlgmr.msrb.gmra.mxu2 %v1413_v58  ;;  %1461 = vmatmul.bf16.vlgmr.msrb.gmra.mxu3 %v1413_v58 }
 0x1ec   :  { %1588 = vmatpush.bf16.msrb.mxu0 %v4386_v45  ;;  %1601 = vmatpush.bf16.msrb.mxu1 %v4391_v51 }
 0x1ed   :  { %1614 = vmatpush.bf16.msrb.mxu2 %v4393_v52  ;;  %1627 = vmatpush.bf16.msrb.mxu3 %v4398_v55 }
 0x1f0   :  { %1589 = vmatpush.bf16.msrb.mxu0 %v4410_v60  ;;  %1602 = vmatpush.bf16.msrb.mxu1 %v4414_v63 }
 0x1f1   :  { %1615 = vmatpush.bf16.msrb.mxu2 %v4416_v0  ;;  %1628 = vmatpush.bf16.msrb.mxu3 %v4419_v3 }
 0x1f4   :  { %1590 = vmatpush.bf16.msrb.mxu0 %v4422_v8  ;;  %1603 = vmatpush.bf16.msrb.mxu1 %v4426_v9 }
 0x1f5   :  { %1616 = vmatpush.bf16.msrb.mxu2 %v4428_v10  ;;  %1629 = vmatpush.bf16.msrb.mxu3 %v4431_v13 }
 0x1f8   :  { %1591 = vmatpush.bf16.msrb.mxu0 %v4434_v20  ;;  %1604 = vmatpush.bf16.msrb.mxu1 %v4439_v25 }
 0x1f9   :  { %1617 = vmatpush.bf16.msrb.mxu2 %v4441_v26  ;;  %1630 = vmatpush.bf16.msrb.mxu3 %v4443_v29 }
 0x1fa   :  { %1474 = vmatmul.bf16.vlgmr.msra.gmra.mxu0 %v1313_v30  ;;  %1487 = vmatmul.bf16.vlgmr.msra.gmra.mxu1 %v1313_v30 }
 0x1fb   :  { %1500 = vmatmul.bf16.vlgmr.msra.gmra.mxu2 %v1313_v30  ;;  %1513 = vmatmul.bf16.vlgmr.msra.gmra.mxu3 %v1313_v30  ;;  %v6129_v30 = vld [vmem:[#allocation48_spill] sm:$0xff] }
 0x1fc   :  { %1592 = vmatpush.bf16.msrb.mxu0 %v4446_v35  ;;  %1605 = vmatpush.bf16.msrb.mxu1 %v4450_v36 }
 0x1fd   :  { %1618 = vmatpush.bf16.msrb.mxu2 %v4452_v37  ;;  %1631 = vmatpush.bf16.msrb.mxu3 %v4455_v41 }
 0x200   :  { %1593 = vmatpush.bf16.msrb.mxu0 %v4458_v48  ;;  %1606 = vmatpush.bf16.msrb.mxu1 %v4462_v49 }
 0x201   :  { %1619 = vmatpush.bf16.msrb.mxu2 %v4464_v50  ;;  %1632 = vmatpush.bf16.msrb.mxu3 %v4467_v57 }
 0x204   :  { %1594 = vmatpush.bf16.msrb.mxu0 %v4470_v2  ;;  %1607 = vmatpush.bf16.msrb.mxu1 %v4474_v4 }
 0x205   :  { %1620 = vmatpush.bf16.msrb.mxu2 %v4476_v5  ;;  %1633 = vmatpush.bf16.msrb.mxu3 %v4479_v12 }
 0x208   :  { %1595 = vmatpush.bf16.msrb.mxu0 %v4482_v19  ;;  %1608 = vmatpush.bf16.msrb.mxu1 %v4486_v21 }
 0x209   :  { %1621 = vmatpush.bf16.msrb.mxu2 %v4488_v22  ;;  %1634 = vmatpush.bf16.msrb.mxu3 %v6048_v31 }
 0x20b   :  { %1596 = vmatmul.bf16.vlgmr.msrb.gmra.mxu0 %v1413_v58  ;;  %1609 = vmatmul.bf16.vlgmr.msrb.gmra.mxu1 %v1413_v58 }
 0x20c   :  { %1686 = vmatpush.bf16.msra.mxu0 %v6049_v53  ;;  %1699 = vmatpush.bf16.msra.mxu1 %v6050_v7 }
 0x20d   :  { %1622 = vmatmul.bf16.vlgmr.msrb.gmra.mxu2 %v1413_v58  ;;  %1635 = vmatmul.bf16.vlgmr.msrb.gmra.mxu3 %v1413_v58  ;;  %v6119_v58 = vld [vmem:[#allocation35_spill] sm:$0xff] }
 0x20e   :  { %1712 = vmatpush.bf16.msra.mxu2 %v6051_v61  ;;  %1725 = vmatpush.bf16.msra.mxu3 %v6052_v24 }
 0x210   :  { %1687 = vmatpush.bf16.msra.mxu0 %v6105_v15  ;;  %1700 = vmatpush.bf16.msra.mxu1 %v6106_v28 }
 0x212   :  { %1713 = vmatpush.bf16.msra.mxu2 %v6107_v44  ;;  %1726 = vmatpush.bf16.msra.mxu3 %v6108_v47 }
 0x214   :  { %1688 = vmatpush.bf16.msra.mxu0 %v6109_v16  ;;  %1701 = vmatpush.bf16.msra.mxu1 %v6110_v17  ;;  %v6166_v16 = vld [vmem:[#allocation17_spill] sm:$0xff] }
 0x216   :  { %1714 = vmatpush.bf16.msra.mxu2 %v6111_v62  ;;  %1727 = vmatpush.bf16.msra.mxu3 %v6112_v40 }
 0x218   :  { %1689 = vmatpush.bf16.msra.mxu0 %v6113_v32  ;;  %1702 = vmatpush.bf16.msra.mxu1 %v6114_v59 }
 0x21a   :  { %1715 = vmatpush.bf16.msra.mxu2 %v6115_v38  ;;  %1728 = vmatpush.bf16.msra.mxu3 %v6116_v1 }
 0x21c   :  { %1690 = vmatpush.bf16.msra.mxu0 %v6117_v23  ;;  %1703 = vmatpush.bf16.msra.mxu1 %v6118_v42 }
 0x21e   :  { %1716 = vmatpush.bf16.msra.mxu2 %v6119_v58  ;;  %1729 = vmatpush.bf16.msra.mxu3 %v6120_v14  ;;  %v6130_v58 = vld [vmem:[#allocation49_spill] sm:$0xff] }
 0x21f   :  { %v6131_v14 = vld [vmem:[#allocation53_spill] sm:$0xff] }
 0x220   :  { %1691 = vmatpush.bf16.msra.mxu0 %v6121_v33  ;;  %1704 = vmatpush.bf16.msra.mxu1 %v6122_v11  ;;  %v6132_v33 = vld [vmem:[#allocation57_spill] sm:$0xff]  ;;  %v6133_v11 = vld [vmem:[#allocation50_spill] sm:$0xff] }
 0x222   :  { %1717 = vmatpush.bf16.msra.mxu2 %v6123_v46  ;;  %1730 = vmatpush.bf16.msra.mxu3 %v6124_v43  ;;  %v6134_v46 = vld [vmem:[#allocation51_spill] sm:$0xff]  ;;  %v6135_v43 = vld [vmem:[#allocation58_spill] sm:$0xff] }
 0x224   :  { %1692 = vmatpush.bf16.msra.mxu0 %v6125_v34  ;;  %1705 = vmatpush.bf16.msra.mxu1 %v6126_v39  ;;  %v6136_v34 = vld [vmem:[#allocation59_spill] sm:$0xff]  ;;  %v6137_v39 = vld [vmem:[#allocation60_spill] sm:$0xff] }
 0x226   :  { %1718 = vmatpush.bf16.msra.mxu2 %v6127_v56  ;;  %1731 = vmatpush.bf16.msra.mxu3 %v6128_v27  ;;  %v6138_v56 = vld [vmem:[#allocation61_spill] sm:$0xff]  ;;  %v6139_v27 = vld [vmem:[#allocation62_spill] sm:$0xff] }
 0x228   :  { %1693 = vmatpush.bf16.msra.mxu0 %v6129_v30  ;;  %1706 = vmatpush.bf16.msra.mxu1 %v6130_v58  ;;  %v6140_v30 = vld [vmem:[#allocation63_spill] sm:$0xff]  ;;  %v6141_v58 = vld [vmem:[#allocation64_spill] sm:$0xff] }
 0x22a   :  { %1719 = vmatpush.bf16.msra.mxu2 %v6133_v11  ;;  %1732 = vmatpush.bf16.msra.mxu3 %v6134_v46  ;;  %v6144_v11 = vld [vmem:[#allocation67_spill] sm:$0xff]  ;;  %v6145_v46 = vld [vmem:[#allocation68_spill] sm:$0xff] }
 0x22c   :  { %1738 = vmatpush.bf16.msrb.mxu0 %v6131_v14  ;;  %1751 = vmatpush.bf16.msrb.mxu1 %v6132_v33  ;;  %v6142_v14 = vld [vmem:[#allocation65_spill] sm:$0xff]  ;;  %v6143_v33 = vld [vmem:[#allocation66_spill] sm:$0xff] }
 0x22e   :  { %1764 = vmatpush.bf16.msrb.mxu2 %v6135_v43  ;;  %1777 = vmatpush.bf16.msrb.mxu3 %v6136_v34  ;;  %v6146_v43 = vld [vmem:[#allocation69_spill] sm:$0xff]  ;;  %v6147_v34 = vld [vmem:[#allocation70_spill] sm:$0xff] }
 0x230   :  { %1739 = vmatpush.bf16.msrb.mxu0 %v6137_v39  ;;  %1752 = vmatpush.bf16.msrb.mxu1 %v6138_v56  ;;  %v6148_v39 = vld [vmem:[#allocation71_spill] sm:$0xff]  ;;  %v6149_v56 = vld [vmem:[#allocation72_spill] sm:$0xff] }
 0x232   :  { %1765 = vmatpush.bf16.msrb.mxu2 %v6139_v27  ;;  %1778 = vmatpush.bf16.msrb.mxu3 %v6140_v30  ;;  %v6150_v27 = vld [vmem:[#allocation73_spill] sm:$0xff]  ;;  %v6151_v30 = vld [vmem:[#allocation74_spill] sm:$0xff] }
 0x234   :  { %1740 = vmatpush.bf16.msrb.mxu0 %v6141_v58  ;;  %1753 = vmatpush.bf16.msrb.mxu1 %v6142_v14  ;;  %v6152_v58 = vld [vmem:[#allocation75_spill] sm:$0xff]  ;;  %v6153_v14 = vld [vmem:[#allocation76_spill] sm:$0xff] }
 0x236   :  { %1766 = vmatpush.bf16.msrb.mxu2 %v6143_v33  ;;  %1779 = vmatpush.bf16.msrb.mxu3 %v6144_v11  ;;  %v6154_v33 = vld [vmem:[#allocation77_spill] sm:$0xff]  ;;  %v6155_v11 = vld [vmem:[#allocation78_spill] sm:$0xff] }
 0x238   :  { %1741 = vmatpush.bf16.msrb.mxu0 %v6145_v46  ;;  %1754 = vmatpush.bf16.msrb.mxu1 %v6146_v43  ;;  %v6156_v46 = vld [vmem:[#allocation79_spill] sm:$0xff]  ;;  %v6157_v43 = vld [vmem:[#allocation80_spill] sm:$0xff] }
 0x23a   :  { %1767 = vmatpush.bf16.msrb.mxu2 %v6147_v34  ;;  %1780 = vmatpush.bf16.msrb.mxu3 %v6148_v39  ;;  %v6158_v34 = vld [vmem:[#allocation81_spill] sm:$0xff]  ;;  %v6159_v39 = vld [vmem:[#allocation82_spill] sm:$0xff] }
 0x23c   :  { %1742 = vmatpush.bf16.msrb.mxu0 %v6149_v56  ;;  %1755 = vmatpush.bf16.msrb.mxu1 %v6150_v27  ;;  %v6160_v56 = vld [vmem:[#allocation83_spill] sm:$0xff]  ;;  %v6161_v27 = vld [vmem:[#allocation84_spill] sm:$0xff] }
 0x23e   :  { %1768 = vmatpush.bf16.msrb.mxu2 %v6151_v30  ;;  %1781 = vmatpush.bf16.msrb.mxu3 %v6152_v58  ;;  %v6162_v30 = vld [vmem:[#allocation85_spill] sm:$0xff]  ;;  %v6163_v58 = vld [vmem:[#allocation86_spill] sm:$0xff] }
 0x240   :  { %1743 = vmatpush.bf16.msrb.mxu0 %v6153_v14  ;;  %1756 = vmatpush.bf16.msrb.mxu1 %v6154_v33  ;;  %v6164_v14 = vld [vmem:[#allocation87_spill] sm:$0xff] }
 0x242   :  { %1769 = vmatpush.bf16.msrb.mxu2 %v6155_v11  ;;  %1782 = vmatpush.bf16.msrb.mxu3 %v6156_v46 }
 0x244   :  { %1744 = vmatpush.bf16.msrb.mxu0 %v6157_v43  ;;  %1757 = vmatpush.bf16.msrb.mxu1 %v6158_v34 }
 0x246   :  { %1770 = vmatpush.bf16.msrb.mxu2 %v6159_v39  ;;  %1783 = vmatpush.bf16.msrb.mxu3 %v6160_v56 }
 0x248   :  { %1745 = vmatpush.bf16.msrb.mxu0 %v6161_v27  ;;  %1758 = vmatpush.bf16.msrb.mxu1 %v6162_v30 }
 0x24a   :  { %1771 = vmatpush.bf16.msrb.mxu2 %v6163_v58  ;;  %1784 = vmatpush.bf16.msrb.mxu3 %v6164_v14  ;;  %v6165_v14 = vld [vmem:[#allocation16_spill] sm:$0xff] }
 0x267   :  { %v1423_v33 = vpop.f32.mrf.mxu0  ;;  %v1436_v11 = vpop.f32.mrf.mxu1 }
 0x26e   :  { %v1449_v42 = vpop.f32.mrf.mxu2  ;;  %v5045_v46 = vpop.f32.mrf.mxu3 }
 0x26f   :  { %v1425_v43 = vpop.f32.mrf.mxu0  ;;  %v1438_v23 = vpop.f32.mrf.mxu1 }
 0x276   :  { %v1451_v34 = vpop.f32.mrf.mxu2  ;;  %v1464_v1 = vpop.f32.mrf.mxu3 }
 0x277   :  { %v1475_v39 = vpop.f32.mrf.mxu0  ;;  %v1488_v38 = vpop.f32.mrf.mxu1 }
 0x278   :  { %v1476_v30 = vadd.f32 %v1475_v39, %v1423_v33  ;;  %v1489_v40 = vadd.f32 %v1488_v38, %v1436_v11 }
 0x27a   :  { %v1518_v17 = vadd.f32 %v1476_v30, %v6165_v14  ;;  %v1519_v47 = vadd.f32 %v1489_v40, %v6166_v16 }
 0x27c   :  { %v3819_v43 = vmul.f32 -1.442695, %v1518_v17  ;;  %v3820_v23 = vmul.f32 -1.442695, %v1519_v47 }
 0x27e   :  { %v1501_v56 = vpop.f32.mrf.mxu2  ;;  %v1514_v59 = vpop.f32.mrf.mxu3  ;;  %4015 = vpow2.f32 %v3819_v43 }
 0x27f   :  { %v1477_v27 = vpop.f32.mrf.mxu0  ;;  %v1490_v32 = vpop.f32.mrf.mxu1  ;;  %4017 = vpow2.f32 %v3820_v23  ;;  %v1502_v30 = vadd.f32 %v1501_v56, %v1449_v42 }
 0x284   :  { %v4016_v17 = vpop.eup %4015 }
 0x285   :  { %v4018_v47 = vpop.eup %4017  ;;  %v5053_v23 = vadd.f32 1.0, %v4016_v17 }
 0x286   :  { %v1503_v58 = vpop.f32.mrf.mxu2  ;;  %v1516_v62 = vpop.f32.mrf.mxu3 }
 0x287   :  { %v6167_v62 = vld [vmem:[#allocation42_spill] sm:$0xff]  ;;  %vm1539_vm6 = vweird.f32 %v5053_v23 }
 0x288   :  { %v1597_v44 = vpop.f32.mrf.mxu0  ;;  %v1610_v28 = vpop.f32.mrf.mxu1  ;;  %v421_v58 = vrot.slane %v6167_v62, 4 }
 0x289   :  { %v1644_v34 = vrot.slane %v1610_v28, 6 }
 0x28b   :  { %v1647_v38 = vsel %vm405_vm0, %v1597_v44, %v1644_v34 }
 0x290   :  { %v1623_v1 = vpop.f32.mrf.mxu2  ;;  %v1636_v15 = vpop.f32.mrf.mxu3 }
 0x291   :  { %v1645_v24 = vrot.slane %v1623_v1, 4  ;;  %v1646_v27 = vrot.slane %v1636_v15, 2  ;;  %v1599_v32 = vpop.f32.mrf.mxu0  ;;  %v1612_v33 = vpop.f32.mrf.mxu1  ;;  %v1532_v15 = vadd.f32 1.0, %v4018_v47  ;;  %v6168_v1 = vld [vmem:[#allocation18_spill] sm:$0xff] }
 0x292   :  { %v1520_v32 = vadd.f32 %v1502_v30, %v6168_v1 }
 0x293   :  { %v1648_v11 = vsel %vm407_vm1, %v1645_v24, %v1646_v27  ;;  %vm1554_vm7 = vweird.f32 %v1532_v15 }
 0x294   :  { %v1649_v40 = vsel %vm409_vm4, %v1647_v38, %v1648_v11  ;;  %v3821_v24 = vmul.f32 -1.442695, %v1520_v32  ;;  %v1515_v32 = vadd.f32 %v1514_v59, %v5045_v46  ;;  %v1560_v46 = vand.u32 2147483648, %v1532_v15 }
 0x295   :  { %v1651_v39 = vadd.f32 %v1649_v40, %v421_v58 }
 0x297   :  { %v3822_v28 = vmul.f32 -1.442695, %v1651_v39  ;;  %v1672_v58 = vrot.slane %v1651_v39, 6 }
 0x298   :  { %v1625_v43 = vpop.f32.mrf.mxu2  ;;  %v1638_v16 = vpop.f32.mrf.mxu3 }
 0x299   :  { %4019 = vpow2.f32 %v3822_v28 }
 0x29a   :  { %4021 = vrcp.f32 %v5053_v23 }
 0x29b   :  { %4023 = vrcp.f32 %v1532_v15 }
 0x29f   :  { %v4020_v44 = vpop.eup %4019 }
 0x2a0   :  { %v1655_v34 = vadd.f32 1.0, %v4020_v44  ;;  %v4022_v27 = vpop.eup %4021 }
 0x2a1   :  { %v4024_v33 = vpop.eup %4023  ;;  %v1535_v42 = vmul.f32 %v4022_v27, %v5053_v23  ;;  %vm1540_vm3 = vweird.f32 %v4022_v27 }
 0x2a2   :  { %4025 = vrcp.f32 %v1655_v34  ;;  %v1550_v56 = vmul.f32 %v4024_v33, %v1532_v15  ;;  %v1667_v47 = vand.u32 2147483648, %v1655_v34  ;;  %v1665_v43 = vand.u32 2147483647, %v1655_v34  ;;  %vm5066_vm8 = vmor %vm1539_vm6, %vm1540_vm3 }
 0x2a3   :  { %4027 = vpow2.f32 %v3821_v24  ;;  %v1536_v11 = vsub.f32 1.0, %v1535_v42  ;;  %vm1661_vm14 = vweird.f32 %v1655_v34  ;;  %v1521_v42 = vadd.f32 %v1515_v32, %v4920_v54 }
 0x2a4   :  { %v1551_v40 = vsub.f32 1.0, %v1550_v56  ;;  %4029 = vtanh.f32 %v1672_v58  ;;  %v1668_v14 = vor.u32 1.1754944e-38, %v1667_v47  ;;  %vm1666_vm2 = vcmp.eq.f32.partialorder %v1665_v43, 8.507059e+37 }
 0x2a5   :  { %v1537_v24 = vmul.f32 %v4022_v27, %v1536_v11  ;;  %vm1555_vm5 = vweird.f32 %v4024_v33  ;;  %v1545_v58 = vand.u32 2147483648, %v5053_v23  ;;  %v1561_v32 = vor.u32 1.1754944e-38, %v1560_v46 }
 0x2a6   :  { %v1552_v44 = vmul.f32 %v4024_v33, %v1551_v40  ;;  %vm1556_vm9 = vmor %vm1554_vm7, %vm1555_vm5 }
 0x2a8   :  { %v4026_v16 = vpop.eup %4025 }
 0x2a9   :  { %v1657_v38 = vmul.f32 %v4026_v16, %v1655_v34  ;;  %v4028_v62 = vpop.eup %4027  ;;  %vm1662_vm13 = vweird.f32 %v4026_v16  ;;  %v1543_v34 = vand.u32 2147483647, %v5053_v23  ;;  %v1546_v23 = vor.u32 1.1754944e-38, %v1545_v58 }
 0x2aa   :  { %v5058_v28 = vadd.f32 1.0, %v4028_v62  ;;  %vm1663_vm15 = vmor %vm1661_vm14, %vm1662_vm13  ;;  %v1553_v62 = vadd.f32 %v4024_v33, %v1552_v44  ;;  %v4030_v59 = vpop.eup %4029 }
 0x2ab   :  { %v1658_v17 = vsub.f32 1.0, %v1657_v38  ;;  %v1538_v38 = vadd.f32 %v4022_v27, %v1537_v24  ;;  %vm1544_vm10 = vcmp.eq.f32.partialorder %v1543_v34, 8.507059e+37 }
 0x2ac   :  { %4031 = vrcp.f32 %v5058_v28  ;;  %vm1569_vm13 = vweird.f32 %v5058_v28  ;;  %v1573_v34 = vand.u32 2147483647, %v5058_v28 }
 0x2ad   :  { %v1659_v30 = vmul.f32 %v4026_v16, %v1658_v17  ;;  %4033 = vtanh.f32 %v1521_v42  ;;  %v1542_v47 = vsel %vm5066_vm8, %v4022_v27, %v1538_v38 }
 0x2ae   :  { %v1547_v44 = vsel %vm1544_vm10, %v1546_v23, %v1542_v47  ;;  %v6172_v47 = vld [vmem:[#allocation21_spill] sm:$0xff]  ;;  %v6175_v23 = vld [vmem:[#allocation24_spill] sm:$0xff] }
 0x2af   :  { %v1660_v1 = vadd.f32 %v4026_v16, %v1659_v30  ;;  %v1557_v30 = vsel %vm1556_vm9, %v4024_v33, %v1553_v62 }
 0x2b1   :  { %v1664_v39 = vsel %vm1663_vm15, %v4026_v16, %v1660_v1  ;;  %v1558_v16 = vand.u32 2147483647, %v1532_v15  ;;  %vm1574_vm15 = vcmp.eq.f32.partialorder %v1573_v34, 8.507059e+37  ;;  %v6190_v34 = vld [vmem:[#allocation39_spill] sm:$0xff] }
 0x2b2   :  { %v1669_v56 = vsel %vm1666_vm2, %v1668_v14, %v1664_v39  ;;  %v4032_v40 = vpop.eup %4031 }
 0x2b3   :  { %v1676_v17 = vrot.slane %v1669_v56, 2  ;;  %v1679_v11 = vmul.f32 %v4030_v59, %v1669_v56  ;;  %vm1559_vm11 = vcmp.eq.f32.partialorder %v1558_v16, 8.507059e+37  ;;  %v1565_v15 = vmul.f32 %v4032_v40, %v5058_v28  ;;  %v4034_v24 = vpop.eup %4033 }
 0x2b4   :  { %v1581_v42 = vmul.f32 %v4034_v24, %v1547_v44  ;;  %v1682_v59 = vrot.slane %v1669_v56, 4  ;;  %vm1570_vm12 = vweird.f32 %v4032_v40  ;;  %v1575_v56 = vand.u32 2147483648, %v5058_v28  ;;  %v6177_v44 = vld [vmem:[#allocation26_spill] sm:$0xff]  ;;  %v6179_v24 = vld [vmem:[#allocation28_spill] sm:$0xff] }
 0x2b5   :  { %v1678_v14 = vmul.f32 %v1676_v17, %v4939_v6  ;;  %v1562_v6 = vsel %vm1559_vm11, %v1561_v32, %v1557_v30  ;;  %v1566_v17 = vsub.f32 1.0, %v1565_v15  ;;  %vm1571_vm14 = vmor %vm1569_vm13, %vm1570_vm12  ;;  %v6173_v30 = vld [vmem:[#allocation22_spill] sm:$0xff]  ;;  %v6174_v32 = vld [vmem:[#allocation23_spill] sm:$0xff] }
 0x2b6   :  { %v1580_v39 = vmul.f32 %v1562_v6, %v4943_v18  ;;  %v1576_v16 = vor.u32 1.1754944e-38, %v1575_v56  ;;  %v6176_v15 = vld [vmem:[#allocation25_spill] sm:$0xff]  ;;  %v6178_v6 = vld [vmem:[#allocation27_spill] sm:$0xff]  ;;  %v6189_v56 = vld [vmem:[#allocation38_spill] sm:$0xff] }
 0x2b7   :  { %v5073_v43 = vadd.f32 %v1679_v11, %v1678_v14  ;;  %v1567_v46 = vmul.f32 %v4032_v40, %v1566_v17  ;;  %v6182_v17 = vld [vmem:[#allocation31_spill] sm:$0xff] }
 0x2b8   :  { %v5078_v38 = vadd.f32 %v1581_v42, %v1580_v39  ;;  %v6180_v39 = vld [vmem:[#allocation29_spill] sm:$0xff]  ;;  %v6181_v42 = vld [vmem:[#allocation30_spill] sm:$0xff] }
 0x2b9   :  { %4035 = vtanh.f32 %v5073_v43  ;;  %v1568_v18 = vadd.f32 %v4032_v40, %v1567_v46  ;;  %v6187_v46 = vld [vmem:[#allocation36_spill] sm:$0xff] }
 0x2ba   :  { %4037 = vtanh.f32 %v5078_v38 }
 0x2bb   :  { %v1572_v58 = vsel %vm1571_vm14, %v4032_v40, %v1568_v18  ;;  %v6171_v40 = vld [vmem:[#allocation20_spill] sm:$0xff]  ;;  %v6188_v18 = vld [vmem:[#allocation37_spill] sm:$0xff] }
 0x2bc   :  { %v1577_v14 = vsel %vm1574_vm15, %v1576_v16, %v1572_v58  ;;  %v6191_v58 = vld [vmem:[#allocation40_spill] sm:$0xff]  ;;  %v6193_v16 = vld [vmem:[#allocation45_spill] sm:$0xff] }
 0x2bf   :  { %v4036_v27 = vpop.eup %4035 }
 0x2c0   :  { %v1684_v33 = vmul.f32 %v4036_v27, %v1682_v59  ;;  %v4038_v1 = vpop.eup %4037  ;;  %v6183_v59 = vld [vmem:[#allocation32_spill] sm:$0xff]  ;;  %v6184_v27 = vld [vmem:[#allocation33_spill] sm:$0xff] }
 0x2c1   :  { %v1584_v11 = vmul.f32 %v4038_v1, %v1577_v14  ;;  %v6192_v1 = vld [vmem:[#allocation44_spill] sm:$0xff]  ;;  %v6194_v14 = vld [vmem:[#allocation46_spill] sm:$0xff] }
 0x2c2   :  { %v1685_v62 = vpack.c.bf16 %v1684_v33, %v1684_v33  ;;  %v6185_v33 = vld [vmem:[#allocation34_spill] sm:$0xff] }
 0x2c3   :  { %v1585_v28 = vpack.c.bf16 %v1584_v11, %v1584_v11  ;;  %v6195_v11 = vld [vmem:[#allocation47_spill] sm:$0xff] }
 0x2c4   :  { %1694 = vmatmul.bf16.vlgmr.msra.gmra.mxu0 %v1685_v62  ;;  %1707 = vmatmul.bf16.vlgmr.msra.gmra.mxu1 %v1685_v62 }
 0x2c5   :  { %1720 = vmatmul.bf16.vlgmr.msra.gmra.mxu2 %v1685_v62  ;;  %1733 = vmatmul.bf16.vlgmr.msra.gmra.mxu3 %v1685_v62 }
 0x2c6   :  { %1860 = vmatpush.bf16.msra.mxu0 %v4386_v45  ;;  %1873 = vmatpush.bf16.msra.mxu1 %v4391_v51 }
 0x2c7   :  { %1886 = vmatpush.bf16.msra.mxu2 %v4393_v52  ;;  %1899 = vmatpush.bf16.msra.mxu3 %v4398_v55 }
 0x2ca   :  { %1861 = vmatpush.bf16.msra.mxu0 %v4410_v60  ;;  %1874 = vmatpush.bf16.msra.mxu1 %v4414_v63 }
 0x2cb   :  { %1887 = vmatpush.bf16.msra.mxu2 %v4416_v0  ;;  %1900 = vmatpush.bf16.msra.mxu3 %v4419_v3 }
 0x2ce   :  { %1862 = vmatpush.bf16.msra.mxu0 %v4422_v8  ;;  %1875 = vmatpush.bf16.msra.mxu1 %v4426_v9 }
 0x2cf   :  { %1888 = vmatpush.bf16.msra.mxu2 %v4428_v10  ;;  %1901 = vmatpush.bf16.msra.mxu3 %v4431_v13 }
 0x2d2   :  { %1863 = vmatpush.bf16.msra.mxu0 %v4434_v20  ;;  %1876 = vmatpush.bf16.msra.mxu1 %v4439_v25 }
 0x2d3   :  { %1889 = vmatpush.bf16.msra.mxu2 %v4441_v26  ;;  %1902 = vmatpush.bf16.msra.mxu3 %v4443_v29 }
 0x2d4   :  { %1746 = vmatmul.bf16.vlgmr.msrb.gmra.mxu0 %v1585_v28  ;;  %1759 = vmatmul.bf16.vlgmr.msrb.gmra.mxu1 %v1585_v28 }
 0x2d5   :  { %1772 = vmatmul.bf16.vlgmr.msrb.gmra.mxu2 %v1585_v28  ;;  %1785 = vmatmul.bf16.vlgmr.msrb.gmra.mxu3 %v1585_v28  ;;  %v6196_v28 = vld [vmem:[#allocation48_spill] sm:$0xff] }
 0x2d6   :  { %1864 = vmatpush.bf16.msra.mxu0 %v4446_v35  ;;  %1877 = vmatpush.bf16.msra.mxu1 %v4450_v36 }
 0x2d7   :  { %1890 = vmatpush.bf16.msra.mxu2 %v4452_v37  ;;  %1903 = vmatpush.bf16.msra.mxu3 %v4455_v41 }
 0x2da   :  { %1865 = vmatpush.bf16.msra.mxu0 %v4458_v48  ;;  %1878 = vmatpush.bf16.msra.mxu1 %v4462_v49 }
 0x2db   :  { %1891 = vmatpush.bf16.msra.mxu2 %v4464_v50  ;;  %1904 = vmatpush.bf16.msra.mxu3 %v4467_v57 }
 0x2de   :  { %1866 = vmatpush.bf16.msra.mxu0 %v4470_v2  ;;  %1879 = vmatpush.bf16.msra.mxu1 %v4474_v4 }
 0x2df   :  { %1892 = vmatpush.bf16.msra.mxu2 %v4476_v5  ;;  %1905 = vmatpush.bf16.msra.mxu3 %v4479_v12 }
 0x2e2   :  { %1867 = vmatpush.bf16.msra.mxu0 %v4482_v19  ;;  %1880 = vmatpush.bf16.msra.mxu1 %v4486_v21 }
 0x2e3   :  { %1893 = vmatpush.bf16.msra.mxu2 %v4488_v22  ;;  %1906 = vmatpush.bf16.msra.mxu3 %v6048_v31 }
 0x2e5   :  { %1868 = vmatmul.bf16.vlgmr.msra.gmra.mxu0 %v1685_v62  ;;  %1881 = vmatmul.bf16.vlgmr.msra.gmra.mxu1 %v1685_v62 }
 0x2e6   :  { %1958 = vmatpush.bf16.msrb.mxu0 %v6049_v53  ;;  %1971 = vmatpush.bf16.msrb.mxu1 %v6050_v7 }
 0x2e7   :  { %1894 = vmatmul.bf16.vlgmr.msra.gmra.mxu2 %v1685_v62  ;;  %1907 = vmatmul.bf16.vlgmr.msra.gmra.mxu3 %v1685_v62  ;;  %v6186_v62 = vld [vmem:[#allocation35_spill] sm:$0xff] }
 0x2e8   :  { %1984 = vmatpush.bf16.msrb.mxu2 %v6051_v61  ;;  %1997 = vmatpush.bf16.msrb.mxu3 %v6171_v40 }
 0x2ea   :  { %1959 = vmatpush.bf16.msrb.mxu0 %v6172_v47  ;;  %1972 = vmatpush.bf16.msrb.mxu1 %v6173_v30 }
 0x2ec   :  { %1985 = vmatpush.bf16.msrb.mxu2 %v6174_v32  ;;  %1998 = vmatpush.bf16.msrb.mxu3 %v6175_v23 }
 0x2ee   :  { %1960 = vmatpush.bf16.msrb.mxu0 %v6176_v15  ;;  %1973 = vmatpush.bf16.msrb.mxu1 %v6177_v44  ;;  %v6233_v15 = vld [vmem:[#allocation17_spill] sm:$0xff] }
 0x2f0   :  { %1986 = vmatpush.bf16.msrb.mxu2 %v6178_v6  ;;  %1999 = vmatpush.bf16.msrb.mxu3 %v6179_v24 }
 0x2f2   :  { %1961 = vmatpush.bf16.msrb.mxu0 %v6180_v39  ;;  %1974 = vmatpush.bf16.msrb.mxu1 %v6181_v42 }
 0x2f4   :  { %1987 = vmatpush.bf16.msrb.mxu2 %v6182_v17  ;;  %2000 = vmatpush.bf16.msrb.mxu3 %v6183_v59 }
 0x2f6   :  { %1962 = vmatpush.bf16.msrb.mxu0 %v6184_v27  ;;  %1975 = vmatpush.bf16.msrb.mxu1 %v6185_v33 }
 0x2f8   :  { %1988 = vmatpush.bf16.msrb.mxu2 %v6186_v62  ;;  %2001 = vmatpush.bf16.msrb.mxu3 %v6187_v46  ;;  %v6197_v62 = vld [vmem:[#allocation49_spill] sm:$0xff] }
 0x2f9   :  { %v6198_v46 = vld [vmem:[#allocation53_spill] sm:$0xff] }
 0x2fa   :  { %1963 = vmatpush.bf16.msrb.mxu0 %v6188_v18  ;;  %1976 = vmatpush.bf16.msrb.mxu1 %v6189_v56  ;;  %v6199_v18 = vld [vmem:[#allocation57_spill] sm:$0xff]  ;;  %v6200_v56 = vld [vmem:[#allocation50_spill] sm:$0xff] }
 0x2fc   :  { %1989 = vmatpush.bf16.msrb.mxu2 %v6190_v34  ;;  %2002 = vmatpush.bf16.msrb.mxu3 %v6191_v58  ;;  %v6201_v34 = vld [vmem:[#allocation51_spill] sm:$0xff]  ;;  %v6202_v58 = vld [vmem:[#allocation58_spill] sm:$0xff] }
 0x2fe   :  { %1964 = vmatpush.bf16.msrb.mxu0 %v6192_v1  ;;  %1977 = vmatpush.bf16.msrb.mxu1 %v6193_v16  ;;  %v6203_v1 = vld [vmem:[#allocation59_spill] sm:$0xff]  ;;  %v6204_v16 = vld [vmem:[#allocation60_spill] sm:$0xff] }
 0x300   :  { %1990 = vmatpush.bf16.msrb.mxu2 %v6194_v14  ;;  %2003 = vmatpush.bf16.msrb.mxu3 %v6195_v11  ;;  %v6205_v14 = vld [vmem:[#allocation61_spill] sm:$0xff]  ;;  %v6206_v11 = vld [vmem:[#allocation62_spill] sm:$0xff] }
 0x302   :  { %1965 = vmatpush.bf16.msrb.mxu0 %v6196_v28  ;;  %1978 = vmatpush.bf16.msrb.mxu1 %v6197_v62  ;;  %v6207_v28 = vld [vmem:[#allocation63_spill] sm:$0xff]  ;;  %v6208_v62 = vld [vmem:[#allocation64_spill] sm:$0xff] }
 0x304   :  { %1991 = vmatpush.bf16.msrb.mxu2 %v6200_v56  ;;  %2004 = vmatpush.bf16.msrb.mxu3 %v6201_v34  ;;  %v6211_v56 = vld [vmem:[#allocation67_spill] sm:$0xff]  ;;  %v6212_v34 = vld [vmem:[#allocation68_spill] sm:$0xff] }
 0x306   :  { %2010 = vmatpush.bf16.msra.mxu0 %v6198_v46  ;;  %2023 = vmatpush.bf16.msra.mxu1 %v6199_v18  ;;  %v6209_v46 = vld [vmem:[#allocation65_spill] sm:$0xff]  ;;  %v6210_v18 = vld [vmem:[#allocation66_spill] sm:$0xff] }
 0x308   :  { %2036 = vmatpush.bf16.msra.mxu2 %v6202_v58  ;;  %2049 = vmatpush.bf16.msra.mxu3 %v6203_v1  ;;  %v6213_v58 = vld [vmem:[#allocation69_spill] sm:$0xff]  ;;  %v6214_v1 = vld [vmem:[#allocation70_spill] sm:$0xff] }
 0x30a   :  { %2011 = vmatpush.bf16.msra.mxu0 %v6204_v16  ;;  %2024 = vmatpush.bf16.msra.mxu1 %v6205_v14  ;;  %v6215_v16 = vld [vmem:[#allocation71_spill] sm:$0xff]  ;;  %v6216_v14 = vld [vmem:[#allocation72_spill] sm:$0xff] }
 0x30c   :  { %2037 = vmatpush.bf16.msra.mxu2 %v6206_v11  ;;  %2050 = vmatpush.bf16.msra.mxu3 %v6207_v28  ;;  %v6217_v11 = vld [vmem:[#allocation73_spill] sm:$0xff]  ;;  %v6218_v28 = vld [vmem:[#allocation74_spill] sm:$0xff] }
 0x30e   :  { %2012 = vmatpush.bf16.msra.mxu0 %v6208_v62  ;;  %2025 = vmatpush.bf16.msra.mxu1 %v6209_v46  ;;  %v6219_v62 = vld [vmem:[#allocation75_spill] sm:$0xff]  ;;  %v6220_v46 = vld [vmem:[#allocation76_spill] sm:$0xff] }
 0x310   :  { %2038 = vmatpush.bf16.msra.mxu2 %v6210_v18  ;;  %2051 = vmatpush.bf16.msra.mxu3 %v6211_v56  ;;  %v6221_v18 = vld [vmem:[#allocation77_spill] sm:$0xff]  ;;  %v6222_v56 = vld [vmem:[#allocation78_spill] sm:$0xff] }
 0x312   :  { %2013 = vmatpush.bf16.msra.mxu0 %v6212_v34  ;;  %2026 = vmatpush.bf16.msra.mxu1 %v6213_v58  ;;  %v6223_v34 = vld [vmem:[#allocation79_spill] sm:$0xff]  ;;  %v6224_v58 = vld [vmem:[#allocation80_spill] sm:$0xff] }
 0x314   :  { %2039 = vmatpush.bf16.msra.mxu2 %v6214_v1  ;;  %2052 = vmatpush.bf16.msra.mxu3 %v6215_v16  ;;  %v6225_v1 = vld [vmem:[#allocation81_spill] sm:$0xff]  ;;  %v6226_v16 = vld [vmem:[#allocation82_spill] sm:$0xff] }
 0x316   :  { %2014 = vmatpush.bf16.msra.mxu0 %v6216_v14  ;;  %2027 = vmatpush.bf16.msra.mxu1 %v6217_v11  ;;  %v6227_v14 = vld [vmem:[#allocation83_spill] sm:$0xff]  ;;  %v6228_v11 = vld [vmem:[#allocation84_spill] sm:$0xff] }
 0x318   :  { %2040 = vmatpush.bf16.msra.mxu2 %v6218_v28  ;;  %2053 = vmatpush.bf16.msra.mxu3 %v6219_v62  ;;  %v6229_v28 = vld [vmem:[#allocation85_spill] sm:$0xff]  ;;  %v6230_v62 = vld [vmem:[#allocation86_spill] sm:$0xff] }
 0x31a   :  { %2015 = vmatpush.bf16.msra.mxu0 %v6220_v46  ;;  %2028 = vmatpush.bf16.msra.mxu1 %v6221_v18  ;;  %v6231_v46 = vld [vmem:[#allocation87_spill] sm:$0xff] }
 0x31c   :  { %2041 = vmatpush.bf16.msra.mxu2 %v6222_v56  ;;  %2054 = vmatpush.bf16.msra.mxu3 %v6223_v34 }
 0x31e   :  { %2016 = vmatpush.bf16.msra.mxu0 %v6224_v58  ;;  %2029 = vmatpush.bf16.msra.mxu1 %v6225_v1 }
 0x320   :  { %2042 = vmatpush.bf16.msra.mxu2 %v6226_v16  ;;  %2055 = vmatpush.bf16.msra.mxu3 %v6227_v14 }
 0x322   :  { %2017 = vmatpush.bf16.msra.mxu0 %v6228_v11  ;;  %2030 = vmatpush.bf16.msra.mxu1 %v6229_v28 }
 0x324   :  { %2043 = vmatpush.bf16.msra.mxu2 %v6230_v62  ;;  %2056 = vmatpush.bf16.msra.mxu3 %v6231_v46  ;;  %v6232_v46 = vld [vmem:[#allocation16_spill] sm:$0xff] }
 0x341   :  { %v1695_v18 = vpop.f32.mrf.mxu0  ;;  %v1708_v56 = vpop.f32.mrf.mxu1 }
 0x348   :  { %v1721_v33 = vpop.f32.mrf.mxu2  ;;  %v5180_v34 = vpop.f32.mrf.mxu3 }
 0x349   :  { %v1697_v58 = vpop.f32.mrf.mxu0  ;;  %v1710_v27 = vpop.f32.mrf.mxu1 }
 0x350   :  { %v1723_v1 = vpop.f32.mrf.mxu2  ;;  %v1736_v59 = vpop.f32.mrf.mxu3 }
 0x351   :  { %v1747_v16 = vpop.f32.mrf.mxu0  ;;  %v1760_v17 = vpop.f32.mrf.mxu1 }
 0x352   :  { %v1748_v28 = vadd.f32 %v1747_v16, %v1695_v18  ;;  %v1761_v24 = vadd.f32 %v1760_v17, %v1708_v56 }
 0x354   :  { %v1790_v44 = vadd.f32 %v1748_v28, %v6232_v46  ;;  %v1791_v23 = vadd.f32 %v1761_v24, %v6233_v15 }
 0x356   :  { %v3823_v58 = vmul.f32 -1.442695, %v1790_v44  ;;  %v3824_v27 = vmul.f32 -1.442695, %v1791_v23 }
 0x358   :  { %v1773_v14 = vpop.f32.mrf.mxu2  ;;  %v1786_v42 = vpop.f32.mrf.mxu3  ;;  %4039 = vpow2.f32 %v3823_v58 }
 0x359   :  { %v1749_v11 = vpop.f32.mrf.mxu0  ;;  %v1762_v39 = vpop.f32.mrf.mxu1  ;;  %4041 = vpow2.f32 %v3824_v27  ;;  %v1774_v28 = vadd.f32 %v1773_v14, %v1721_v33 }
 0x35e   :  { %v4040_v44 = vpop.eup %4039 }
 0x35f   :  { %v4042_v23 = vpop.eup %4041  ;;  %v5188_v27 = vadd.f32 1.0, %v4040_v44 }
 0x360   :  { %v1775_v62 = vpop.f32.mrf.mxu2  ;;  %v1788_v6 = vpop.f32.mrf.mxu3 }
 0x361   :  { %v6234_v6 = vld [vmem:[#allocation43_spill] sm:$0xff]  ;;  %vm1811_vm10 = vweird.f32 %v5188_v27 }
 0x362   :  { %v1869_v32 = vpop.f32.mrf.mxu0  ;;  %v1882_v30 = vpop.f32.mrf.mxu1  ;;  %v425_v62 = vrot.slane %v6234_v6, 6 }
 0x363   :  { %v1916_v1 = vrot.slane %v1882_v30, 6 }
 0x365   :  { %v1919_v17 = vsel %vm405_vm0, %v1869_v32, %v1916_v1 }
 0x36a   :  { %v1895_v59 = vpop.f32.mrf.mxu2  ;;  %v1908_v47 = vpop.f32.mrf.mxu3 }
 0x36b   :  { %v1917_v40 = vrot.slane %v1895_v59, 4  ;;  %v1918_v11 = vrot.slane %v1908_v47, 2  ;;  %v1871_v39 = vpop.f32.mrf.mxu0  ;;  %v1884_v18 = vpop.f32.mrf.mxu1  ;;  %v1804_v47 = vadd.f32 1.0, %v4042_v23  ;;  %v6235_v59 = vld [vmem:[#allocation18_spill] sm:$0xff] }
 0x36c   :  { %v1792_v39 = vadd.f32 %v1774_v28, %v6235_v59 }
 0x36d   :  { %v1920_v56 = vsel %vm407_vm1, %v1917_v40, %v1918_v11  ;;  %vm1826_vm9 = vweird.f32 %v1804_v47 }
 0x36e   :  { %v1921_v24 = vsel %vm409_vm4, %v1919_v17, %v1920_v56  ;;  %v3825_v40 = vmul.f32 -1.442695, %v1792_v39  ;;  %v1787_v39 = vadd.f32 %v1786_v42, %v5180_v34  ;;  %v1832_v34 = vand.u32 2147483648, %v1804_v47 }
 0x36f   :  { %v1923_v16 = vadd.f32 %v1921_v24, %v425_v62 }
 0x371   :  { %v3826_v30 = vmul.f32 -1.442695, %v1923_v16  ;;  %v1944_v62 = vrot.slane %v1923_v16, 6 }
 0x372   :  { %v1897_v58 = vpop.f32.mrf.mxu2  ;;  %v1910_v15 = vpop.f32.mrf.mxu3 }
 0x373   :  { %4043 = vpow2.f32 %v3826_v30 }
 0x374   :  { %4045 = vrcp.f32 %v5188_v27 }
 0x375   :  { %4047 = vrcp.f32 %v1804_v47 }
 0x379   :  { %v4044_v32 = vpop.eup %4043 }
 0x37a   :  { %v1927_v1 = vadd.f32 1.0, %v4044_v32  ;;  %v4046_v11 = vpop.eup %4045 }
 0x37b   :  { %v4048_v18 = vpop.eup %4047  ;;  %v1807_v33 = vmul.f32 %v4046_v11, %v5188_v27  ;;  %vm1812_vm8 = vweird.f32 %v4046_v11 }
 0x37c   :  { %4049 = vrcp.f32 %v1927_v1  ;;  %v1822_v14 = vmul.f32 %v4048_v18, %v1804_v47  ;;  %v1939_v23 = vand.u32 2147483648, %v1927_v1  ;;  %v1937_v58 = vand.u32 2147483647, %v1927_v1  ;;  %vm1813_vm12 = vmor %vm1811_vm10, %vm1812_vm8 }
 0x37d   :  { %4051 = vpow2.f32 %v3825_v40  ;;  %v1808_v56 = vsub.f32 1.0, %v1807_v33  ;;  %vm1933_vm3 = vweird.f32 %v1927_v1  ;;  %vm1827_vm7 = vweird.f32 %v4048_v18 }
 0x37e   :  { %v1823_v24 = vsub.f32 1.0, %v1822_v14  ;;  %4053 = vtanh.f32 %v1944_v62  ;;  %v1940_v46 = vor.u32 1.1754944e-38, %v1939_v23  ;;  %vm1938_vm6 = vcmp.eq.f32.partialorder %v1937_v58, 8.507059e+37  ;;  %vm5200_vm11 = vmor %vm1826_vm9, %vm1827_vm7 }
 0x37f   :  { %v1809_v40 = vmul.f32 %v4046_v11, %v1808_v56  ;;  %v1793_v33 = vadd.f32 %v1787_v39, %v4920_v54  ;;  %v1833_v39 = vor.u32 1.1754944e-38, %v1832_v34 }
 0x380   :  { %v1824_v32 = vmul.f32 %v4048_v18, %v1823_v24 }
 0x382   :  { %v4050_v15 = vpop.eup %4049 }
 0x383   :  { %v1929_v17 = vmul.f32 %v4050_v15, %v1927_v1  ;;  %v4052_v6 = vpop.eup %4051  ;;  %vm1934_vm2 = vweird.f32 %v4050_v15  ;;  %v1817_v1 = vand.u32 2147483648, %v5188_v27 }
 0x384   :  { %v5193_v30 = vadd.f32 1.0, %v4052_v6  ;;  %vm1935_vm5 = vmor %vm1933_vm3, %vm1934_vm2  ;;  %v1825_v6 = vadd.f32 %v4048_v18, %v1824_v32  ;;  %v4054_v42 = vpop.eup %4053 }
 0x385   :  { %v1930_v44 = vsub.f32 1.0, %v1929_v17  ;;  %v1810_v17 = vadd.f32 %v4046_v11, %v1809_v40  ;;  %v1818_v32 = vor.u32 1.1754944e-38, %v1817_v1 }
 0x386   :  { %4055 = vrcp.f32 %v5193_v30  ;;  %vm1841_vm2 = vweird.f32 %v5193_v30  ;;  %v1845_v1 = vand.u32 2147483647, %v5193_v30 }
 0x387   :  { %v1931_v28 = vmul.f32 %v4050_v15, %v1930_v44  ;;  %4057 = vtanh.f32 %v1793_v33  ;;  %v1814_v23 = vsel %vm1813_vm12, %v4046_v11, %v1810_v17 }
 0x389   :  { %v1932_v59 = vadd.f32 %v4050_v15, %v1931_v28  ;;  %v1829_v28 = vsel %vm5200_vm11, %v4048_v18, %v1825_v6 }
 0x38b   :  { %v1936_v16 = vsel %vm1935_vm5, %v4050_v15, %v1932_v59  ;;  %v1815_v59 = vand.u32 2147483647, %v5188_v27  ;;  %v1830_v15 = vand.u32 2147483647, %v1804_v47  ;;  %vm1846_vm5 = vcmp.eq.f32.partialorder %v1845_v1, 8.507059e+37  ;;  %v6257_v1 = vld [vmem:[#allocation39_spill] sm:$0xff] }
 0x38c   :  { %v1941_v14 = vsel %vm1938_vm6, %v1940_v46, %v1936_v16  ;;  %v4056_v24 = vpop.eup %4055 }
 0x38d   :  { %v1948_v44 = vrot.slane %v1941_v14, 2  ;;  %v1951_v56 = vmul.f32 %v4054_v42, %v1941_v14  ;;  %vm1816_vm13 = vcmp.eq.f32.partialorder %v1815_v59, 8.507059e+37  ;;  %vm1831_vm14 = vcmp.eq.f32.partialorder %v1830_v15, 8.507059e+37  ;;  %v4058_v40 = vpop.eup %4057 }
 0x38e   :  { %v1837_v27 = vmul.f32 %v4056_v24, %v5193_v30  ;;  %v1819_v47 = vsel %vm1816_vm13, %v1818_v32, %v1814_v23  ;;  %v1954_v17 = vrot.slane %v1941_v14, 4  ;;  %vm1842_vm15 = vweird.f32 %v4056_v24  ;;  %v6239_v23 = vld [vmem:[#allocation21_spill] sm:$0xff]  ;;  %v6242_v32 = vld [vmem:[#allocation24_spill] sm:$0xff] }
 0x38f   :  { %v1950_v46 = vmul.f32 %v1948_v44, %v5073_v43  ;;  %v1834_v43 = vsel %vm1831_vm14, %v1833_v39, %v1829_v28  ;;  %v1853_v33 = vmul.f32 %v4058_v40, %v1819_v47  ;;  %v1847_v14 = vand.u32 2147483648, %v5193_v30  ;;  %vm1843_vm3 = vmor %vm1841_vm2, %vm1842_vm15  ;;  %v6240_v28 = vld [vmem:[#allocation22_spill] sm:$0xff]  ;;  %v6241_v39 = vld [vmem:[#allocation23_spill] sm:$0xff] }
 0x390   :  { %v1852_v16 = vmul.f32 %v1834_v43, %v5078_v38  ;;  %v1838_v11 = vsub.f32 1.0, %v1837_v27  ;;  %v6243_v27 = vld [vmem:[#allocation25_spill] sm:$0xff]  ;;  %v6244_v47 = vld [vmem:[#allocation26_spill] sm:$0xff]  ;;  %v6245_v43 = vld [vmem:[#allocation27_spill] sm:$0xff] }
 0x391   :  { %v5208_v58 = vadd.f32 %v1951_v56, %v1950_v46  ;;  %v1848_v15 = vor.u32 1.1754944e-38, %v1847_v14  ;;  %v6246_v40 = vld [vmem:[#allocation28_spill] sm:$0xff]  ;;  %v6256_v14 = vld [vmem:[#allocation38_spill] sm:$0xff] }
 0x392   :  { %v5213_v6 = vadd.f32 %v1853_v33, %v1852_v16  ;;  %v1839_v42 = vmul.f32 %v4056_v24, %v1838_v11  ;;  %v6247_v16 = vld [vmem:[#allocation29_spill] sm:$0xff]  ;;  %v6248_v33 = vld [vmem:[#allocation30_spill] sm:$0xff]  ;;  %v6249_v11 = vld [vmem:[#allocation31_spill] sm:$0xff] }
 0x393   :  { %4059 = vtanh.f32 %v5208_v58 }
 0x394   :  { %4061 = vtanh.f32 %v5213_v6  ;;  %v1840_v38 = vadd.f32 %v4056_v24, %v1839_v42  ;;  %v6253_v42 = vld [vmem:[#allocation35_spill] sm:$0xff] }
 0x396   :  { %v1844_v62 = vsel %vm1843_vm3, %v4056_v24, %v1840_v38  ;;  %v6238_v24 = vld [vmem:[#allocation20_spill] sm:$0xff]  ;;  %v6255_v38 = vld [vmem:[#allocation37_spill] sm:$0xff] }
 0x397   :  { %v1849_v46 = vsel %vm1846_vm5, %v1848_v15, %v1844_v62  ;;  %v6258_v62 = vld [vmem:[#allocation40_spill] sm:$0xff]  ;;  %v6260_v15 = vld [vmem:[#allocation45_spill] sm:$0xff] }
 0x399   :  { %v4060_v44 = vpop.eup %4059 }
 0x39a   :  { %v1956_v18 = vmul.f32 %v4060_v44, %v1954_v17  ;;  %v4062_v59 = vpop.eup %4061  ;;  %v6250_v17 = vld [vmem:[#allocation32_spill] sm:$0xff]  ;;  %v6251_v44 = vld [vmem:[#allocation33_spill] sm:$0xff] }
 0x39b   :  { %v1856_v56 = vmul.f32 %v4062_v59, %v1849_v46  ;;  %v6259_v59 = vld [vmem:[#allocation44_spill] sm:$0xff]  ;;  %v6261_v46 = vld [vmem:[#allocation46_spill] sm:$0xff] }
 0x39c   :  { %v1957_v34 = vpack.c.bf16 %v1956_v18, %v1956_v18  ;;  %v6252_v18 = vld [vmem:[#allocation34_spill] sm:$0xff] }
 0x39d   :  { %v1857_v30 = vpack.c.bf16 %v1856_v56, %v1856_v56  ;;  %v6262_v56 = vld [vmem:[#allocation47_spill] sm:$0xff] }
 0x39e   :  { %1966 = vmatmul.bf16.vlgmr.msrb.gmra.mxu0 %v1957_v34  ;;  %1979 = vmatmul.bf16.vlgmr.msrb.gmra.mxu1 %v1957_v34 }
 0x39f   :  { %1992 = vmatmul.bf16.vlgmr.msrb.gmra.mxu2 %v1957_v34  ;;  %2005 = vmatmul.bf16.vlgmr.msrb.gmra.mxu3 %v1957_v34 }
 0x3a0   :  { %2132 = vmatpush.bf16.msrb.mxu0 %v4386_v45  ;;  %2145 = vmatpush.bf16.msrb.mxu1 %v4391_v51 }
 0x3a1   :  { %2158 = vmatpush.bf16.msrb.mxu2 %v4393_v52  ;;  %2171 = vmatpush.bf16.msrb.mxu3 %v4398_v55 }
 0x3a4   :  { %2133 = vmatpush.bf16.msrb.mxu0 %v4410_v60  ;;  %2146 = vmatpush.bf16.msrb.mxu1 %v4414_v63 }
 0x3a5   :  { %2159 = vmatpush.bf16.msrb.mxu2 %v4416_v0  ;;  %2172 = vmatpush.bf16.msrb.mxu3 %v4419_v3 }
 0x3a8   :  { %2134 = vmatpush.bf16.msrb.mxu0 %v4422_v8  ;;  %2147 = vmatpush.bf16.msrb.mxu1 %v4426_v9 }
 0x3a9   :  { %2160 = vmatpush.bf16.msrb.mxu2 %v4428_v10  ;;  %2173 = vmatpush.bf16.msrb.mxu3 %v4431_v13 }
 0x3ac   :  { %2135 = vmatpush.bf16.msrb.mxu0 %v4434_v20  ;;  %2148 = vmatpush.bf16.msrb.mxu1 %v4439_v25 }
 0x3ad   :  { %2161 = vmatpush.bf16.msrb.mxu2 %v4441_v26  ;;  %2174 = vmatpush.bf16.msrb.mxu3 %v4443_v29 }
 0x3ae   :  { %2018 = vmatmul.bf16.vlgmr.msra.gmra.mxu0 %v1857_v30  ;;  %2031 = vmatmul.bf16.vlgmr.msra.gmra.mxu1 %v1857_v30 }
 0x3af   :  { %2044 = vmatmul.bf16.vlgmr.msra.gmra.mxu2 %v1857_v30  ;;  %2057 = vmatmul.bf16.vlgmr.msra.gmra.mxu3 %v1857_v30  ;;  %v6263_v30 = vld [vmem:[#allocation48_spill] sm:$0xff] }
 0x3b0   :  { %2136 = vmatpush.bf16.msrb.mxu0 %v4446_v35  ;;  %2149 = vmatpush.bf16.msrb.mxu1 %v4450_v36 }
 0x3b1   :  { %2162 = vmatpush.bf16.msrb.mxu2 %v4452_v37  ;;  %2175 = vmatpush.bf16.msrb.mxu3 %v4455_v41 }
 0x3b4   :  { %2137 = vmatpush.bf16.msrb.mxu0 %v4458_v48  ;;  %2150 = vmatpush.bf16.msrb.mxu1 %v4462_v49 }
 0x3b5   :  { %2163 = vmatpush.bf16.msrb.mxu2 %v4464_v50  ;;  %2176 = vmatpush.bf16.msrb.mxu3 %v4467_v57 }
 0x3b8   :  { %2138 = vmatpush.bf16.msrb.mxu0 %v4470_v2  ;;  %2151 = vmatpush.bf16.msrb.mxu1 %v4474_v4 }
 0x3b9   :  { %2164 = vmatpush.bf16.msrb.mxu2 %v4476_v5  ;;  %2177 = vmatpush.bf16.msrb.mxu3 %v4479_v12 }
 0x3bc   :  { %2139 = vmatpush.bf16.msrb.mxu0 %v4482_v19  ;;  %2152 = vmatpush.bf16.msrb.mxu1 %v4486_v21 }
 0x3bd   :  { %2165 = vmatpush.bf16.msrb.mxu2 %v4488_v22  ;;  %2178 = vmatpush.bf16.msrb.mxu3 %v6048_v31 }
 0x3bf   :  { %2140 = vmatmul.bf16.vlgmr.msrb.gmra.mxu0 %v1957_v34  ;;  %2153 = vmatmul.bf16.vlgmr.msrb.gmra.mxu1 %v1957_v34 }
 0x3c0   :  { %2230 = vmatpush.bf16.msra.mxu0 %v6049_v53  ;;  %2243 = vmatpush.bf16.msra.mxu1 %v6050_v7 }
 0x3c1   :  { %2166 = vmatmul.bf16.vlgmr.msrb.gmra.mxu2 %v1957_v34  ;;  %2179 = vmatmul.bf16.vlgmr.msrb.gmra.mxu3 %v1957_v34  ;;  %v6254_v34 = vld [vmem:[#allocation36_spill] sm:$0xff] }
 0x3c2   :  { %2256 = vmatpush.bf16.msra.mxu2 %v6051_v61  ;;  %2269 = vmatpush.bf16.msra.mxu3 %v6238_v24 }
 0x3c4   :  { %2231 = vmatpush.bf16.msra.mxu0 %v6239_v23  ;;  %2244 = vmatpush.bf16.msra.mxu1 %v6240_v28 }
 0x3c6   :  { %2257 = vmatpush.bf16.msra.mxu2 %v6241_v39  ;;  %2270 = vmatpush.bf16.msra.mxu3 %v6242_v32 }
 0x3c8   :  { %2232 = vmatpush.bf16.msra.mxu0 %v6243_v27  ;;  %2245 = vmatpush.bf16.msra.mxu1 %v6244_v47  ;;  %v6300_v27 = vld [vmem:[#allocation17_spill] sm:$0xff] }
 0x3ca   :  { %2258 = vmatpush.bf16.msra.mxu2 %v6245_v43  ;;  %2271 = vmatpush.bf16.msra.mxu3 %v6246_v40 }
 0x3cc   :  { %2233 = vmatpush.bf16.msra.mxu0 %v6247_v16  ;;  %2246 = vmatpush.bf16.msra.mxu1 %v6248_v33 }
 0x3ce   :  { %2259 = vmatpush.bf16.msra.mxu2 %v6249_v11  ;;  %2272 = vmatpush.bf16.msra.mxu3 %v6250_v17 }
 0x3d0   :  { %2234 = vmatpush.bf16.msra.mxu0 %v6251_v44  ;;  %2247 = vmatpush.bf16.msra.mxu1 %v6252_v18 }
 0x3d2   :  { %2260 = vmatpush.bf16.msra.mxu2 %v6253_v42  ;;  %2273 = vmatpush.bf16.msra.mxu3 %v6254_v34  ;;  %v6264_v42 = vld [vmem:[#allocation49_spill] sm:$0xff] }
 0x3d3   :  { %v6265_v34 = vld [vmem:[#allocation53_spill] sm:$0xff] }
 0x3d4   :  { %2235 = vmatpush.bf16.msra.mxu0 %v6255_v38  ;;  %2248 = vmatpush.bf16.msra.mxu1 %v6256_v14  ;;  %v6266_v38 = vld [vmem:[#allocation57_spill] sm:$0xff]  ;;  %v6267_v14 = vld [vmem:[#allocation50_spill] sm:$0xff] }
 0x3d6   :  { %2261 = vmatpush.bf16.msra.mxu2 %v6257_v1  ;;  %2274 = vmatpush.bf16.msra.mxu3 %v6258_v62  ;;  %v6268_v1 = vld [vmem:[#allocation51_spill] sm:$0xff]  ;;  %v6269_v62 = vld [vmem:[#allocation58_spill] sm:$0xff] }
 0x3d8   :  { %2236 = vmatpush.bf16.msra.mxu0 %v6259_v59  ;;  %2249 = vmatpush.bf16.msra.mxu1 %v6260_v15  ;;  %v6270_v59 = vld [vmem:[#allocation59_spill] sm:$0xff]  ;;  %v6271_v15 = vld [vmem:[#allocation60_spill] sm:$0xff] }
 0x3da   :  { %2262 = vmatpush.bf16.msra.mxu2 %v6261_v46  ;;  %2275 = vmatpush.bf16.msra.mxu3 %v6262_v56  ;;  %v6272_v46 = vld [vmem:[#allocation61_spill] sm:$0xff]  ;;  %v6273_v56 = vld [vmem:[#allocation62_spill] sm:$0xff] }
 0x3dc   :  { %2237 = vmatpush.bf16.msra.mxu0 %v6263_v30  ;;  %2250 = vmatpush.bf16.msra.mxu1 %v6264_v42  ;;  %v6274_v30 = vld [vmem:[#allocation63_spill] sm:$0xff]  ;;  %v6275_v42 = vld [vmem:[#allocation64_spill] sm:$0xff] }
 0x3de   :  { %2263 = vmatpush.bf16.msra.mxu2 %v6267_v14  ;;  %2276 = vmatpush.bf16.msra.mxu3 %v6268_v1  ;;  %v6278_v14 = vld [vmem:[#allocation67_spill] sm:$0xff]  ;;  %v6279_v1 = vld [vmem:[#allocation68_spill] sm:$0xff] }
 0x3e0   :  { %2282 = vmatpush.bf16.msrb.mxu0 %v6265_v34  ;;  %2295 = vmatpush.bf16.msrb.mxu1 %v6266_v38  ;;  %v6276_v34 = vld [vmem:[#allocation65_spill] sm:$0xff]  ;;  %v6277_v38 = vld [vmem:[#allocation66_spill] sm:$0xff] }
 0x3e2   :  { %2308 = vmatpush.bf16.msrb.mxu2 %v6269_v62  ;;  %2321 = vmatpush.bf16.msrb.mxu3 %v6270_v59  ;;  %v6280_v62 = vld [vmem:[#allocation69_spill] sm:$0xff]  ;;  %v6281_v59 = vld [vmem:[#allocation70_spill] sm:$0xff] }
 0x3e4   :  { %2283 = vmatpush.bf16.msrb.mxu0 %v6271_v15  ;;  %2296 = vmatpush.bf16.msrb.mxu1 %v6272_v46  ;;  %v6282_v15 = vld [vmem:[#allocation71_spill] sm:$0xff]  ;;  %v6283_v46 = vld [vmem:[#allocation72_spill] sm:$0xff] }
 0x3e6   :  { %2309 = vmatpush.bf16.msrb.mxu2 %v6273_v56  ;;  %2322 = vmatpush.bf16.msrb.mxu3 %v6274_v30  ;;  %v6284_v56 = vld [vmem:[#allocation73_spill] sm:$0xff]  ;;  %v6285_v30 = vld [vmem:[#allocation74_spill] sm:$0xff] }
 0x3e8   :  { %2284 = vmatpush.bf16.msrb.mxu0 %v6275_v42  ;;  %2297 = vmatpush.bf16.msrb.mxu1 %v6276_v34  ;;  %v6286_v42 = vld [vmem:[#allocation75_spill] sm:$0xff]  ;;  %v6287_v34 = vld [vmem:[#allocation76_spill] sm:$0xff] }
 0x3ea   :  { %2310 = vmatpush.bf16.msrb.mxu2 %v6277_v38  ;;  %2323 = vmatpush.bf16.msrb.mxu3 %v6278_v14  ;;  %v6288_v38 = vld [vmem:[#allocation77_spill] sm:$0xff]  ;;  %v6289_v14 = vld [vmem:[#allocation78_spill] sm:$0xff] }
 0x3ec   :  { %2285 = vmatpush.bf16.msrb.mxu0 %v6279_v1  ;;  %2298 = vmatpush.bf16.msrb.mxu1 %v6280_v62  ;;  %v6290_v1 = vld [vmem:[#allocation79_spill] sm:$0xff]  ;;  %v6291_v62 = vld [vmem:[#allocation80_spill] sm:$0xff] }
 0x3ee   :  { %2311 = vmatpush.bf16.msrb.mxu2 %v6281_v59  ;;  %2324 = vmatpush.bf16.msrb.mxu3 %v6282_v15  ;;  %v6292_v59 = vld [vmem:[#allocation81_spill] sm:$0xff]  ;;  %v6293_v15 = vld [vmem:[#allocation82_spill] sm:$0xff] }
 0x3f0   :  { %2286 = vmatpush.bf16.msrb.mxu0 %v6283_v46  ;;  %2299 = vmatpush.bf16.msrb.mxu1 %v6284_v56  ;;  %v6294_v46 = vld [vmem:[#allocation83_spill] sm:$0xff]  ;;  %v6295_v56 = vld [vmem:[#allocation84_spill] sm:$0xff] }
 0x3f2   :  { %2312 = vmatpush.bf16.msrb.mxu2 %v6285_v30  ;;  %2325 = vmatpush.bf16.msrb.mxu3 %v6286_v42  ;;  %v6296_v30 = vld [vmem:[#allocation85_spill] sm:$0xff]  ;;  %v6297_v42 = vld [vmem:[#allocation86_spill] sm:$0xff] }
 0x3f4   :  { %2287 = vmatpush.bf16.msrb.mxu0 %v6287_v34  ;;  %2300 = vmatpush.bf16.msrb.mxu1 %v6288_v38  ;;  %v6298_v34 = vld [vmem:[#allocation87_spill] sm:$0xff] }
 0x3f6   :  { %2313 = vmatpush.bf16.msrb.mxu2 %v6289_v14  ;;  %2326 = vmatpush.bf16.msrb.mxu3 %v6290_v1 }
 0x3f8   :  { %2288 = vmatpush.bf16.msrb.mxu0 %v6291_v62  ;;  %2301 = vmatpush.bf16.msrb.mxu1 %v6292_v59 }
 0x3fa   :  { %2314 = vmatpush.bf16.msrb.mxu2 %v6293_v15  ;;  %2327 = vmatpush.bf16.msrb.mxu3 %v6294_v46 }
 0x3fc   :  { %2289 = vmatpush.bf16.msrb.mxu0 %v6295_v56  ;;  %2302 = vmatpush.bf16.msrb.mxu1 %v6296_v30 }
 0x3fe   :  { %2315 = vmatpush.bf16.msrb.mxu2 %v6297_v42  ;;  %2328 = vmatpush.bf16.msrb.mxu3 %v6298_v34  ;;  %v6299_v34 = vld [vmem:[#allocation16_spill] sm:$0xff] }
 0x41b   :  { %v1967_v38 = vpop.f32.mrf.mxu0  ;;  %v1980_v14 = vpop.f32.mrf.mxu1 }
 0x422   :  { %v1993_v18 = vpop.f32.mrf.mxu2  ;;  %v5315_v1 = vpop.f32.mrf.mxu3 }
 0x423   :  { %v1969_v62 = vpop.f32.mrf.mxu0  ;;  %v1982_v44 = vpop.f32.mrf.mxu1 }
 0x42a   :  { %v1995_v59 = vpop.f32.mrf.mxu2  ;;  %v2008_v17 = vpop.f32.mrf.mxu3 }
 0x42b   :  { %v2019_v15 = vpop.f32.mrf.mxu0  ;;  %v2032_v11 = vpop.f32.mrf.mxu1 }
 0x42c   :  { %v2020_v30 = vadd.f32 %v2019_v15, %v1967_v38  ;;  %v2033_v40 = vadd.f32 %v2032_v11, %v1980_v14 }
 0x42e   :  { %v2062_v47 = vadd.f32 %v2020_v30, %v6299_v34  ;;  %v2063_v32 = vadd.f32 %v2033_v40, %v6300_v27  ;;  %v6301_v40 = vld [vmem:[#allocation52_spill] sm:$0xff] }
 0x430   :  { %v3827_v62 = vmul.f32 -1.442695, %v2062_v47  ;;  %v3828_v44 = vmul.f32 -1.442695, %v2063_v32 }
 0x432   :  { %v2045_v46 = vpop.f32.mrf.mxu2  ;;  %v2058_v33 = vpop.f32.mrf.mxu3  ;;  %4063 = vpow2.f32 %v3827_v62 }
 0x433   :  { %v2021_v56 = vpop.f32.mrf.mxu0  ;;  %v2034_v16 = vpop.f32.mrf.mxu1  ;;  %4065 = vpow2.f32 %v3828_v44  ;;  %v6302_v44 = vld [vmem:[#allocation18_spill] sm:$0xff] }
 0x438   :  { %v4064_v15 = vpop.eup %4063 }
 0x439   :  { %v4066_v47 = vpop.eup %4065  ;;  %v5323_v27 = vadd.f32 1.0, %v4064_v15 }
 0x43a   :  { %v2047_v42 = vpop.f32.mrf.mxu2  ;;  %v2060_v43 = vpop.f32.mrf.mxu3 }
 0x43b   :  { %vm2083_vm13 = vweird.f32 %v5323_v27 }
 0x43c   :  { %v2141_v39 = vpop.f32.mrf.mxu0  ;;  %v2154_v28 = vpop.f32.mrf.mxu1 }
 0x43d   :  { %v2188_v59 = vrot.slane %v2154_v28, 6  ;;  %v2046_v28 = vadd.f32 %v2045_v46, %v1993_v18 }
 0x43f   :  { %v2191_v11 = vsel %vm405_vm0, %v2141_v39, %v2188_v59 }
 0x444   :  { %v2167_v17 = vpop.f32.mrf.mxu2  ;;  %v2180_v23 = vpop.f32.mrf.mxu3 }
 0x445   :  { %v2189_v24 = vrot.slane %v2167_v17, 4  ;;  %v2190_v56 = vrot.slane %v2180_v23, 2  ;;  %v2143_v16 = vpop.f32.mrf.mxu0  ;;  %v2156_v38 = vpop.f32.mrf.mxu1  ;;  %v2076_v23 = vadd.f32 1.0, %v4066_v47  ;;  %v2064_v17 = vadd.f32 %v2046_v28, %v6302_v44 }
 0x447   :  { %v2192_v43 = vsel %vm407_vm1, %v2189_v24, %v2190_v56  ;;  %v3829_v39 = vmul.f32 -1.442695, %v2064_v17  ;;  %v2059_v17 = vadd.f32 %v2058_v33, %v5315_v1  ;;  %vm2098_vm12 = vweird.f32 %v2076_v23 }
 0x448   :  { %v2193_v42 = vsel %vm409_vm4, %v2191_v11, %v2192_v43  ;;  %v2104_v1 = vand.u32 2147483648, %v2076_v23 }
 0x449   :  { %v2195_v14 = vadd.f32 %v2193_v42, %v6301_v40 }
 0x44b   :  { %v3830_v32 = vmul.f32 -1.442695, %v2195_v14  ;;  %v2216_v42 = vrot.slane %v2195_v14, 6 }
 0x44c   :  { %v2169_v30 = vpop.f32.mrf.mxu2  ;;  %v2182_v62 = vpop.f32.mrf.mxu3 }
 0x44d   :  { %4067 = vpow2.f32 %v3830_v32 }
 0x44e   :  { %4069 = vrcp.f32 %v5323_v27 }
 0x44f   :  { %4071 = vrcp.f32 %v2076_v23 }
 0x453   :  { %v4068_v24 = vpop.eup %4067 }
 0x454   :  { %v2199_v59 = vadd.f32 1.0, %v4068_v24  ;;  %v4070_v56 = vpop.eup %4069 }
 0x455   :  { %v4072_v16 = vpop.eup %4071  ;;  %v2079_v18 = vmul.f32 %v4070_v56, %v5323_v27  ;;  %vm2084_vm11 = vweird.f32 %v4070_v56 }
 0x456   :  { %4073 = vrcp.f32 %v2199_v59  ;;  %v2094_v46 = vmul.f32 %v4072_v16, %v2076_v23  ;;  %v2211_v32 = vand.u32 2147483648, %v2199_v59  ;;  %v2209_v62 = vand.u32 2147483647, %v2199_v59  ;;  %vm2085_vm15 = vmor %vm2083_vm13, %vm2084_vm11 }
 0x457   :  { %4075 = vpow2.f32 %v3829_v39  ;;  %v2080_v40 = vsub.f32 1.0, %v2079_v18  ;;  %vm2205_vm7 = vweird.f32 %v2199_v59  ;;  %vm2099_vm10 = vweird.f32 %v4072_v16 }
 0x458   :  { %v2095_v15 = vsub.f32 1.0, %v2094_v46  ;;  %4077 = vtanh.f32 %v2216_v42  ;;  %v2212_v34 = vor.u32 1.1754944e-38, %v2211_v32  ;;  %vm2210_vm9 = vcmp.eq.f32.partialorder %v2209_v62, 8.507059e+37  ;;  %vm5335_vm14 = vmor %vm2098_vm12, %vm2099_vm10 }
 0x459   :  { %v2081_v39 = vmul.f32 %v4070_v56, %v2080_v40  ;;  %v2065_v18 = vadd.f32 %v2059_v17, %v4920_v54  ;;  %v2105_v17 = vor.u32 1.1754944e-38, %v2104_v1 }
 0x45a   :  { %v2096_v24 = vmul.f32 %v4072_v16, %v2095_v15 }
 0x45c   :  { %v4074_v38 = vpop.eup %4073 }
 0x45d   :  { %v2201_v11 = vmul.f32 %v4074_v38, %v2199_v59  ;;  %v4076_v43 = vpop.eup %4075  ;;  %vm2206_vm6 = vweird.f32 %v4074_v38  ;;  %v2089_v59 = vand.u32 2147483648, %v5323_v27 }
 0x45e   :  { %v5328_v28 = vadd.f32 1.0, %v4076_v43  ;;  %vm2207_vm8 = vmor %vm2205_vm7, %vm2206_vm6  ;;  %v2097_v43 = vadd.f32 %v4072_v16, %v2096_v24  ;;  %v4078_v33 = vpop.eup %4077 }
 0x45f   :  { %v2202_v47 = vsub.f32 1.0, %v2201_v11  ;;  %v2082_v11 = vadd.f32 %v4070_v56, %v2081_v39  ;;  %v2090_v24 = vor.u32 1.1754944e-38, %v2089_v59 }
 0x460   :  { %4079 = vrcp.f32 %v5328_v28  ;;  %vm2113_vm6 = vweird.f32 %v5328_v28  ;;  %v2117_v59 = vand.u32 2147483647, %v5328_v28 }
 0x461   :  { %v2203_v30 = vmul.f32 %v4074_v38, %v2202_v47  ;;  %4081 = vtanh.f32 %v2065_v18  ;;  %v2086_v32 = vsel %vm2085_vm15, %v4070_v56, %v2082_v11 }
 0x463   :  { %v2204_v44 = vadd.f32 %v4074_v38, %v2203_v30  ;;  %v2101_v30 = vsel %vm5335_vm14, %v4072_v16, %v2097_v43 }
 0x465   :  { %v2208_v14 = vsel %vm2207_vm8, %v4074_v38, %v2204_v44  ;;  %v2087_v44 = vand.u32 2147483647, %v5323_v27  ;;  %v2102_v38 = vand.u32 2147483647, %v2076_v23  ;;  %vm2118_vm8 = vcmp.eq.f32.partialorder %v2117_v59, 8.507059e+37  ;;  %v6324_v59 = vld [vmem:[#allocation39_spill] sm:$0xff] }
 0x466   :  { %v2213_v46 = vsel %vm2210_vm9, %v2212_v34, %v2208_v14  ;;  %v4080_v15 = vpop.eup %4079 }
 0x467   :  { %v2220_v47 = vrot.slane %v2213_v46, 2  ;;  %v2223_v40 = vmul.f32 %v4078_v33, %v2213_v46  ;;  %vm2088_vm2 = vcmp.eq.f32.partialorder %v2087_v44, 8.507059e+37  ;;  %vm2103_vm3 = vcmp.eq.f32.partialorder %v2102_v38, 8.507059e+37  ;;  %v4082_v39 = vpop.eup %4081 }
 0x468   :  { %v2109_v27 = vmul.f32 %v4080_v15, %v5328_v28  ;;  %v2091_v23 = vsel %vm2088_vm2, %v2090_v24, %v2086_v32  ;;  %v2226_v11 = vrot.slane %v2213_v46, 4  ;;  %vm2114_vm5 = vweird.f32 %v4080_v15  ;;  %v6306_v32 = vld [vmem:[#allocation21_spill] sm:$0xff]  ;;  %v6309_v24 = vld [vmem:[#allocation24_spill] sm:$0xff] }
 0x469   :  { %v2222_v34 = vmul.f32 %v2220_v47, %v5208_v58  ;;  %v2106_v58 = vsel %vm2103_vm3, %v2105_v17, %v2101_v30  ;;  %v2125_v18 = vmul.f32 %v4082_v39, %v2091_v23  ;;  %v2119_v46 = vand.u32 2147483648, %v5328_v28  ;;  %vm2115_vm7 = vmor %vm2113_vm6, %vm2114_vm5  ;;  %v6307_v30 = vld [vmem:[#allocation22_spill] sm:$0xff]  ;;  %v6308_v17 = vld [vmem:[#allocation23_spill] sm:$0xff] }
 0x46a   :  { %v2124_v14 = vmul.f32 %v2106_v58, %v5213_v6  ;;  %v2110_v56 = vsub.f32 1.0, %v2109_v27  ;;  %v6310_v27 = vld [vmem:[#allocation25_spill] sm:$0xff]  ;;  %v6311_v23 = vld [vmem:[#allocation26_spill] sm:$0xff]  ;;  %v6312_v58 = vld [vmem:[#allocation27_spill] sm:$0xff] }
 0x46b   :  { %v5343_v62 = vadd.f32 %v2223_v40, %v2222_v34  ;;  %v2120_v38 = vor.u32 1.1754944e-38, %v2119_v46  ;;  %v6313_v39 = vld [vmem:[#allocation28_spill] sm:$0xff]  ;;  %v6323_v46 = vld [vmem:[#allocation38_spill] sm:$0xff] }
 0x46c   :  { %v5348_v43 = vadd.f32 %v2125_v18, %v2124_v14  ;;  %v2111_v33 = vmul.f32 %v4080_v15, %v2110_v56  ;;  %v6314_v14 = vld [vmem:[#allocation29_spill] sm:$0xff]  ;;  %v6315_v18 = vld [vmem:[#allocation30_spill] sm:$0xff]  ;;  %v6316_v56 = vld [vmem:[#allocation31_spill] sm:$0xff] }
 0x46d   :  { %4083 = vtanh.f32 %v5343_v62 }
 0x46e   :  { %4085 = vtanh.f32 %v5348_v43  ;;  %v2112_v6 = vadd.f32 %v4080_v15, %v2111_v33  ;;  %v6320_v33 = vld [vmem:[#allocation35_spill] sm:$0xff] }
 0x470   :  { %v2116_v42 = vsel %vm2115_vm7, %v4080_v15, %v2112_v6  ;;  %v6305_v15 = vld [vmem:[#allocation20_spill] sm:$0xff]  ;;  %v6322_v6 = vld [vmem:[#allocation37_spill] sm:$0xff] }
 0x471   :  { %v2121_v34 = vsel %vm2118_vm8, %v2120_v38, %v2116_v42  ;;  %v6325_v42 = vld [vmem:[#allocation40_spill] sm:$0xff]  ;;  %v6327_v38 = vld [vmem:[#allocation45_spill] sm:$0xff] }
 0x473   :  { %v4084_v47 = vpop.eup %4083 }
 0x474   :  { %v2228_v16 = vmul.f32 %v4084_v47, %v2226_v11  ;;  %v4086_v44 = vpop.eup %4085  ;;  %v6317_v11 = vld [vmem:[#allocation32_spill] sm:$0xff]  ;;  %v6318_v47 = vld [vmem:[#allocation33_spill] sm:$0xff] }
 0x475   :  { %v2128_v40 = vmul.f32 %v4086_v44, %v2121_v34  ;;  %v6326_v44 = vld [vmem:[#allocation44_spill] sm:$0xff]  ;;  %v6328_v34 = vld [vmem:[#allocation46_spill] sm:$0xff] }
 0x476   :  { %v2229_v1 = vpack.c.bf16 %v2228_v16, %v2228_v16  ;;  %v6319_v16 = vld [vmem:[#allocation34_spill] sm:$0xff] }
 0x477   :  { %v2129_v28 = vpack.c.bf16 %v2128_v40, %v2128_v40  ;;  %v6329_v40 = vld [vmem:[#allocation47_spill] sm:$0xff] }
 0x478   :  { %2238 = vmatmul.bf16.vlgmr.msra.gmra.mxu0 %v2229_v1  ;;  %2251 = vmatmul.bf16.vlgmr.msra.gmra.mxu1 %v2229_v1 }
 0x479   :  { %2264 = vmatmul.bf16.vlgmr.msra.gmra.mxu2 %v2229_v1  ;;  %2277 = vmatmul.bf16.vlgmr.msra.gmra.mxu3 %v2229_v1 }
 0x47a   :  { %2404 = vmatpush.bf16.msra.mxu0 %v4386_v45  ;;  %2417 = vmatpush.bf16.msra.mxu1 %v4391_v51 }
 0x47b   :  { %2430 = vmatpush.bf16.msra.mxu2 %v4393_v52  ;;  %2443 = vmatpush.bf16.msra.mxu3 %v4398_v55 }
 0x47e   :  { %2405 = vmatpush.bf16.msra.mxu0 %v4410_v60  ;;  %2418 = vmatpush.bf16.msra.mxu1 %v4414_v63 }
 0x47f   :  { %2431 = vmatpush.bf16.msra.mxu2 %v4416_v0  ;;  %2444 = vmatpush.bf16.msra.mxu3 %v4419_v3 }
 0x482   :  { %2406 = vmatpush.bf16.msra.mxu0 %v4422_v8  ;;  %2419 = vmatpush.bf16.msra.mxu1 %v4426_v9 }
 0x483   :  { %2432 = vmatpush.bf16.msra.mxu2 %v4428_v10  ;;  %2445 = vmatpush.bf16.msra.mxu3 %v4431_v13 }
 0x486   :  { %2407 = vmatpush.bf16.msra.mxu0 %v4434_v20  ;;  %2420 = vmatpush.bf16.msra.mxu1 %v4439_v25 }
 0x487   :  { %2433 = vmatpush.bf16.msra.mxu2 %v4441_v26  ;;  %2446 = vmatpush.bf16.msra.mxu3 %v4443_v29 }
 0x488   :  { %2290 = vmatmul.bf16.vlgmr.msrb.gmra.mxu0 %v2129_v28  ;;  %2303 = vmatmul.bf16.vlgmr.msrb.gmra.mxu1 %v2129_v28 }
 0x489   :  { %2316 = vmatmul.bf16.vlgmr.msrb.gmra.mxu2 %v2129_v28  ;;  %2329 = vmatmul.bf16.vlgmr.msrb.gmra.mxu3 %v2129_v28  ;;  %v6330_v28 = vld [vmem:[#allocation48_spill] sm:$0xff] }
 0x48a   :  { %2408 = vmatpush.bf16.msra.mxu0 %v4446_v35  ;;  %2421 = vmatpush.bf16.msra.mxu1 %v4450_v36 }
 0x48b   :  { %2434 = vmatpush.bf16.msra.mxu2 %v4452_v37  ;;  %2447 = vmatpush.bf16.msra.mxu3 %v4455_v41 }
 0x48e   :  { %2409 = vmatpush.bf16.msra.mxu0 %v4458_v48  ;;  %2422 = vmatpush.bf16.msra.mxu1 %v4462_v49 }
 0x48f   :  { %2435 = vmatpush.bf16.msra.mxu2 %v4464_v50  ;;  %2448 = vmatpush.bf16.msra.mxu3 %v4467_v57 }
 0x492   :  { %2410 = vmatpush.bf16.msra.mxu0 %v4470_v2  ;;  %2423 = vmatpush.bf16.msra.mxu1 %v4474_v4 }
 0x493   :  { %2436 = vmatpush.bf16.msra.mxu2 %v4476_v5  ;;  %2449 = vmatpush.bf16.msra.mxu3 %v4479_v12 }
 0x496   :  { %2411 = vmatpush.bf16.msra.mxu0 %v4482_v19  ;;  %2424 = vmatpush.bf16.msra.mxu1 %v4486_v21 }
 0x497   :  { %2437 = vmatpush.bf16.msra.mxu2 %v4488_v22  ;;  %2450 = vmatpush.bf16.msra.mxu3 %v6048_v31 }
 0x499   :  { %2412 = vmatmul.bf16.vlgmr.msra.gmra.mxu0 %v2229_v1  ;;  %2425 = vmatmul.bf16.vlgmr.msra.gmra.mxu1 %v2229_v1 }
 0x49a   :  { %2502 = vmatpush.bf16.msrb.mxu0 %v6049_v53  ;;  %2515 = vmatpush.bf16.msrb.mxu1 %v6050_v7 }
 0x49b   :  { %2438 = vmatmul.bf16.vlgmr.msra.gmra.mxu2 %v2229_v1  ;;  %2451 = vmatmul.bf16.vlgmr.msra.gmra.mxu3 %v2229_v1  ;;  %v6321_v1 = vld [vmem:[#allocation36_spill] sm:$0xff] }
 0x49c   :  { %2528 = vmatpush.bf16.msrb.mxu2 %v6051_v61  ;;  %2541 = vmatpush.bf16.msrb.mxu3 %v6305_v15 }
 0x49e   :  { %2503 = vmatpush.bf16.msrb.mxu0 %v6306_v32  ;;  %2516 = vmatpush.bf16.msrb.mxu1 %v6307_v30 }
 0x4a0   :  { %2529 = vmatpush.bf16.msrb.mxu2 %v6308_v17  ;;  %2542 = vmatpush.bf16.msrb.mxu3 %v6309_v24 }
 0x4a2   :  { %2504 = vmatpush.bf16.msrb.mxu0 %v6310_v27  ;;  %2517 = vmatpush.bf16.msrb.mxu1 %v6311_v23  ;;  %v6367_v27 = vld [vmem:[#allocation17_spill] sm:$0xff] }
 0x4a4   :  { %2530 = vmatpush.bf16.msrb.mxu2 %v6312_v58  ;;  %2543 = vmatpush.bf16.msrb.mxu3 %v6313_v39 }
 0x4a6   :  { %2505 = vmatpush.bf16.msrb.mxu0 %v6314_v14  ;;  %2518 = vmatpush.bf16.msrb.mxu1 %v6315_v18 }
 0x4a8   :  { %2531 = vmatpush.bf16.msrb.mxu2 %v6316_v56  ;;  %2544 = vmatpush.bf16.msrb.mxu3 %v6317_v11 }
 0x4aa   :  { %2506 = vmatpush.bf16.msrb.mxu0 %v6318_v47  ;;  %2519 = vmatpush.bf16.msrb.mxu1 %v6319_v16 }
 0x4ac   :  { %2532 = vmatpush.bf16.msrb.mxu2 %v6320_v33  ;;  %2545 = vmatpush.bf16.msrb.mxu3 %v6321_v1  ;;  %v6331_v33 = vld [vmem:[#allocation49_spill] sm:$0xff] }
 0x4ad   :  { %v6332_v1 = vld [vmem:[#allocation53_spill] sm:$0xff] }
 0x4ae   :  { %2507 = vmatpush.bf16.msrb.mxu0 %v6322_v6  ;;  %2520 = vmatpush.bf16.msrb.mxu1 %v6323_v46  ;;  %v6333_v6 = vld [vmem:[#allocation57_spill] sm:$0xff]  ;;  %v6334_v46 = vld [vmem:[#allocation50_spill] sm:$0xff] }
 0x4b0   :  { %2533 = vmatpush.bf16.msrb.mxu2 %v6324_v59  ;;  %2546 = vmatpush.bf16.msrb.mxu3 %v6325_v42  ;;  %v6335_v59 = vld [vmem:[#allocation51_spill] sm:$0xff]  ;;  %v6336_v42 = vld [vmem:[#allocation58_spill] sm:$0xff] }
 0x4b2   :  { %2508 = vmatpush.bf16.msrb.mxu0 %v6326_v44  ;;  %2521 = vmatpush.bf16.msrb.mxu1 %v6327_v38  ;;  %v6337_v44 = vld [vmem:[#allocation59_spill] sm:$0xff]  ;;  %v6338_v38 = vld [vmem:[#allocation60_spill] sm:$0xff] }
 0x4b4   :  { %2534 = vmatpush.bf16.msrb.mxu2 %v6328_v34  ;;  %2547 = vmatpush.bf16.msrb.mxu3 %v6329_v40  ;;  %v6339_v34 = vld [vmem:[#allocation61_spill] sm:$0xff]  ;;  %v6340_v40 = vld [vmem:[#allocation62_spill] sm:$0xff] }
 0x4b6   :  { %2509 = vmatpush.bf16.msrb.mxu0 %v6330_v28  ;;  %2522 = vmatpush.bf16.msrb.mxu1 %v6331_v33  ;;  %v6341_v28 = vld [vmem:[#allocation63_spill] sm:$0xff]  ;;  %v6342_v33 = vld [vmem:[#allocation64_spill] sm:$0xff] }
 0x4b8   :  { %2535 = vmatpush.bf16.msrb.mxu2 %v6334_v46  ;;  %2548 = vmatpush.bf16.msrb.mxu3 %v6335_v59  ;;  %v6345_v46 = vld [vmem:[#allocation67_spill] sm:$0xff]  ;;  %v6346_v59 = vld [vmem:[#allocation68_spill] sm:$0xff] }
 0x4ba   :  { %2554 = vmatpush.bf16.msra.mxu0 %v6332_v1  ;;  %2567 = vmatpush.bf16.msra.mxu1 %v6333_v6  ;;  %v6343_v1 = vld [vmem:[#allocation65_spill] sm:$0xff]  ;;  %v6344_v6 = vld [vmem:[#allocation66_spill] sm:$0xff] }
 0x4bc   :  { %2580 = vmatpush.bf16.msra.mxu2 %v6336_v42  ;;  %2593 = vmatpush.bf16.msra.mxu3 %v6337_v44  ;;  %v6347_v42 = vld [vmem:[#allocation69_spill] sm:$0xff]  ;;  %v6348_v44 = vld [vmem:[#allocation70_spill] sm:$0xff] }
 0x4be   :  { %2555 = vmatpush.bf16.msra.mxu0 %v6338_v38  ;;  %2568 = vmatpush.bf16.msra.mxu1 %v6339_v34  ;;  %v6349_v38 = vld [vmem:[#allocation71_spill] sm:$0xff]  ;;  %v6350_v34 = vld [vmem:[#allocation72_spill] sm:$0xff] }
 0x4c0   :  { %2581 = vmatpush.bf16.msra.mxu2 %v6340_v40  ;;  %2594 = vmatpush.bf16.msra.mxu3 %v6341_v28  ;;  %v6351_v40 = vld [vmem:[#allocation73_spill] sm:$0xff]  ;;  %v6352_v28 = vld [vmem:[#allocation74_spill] sm:$0xff] }
 0x4c2   :  { %2556 = vmatpush.bf16.msra.mxu0 %v6342_v33  ;;  %2569 = vmatpush.bf16.msra.mxu1 %v6343_v1  ;;  %v6353_v33 = vld [vmem:[#allocation75_spill] sm:$0xff]  ;;  %v6354_v1 = vld [vmem:[#allocation76_spill] sm:$0xff] }
 0x4c4   :  { %2582 = vmatpush.bf16.msra.mxu2 %v6344_v6  ;;  %2595 = vmatpush.bf16.msra.mxu3 %v6345_v46  ;;  %v6355_v6 = vld [vmem:[#allocation77_spill] sm:$0xff]  ;;  %v6356_v46 = vld [vmem:[#allocation78_spill] sm:$0xff] }
 0x4c6   :  { %2557 = vmatpush.bf16.msra.mxu0 %v6346_v59  ;;  %2570 = vmatpush.bf16.msra.mxu1 %v6347_v42  ;;  %v6357_v59 = vld [vmem:[#allocation79_spill] sm:$0xff]  ;;  %v6358_v42 = vld [vmem:[#allocation80_spill] sm:$0xff] }
 0x4c8   :  { %2583 = vmatpush.bf16.msra.mxu2 %v6348_v44  ;;  %2596 = vmatpush.bf16.msra.mxu3 %v6349_v38  ;;  %v6359_v44 = vld [vmem:[#allocation81_spill] sm:$0xff]  ;;  %v6360_v38 = vld [vmem:[#allocation82_spill] sm:$0xff] }
 0x4ca   :  { %2558 = vmatpush.bf16.msra.mxu0 %v6350_v34  ;;  %2571 = vmatpush.bf16.msra.mxu1 %v6351_v40  ;;  %v6361_v34 = vld [vmem:[#allocation83_spill] sm:$0xff]  ;;  %v6362_v40 = vld [vmem:[#allocation84_spill] sm:$0xff] }
 0x4cc   :  { %2584 = vmatpush.bf16.msra.mxu2 %v6352_v28  ;;  %2597 = vmatpush.bf16.msra.mxu3 %v6353_v33  ;;  %v6363_v28 = vld [vmem:[#allocation85_spill] sm:$0xff]  ;;  %v6364_v33 = vld [vmem:[#allocation86_spill] sm:$0xff] }
 0x4ce   :  { %2559 = vmatpush.bf16.msra.mxu0 %v6354_v1  ;;  %2572 = vmatpush.bf16.msra.mxu1 %v6355_v6  ;;  %v6365_v1 = vld [vmem:[#allocation87_spill] sm:$0xff] }
 0x4d0   :  { %2585 = vmatpush.bf16.msra.mxu2 %v6356_v46  ;;  %2598 = vmatpush.bf16.msra.mxu3 %v6357_v59 }
 0x4d2   :  { %2560 = vmatpush.bf16.msra.mxu0 %v6358_v42  ;;  %2573 = vmatpush.bf16.msra.mxu1 %v6359_v44 }
 0x4d4   :  { %2586 = vmatpush.bf16.msra.mxu2 %v6360_v38  ;;  %2599 = vmatpush.bf16.msra.mxu3 %v6361_v34 }
 0x4d6   :  { %2561 = vmatpush.bf16.msra.mxu0 %v6362_v40  ;;  %2574 = vmatpush.bf16.msra.mxu1 %v6363_v28 }
 0x4d8   :  { %2587 = vmatpush.bf16.msra.mxu2 %v6364_v33  ;;  %2600 = vmatpush.bf16.msra.mxu3 %v6365_v1  ;;  %v6366_v1 = vld [vmem:[#allocation16_spill] sm:$0xff] }
 0x4f5   :  { %v2239_v6 = vpop.f32.mrf.mxu0  ;;  %v2252_v46 = vpop.f32.mrf.mxu1 }
 0x4fc   :  { %v2265_v16 = vpop.f32.mrf.mxu2  ;;  %v5450_v59 = vpop.f32.mrf.mxu3 }
 0x4fd   :  { %v2241_v42 = vpop.f32.mrf.mxu0  ;;  %v2254_v47 = vpop.f32.mrf.mxu1 }
 0x504   :  { %v2267_v44 = vpop.f32.mrf.mxu2  ;;  %v2280_v11 = vpop.f32.mrf.mxu3 }
 0x505   :  { %v2291_v38 = vpop.f32.mrf.mxu0  ;;  %v2304_v56 = vpop.f32.mrf.mxu1 }
 0x506   :  { %v2292_v28 = vadd.f32 %v2291_v38, %v2239_v6  ;;  %v2305_v39 = vadd.f32 %v2304_v56, %v2252_v46 }
 0x508   :  { %v2334_v23 = vadd.f32 %v2292_v28, %v6366_v1  ;;  %v2335_v24 = vadd.f32 %v2305_v39, %v6367_v27 }
 0x50a   :  { %v3831_v42 = vmul.f32 -1.442695, %v2334_v23  ;;  %v3832_v47 = vmul.f32 -1.442695, %v2335_v24 }
 0x50c   :  { %v2317_v34 = vpop.f32.mrf.mxu2  ;;  %v2330_v18 = vpop.f32.mrf.mxu3  ;;  %4087 = vpow2.f32 %v3831_v42 }
 0x50d   :  { %v2293_v40 = vpop.f32.mrf.mxu0  ;;  %v2306_v14 = vpop.f32.mrf.mxu1  ;;  %4089 = vpow2.f32 %v3832_v47  ;;  %v2318_v28 = vadd.f32 %v2317_v34, %v2265_v16 }
 0x512   :  { %v4088_v23 = vpop.eup %4087 }
 0x513   :  { %v4090_v24 = vpop.eup %4089  ;;  %v5458_v47 = vadd.f32 1.0, %v4088_v23 }
 0x514   :  { %v2319_v33 = vpop.f32.mrf.mxu2  ;;  %v2332_v58 = vpop.f32.mrf.mxu3 }
 0x515   :  { %v6368_v58 = vld [vmem:[#allocation54_spill] sm:$0xff]  ;;  %vm2355_vm2 = vweird.f32 %v5458_v47 }
 0x516   :  { %v2413_v17 = vpop.f32.mrf.mxu0  ;;  %v2426_v30 = vpop.f32.mrf.mxu1  ;;  %v432_v33 = vrot.slane %v6368_v58, 2 }
 0x517   :  { %v2460_v44 = vrot.slane %v2426_v30, 6 }
 0x519   :  { %v2463_v56 = vsel %vm405_vm0, %v2413_v17, %v2460_v44 }
 0x51e   :  { %v2439_v11 = vpop.f32.mrf.mxu2  ;;  %v2452_v32 = vpop.f32.mrf.mxu3 }
 0x51f   :  { %v2461_v15 = vrot.slane %v2439_v11, 4  ;;  %v2462_v40 = vrot.slane %v2452_v32, 2  ;;  %v2415_v14 = vpop.f32.mrf.mxu0  ;;  %v2428_v6 = vpop.f32.mrf.mxu1  ;;  %v2348_v32 = vadd.f32 1.0, %v4090_v24  ;;  %v6369_v11 = vld [vmem:[#allocation18_spill] sm:$0xff] }
 0x520   :  { %v2336_v14 = vadd.f32 %v2318_v28, %v6369_v11 }
 0x521   :  { %v2464_v46 = vsel %vm407_vm1, %v2461_v15, %v2462_v40  ;;  %vm2370_vm15 = vweird.f32 %v2348_v32 }
 0x522   :  { %v2465_v39 = vsel %vm409_vm4, %v2463_v56, %v2464_v46  ;;  %v3833_v15 = vmul.f32 -1.442695, %v2336_v14  ;;  %v2331_v14 = vadd.f32 %v2330_v18, %v5450_v59  ;;  %v2376_v59 = vand.u32 2147483648, %v2348_v32 }
 0x523   :  { %v2467_v38 = vadd.f32 %v2465_v39, %v432_v33 }
 0x525   :  { %v3834_v30 = vmul.f32 -1.442695, %v2467_v38  ;;  %v2488_v33 = vrot.slane %v2467_v38, 6 }
 0x526   :  { %v2441_v42 = vpop.f32.mrf.mxu2  ;;  %v2454_v27 = vpop.f32.mrf.mxu3 }
 0x527   :  { %4091 = vpow2.f32 %v3834_v30 }
 0x528   :  { %4093 = vrcp.f32 %v5458_v47 }
 0x529   :  { %4095 = vrcp.f32 %v2348_v32 }
 0x52d   :  { %v4092_v17 = vpop.eup %4091 }
 0x52e   :  { %v2471_v44 = vadd.f32 1.0, %v4092_v17  ;;  %v4094_v40 = vpop.eup %4093 }
 0x52f   :  { %v4096_v6 = vpop.eup %4095  ;;  %v2351_v16 = vmul.f32 %v4094_v40, %v5458_v47  ;;  %vm2356_vm14 = vweird.f32 %v4094_v40 }
 0x530   :  { %4097 = vrcp.f32 %v2471_v44  ;;  %v2366_v34 = vmul.f32 %v4096_v6, %v2348_v32  ;;  %v2483_v24 = vand.u32 2147483648, %v2471_v44  ;;  %v2481_v42 = vand.u32 2147483647, %v2471_v44  ;;  %vm2357_vm5 = vmor %vm2355_vm2, %vm2356_vm14 }
 0x531   :  { %4099 = vpow2.f32 %v3833_v15  ;;  %v2352_v46 = vsub.f32 1.0, %v2351_v16  ;;  %vm2477_vm10 = vweird.f32 %v2471_v44  ;;  %vm2371_vm13 = vweird.f32 %v4096_v6 }
 0x532   :  { %v2367_v39 = vsub.f32 1.0, %v2366_v34  ;;  %4101 = vtanh.f32 %v2488_v33  ;;  %v2484_v1 = vor.u32 1.1754944e-38, %v2483_v24  ;;  %vm2482_vm12 = vcmp.eq.f32.partialorder %v2481_v42, 8.507059e+37  ;;  %vm5470_vm3 = vmor %vm2370_vm15, %vm2371_vm13 }
 0x533   :  { %v2353_v15 = vmul.f32 %v4094_v40, %v2352_v46  ;;  %v2337_v16 = vadd.f32 %v2331_v14, %v4920_v54  ;;  %v2377_v14 = vor.u32 1.1754944e-38, %v2376_v59 }
 0x534   :  { %v2368_v17 = vmul.f32 %v4096_v6, %v2367_v39 }
 0x536   :  { %v4098_v27 = vpop.eup %4097 }
 0x537   :  { %v2473_v56 = vmul.f32 %v4098_v27, %v2471_v44  ;;  %v4100_v58 = vpop.eup %4099  ;;  %vm2478_vm9 = vweird.f32 %v4098_v27  ;;  %v2361_v44 = vand.u32 2147483648, %v5458_v47 }
 0x538   :  { %v5463_v30 = vadd.f32 1.0, %v4100_v58  ;;  %vm2479_vm11 = vmor %vm2477_vm10, %vm2478_vm9  ;;  %v2369_v58 = vadd.f32 %v4096_v6, %v2368_v17  ;;  %v4102_v18 = vpop.eup %4101 }
 0x539   :  { %v2474_v23 = vsub.f32 1.0, %v2473_v56  ;;  %v2354_v56 = vadd.f32 %v4094_v40, %v2353_v15  ;;  %v2362_v17 = vor.u32 1.1754944e-38, %v2361_v44 }
 0x53a   :  { %4103 = vrcp.f32 %v5463_v30  ;;  %vm2385_vm9 = vweird.f32 %v5463_v30  ;;  %v2389_v44 = vand.u32 2147483647, %v5463_v30 }
 0x53b   :  { %v2475_v28 = vmul.f32 %v4098_v27, %v2474_v23  ;;  %4105 = vtanh.f32 %v2337_v16  ;;  %v2358_v24 = vsel %vm2357_vm5, %v4094_v40, %v2354_v56 }
 0x53d   :  { %v2476_v11 = vadd.f32 %v4098_v27, %v2475_v28  ;;  %v2373_v28 = vsel %vm5470_vm3, %v4096_v6, %v2369_v58 }
 0x53f   :  { %v2480_v38 = vsel %vm2479_vm11, %v4098_v27, %v2476_v11  ;;  %v2359_v11 = vand.u32 2147483647, %v5458_v47  ;;  %v2374_v27 = vand.u32 2147483647, %v2348_v32  ;;  %vm2390_vm11 = vcmp.eq.f32.partialorder %v2389_v44, 8.507059e+37  ;;  %v6391_v44 = vld [vmem:[#allocation39_spill] sm:$0xff] }
 0x540   :  { %v2485_v34 = vsel %vm2482_vm12, %v2484_v1, %v2480_v38  ;;  %v4104_v39 = vpop.eup %4103 }
 0x541   :  { %v2492_v23 = vrot.slane %v2485_v34, 2  ;;  %v2495_v46 = vmul.f32 %v4102_v18, %v2485_v34  ;;  %vm2360_vm6 = vcmp.eq.f32.partialorder %v2359_v11, 8.507059e+37  ;;  %vm2375_vm7 = vcmp.eq.f32.partialorder %v2374_v27, 8.507059e+37  ;;  %v4106_v15 = vpop.eup %4105 }
 0x542   :  { %v2381_v47 = vmul.f32 %v4104_v39, %v5463_v30  ;;  %v2363_v32 = vsel %vm2360_vm6, %v2362_v17, %v2358_v24  ;;  %v2498_v56 = vrot.slane %v2485_v34, 4  ;;  %vm2386_vm8 = vweird.f32 %v4104_v39  ;;  %v6373_v24 = vld [vmem:[#allocation21_spill] sm:$0xff]  ;;  %v6376_v17 = vld [vmem:[#allocation24_spill] sm:$0xff] }
 0x543   :  { %v2494_v1 = vmul.f32 %v2492_v23, %v5343_v62  ;;  %v2378_v62 = vsel %vm2375_vm7, %v2377_v14, %v2373_v28  ;;  %v2397_v16 = vmul.f32 %v4106_v15, %v2363_v32  ;;  %v2391_v34 = vand.u32 2147483648, %v5463_v30  ;;  %vm2387_vm10 = vmor %vm2385_vm9, %vm2386_vm8  ;;  %v6374_v28 = vld [vmem:[#allocation22_spill] sm:$0xff]  ;;  %v6375_v14 = vld [vmem:[#allocation23_spill] sm:$0xff] }
 0x544   :  { %v2396_v38 = vmul.f32 %v2378_v62, %v5348_v43  ;;  %v2382_v40 = vsub.f32 1.0, %v2381_v47  ;;  %v6377_v47 = vld [vmem:[#allocation25_spill] sm:$0xff]  ;;  %v6378_v32 = vld [vmem:[#allocation26_spill] sm:$0xff]  ;;  %v6379_v62 = vld [vmem:[#allocation27_spill] sm:$0xff] }
 0x545   :  { %v5478_v42 = vadd.f32 %v2495_v46, %v2494_v1  ;;  %v2392_v27 = vor.u32 1.1754944e-38, %v2391_v34  ;;  %v6380_v15 = vld [vmem:[#allocation28_spill] sm:$0xff]  ;;  %v6390_v34 = vld [vmem:[#allocation38_spill] sm:$0xff] }
 0x546   :  { %v5483_v58 = vadd.f32 %v2397_v16, %v2396_v38  ;;  %v2383_v18 = vmul.f32 %v4104_v39, %v2382_v40  ;;  %v6381_v38 = vld [vmem:[#allocation29_spill] sm:$0xff]  ;;  %v6382_v16 = vld [vmem:[#allocation30_spill] sm:$0xff]  ;;  %v6383_v40 = vld [vmem:[#allocation31_spill] sm:$0xff] }
 0x547   :  { %4107 = vtanh.f32 %v5478_v42 }
 0x548   :  { %4109 = vtanh.f32 %v5483_v58  ;;  %v2384_v43 = vadd.f32 %v4104_v39, %v2383_v18  ;;  %v6387_v18 = vld [vmem:[#allocation35_spill] sm:$0xff] }
 0x54a   :  { %v2388_v33 = vsel %vm2387_vm10, %v4104_v39, %v2384_v43  ;;  %v6372_v39 = vld [vmem:[#allocation20_spill] sm:$0xff]  ;;  %v6389_v43 = vld [vmem:[#allocation37_spill] sm:$0xff] }
 0x54b   :  { %v2393_v1 = vsel %vm2390_vm11, %v2392_v27, %v2388_v33  ;;  %v6392_v33 = vld [vmem:[#allocation40_spill] sm:$0xff]  ;;  %v6394_v27 = vld [vmem:[#allocation45_spill] sm:$0xff] }
 0x54d   :  { %v4108_v23 = vpop.eup %4107 }
 0x54e   :  { %v2500_v6 = vmul.f32 %v4108_v23, %v2498_v56  ;;  %v4110_v11 = vpop.eup %4109  ;;  %v6384_v56 = vld [vmem:[#allocation32_spill] sm:$0xff]  ;;  %v6385_v23 = vld [vmem:[#allocation33_spill] sm:$0xff] }
 0x54f   :  { %v2400_v46 = vmul.f32 %v4110_v11, %v2393_v1  ;;  %v6393_v11 = vld [vmem:[#allocation44_spill] sm:$0xff]  ;;  %v6395_v1 = vld [vmem:[#allocation46_spill] sm:$0xff] }
 0x550   :  { %v2501_v59 = vpack.c.bf16 %v2500_v6, %v2500_v6  ;;  %v6386_v6 = vld [vmem:[#allocation34_spill] sm:$0xff] }
 0x551   :  { %v2401_v30 = vpack.c.bf16 %v2400_v46, %v2400_v46  ;;  %v6396_v46 = vld [vmem:[#allocation47_spill] sm:$0xff] }
 0x552   :  { %2510 = vmatmul.bf16.vlgmr.msrb.gmra.mxu0 %v2501_v59  ;;  %2523 = vmatmul.bf16.vlgmr.msrb.gmra.mxu1 %v2501_v59 }
 0x553   :  { %2536 = vmatmul.bf16.vlgmr.msrb.gmra.mxu2 %v2501_v59  ;;  %2549 = vmatmul.bf16.vlgmr.msrb.gmra.mxu3 %v2501_v59 }
 0x554   :  { %2676 = vmatpush.bf16.msrb.mxu0 %v4386_v45  ;;  %2689 = vmatpush.bf16.msrb.mxu1 %v4391_v51 }
 0x555   :  { %2702 = vmatpush.bf16.msrb.mxu2 %v4393_v52  ;;  %2715 = vmatpush.bf16.msrb.mxu3 %v4398_v55 }
 0x558   :  { %2677 = vmatpush.bf16.msrb.mxu0 %v4410_v60  ;;  %2690 = vmatpush.bf16.msrb.mxu1 %v4414_v63 }
 0x559   :  { %2703 = vmatpush.bf16.msrb.mxu2 %v4416_v0  ;;  %2716 = vmatpush.bf16.msrb.mxu3 %v4419_v3 }
 0x55c   :  { %2678 = vmatpush.bf16.msrb.mxu0 %v4422_v8  ;;  %2691 = vmatpush.bf16.msrb.mxu1 %v4426_v9 }
 0x55d   :  { %2704 = vmatpush.bf16.msrb.mxu2 %v4428_v10  ;;  %2717 = vmatpush.bf16.msrb.mxu3 %v4431_v13 }
 0x560   :  { %2679 = vmatpush.bf16.msrb.mxu0 %v4434_v20  ;;  %2692 = vmatpush.bf16.msrb.mxu1 %v4439_v25 }
 0x561   :  { %2705 = vmatpush.bf16.msrb.mxu2 %v4441_v26  ;;  %2718 = vmatpush.bf16.msrb.mxu3 %v4443_v29 }
 0x562   :  { %2562 = vmatmul.bf16.vlgmr.msra.gmra.mxu0 %v2401_v30  ;;  %2575 = vmatmul.bf16.vlgmr.msra.gmra.mxu1 %v2401_v30 }
 0x563   :  { %2588 = vmatmul.bf16.vlgmr.msra.gmra.mxu2 %v2401_v30  ;;  %2601 = vmatmul.bf16.vlgmr.msra.gmra.mxu3 %v2401_v30  ;;  %v6397_v30 = vld [vmem:[#allocation48_spill] sm:$0xff] }
 0x564   :  { %2680 = vmatpush.bf16.msrb.mxu0 %v4446_v35  ;;  %2693 = vmatpush.bf16.msrb.mxu1 %v4450_v36 }
 0x565   :  { %2706 = vmatpush.bf16.msrb.mxu2 %v4452_v37  ;;  %2719 = vmatpush.bf16.msrb.mxu3 %v4455_v41 }
 0x568   :  { %2681 = vmatpush.bf16.msrb.mxu0 %v4458_v48  ;;  %2694 = vmatpush.bf16.msrb.mxu1 %v4462_v49 }
 0x569   :  { %2707 = vmatpush.bf16.msrb.mxu2 %v4464_v50  ;;  %2720 = vmatpush.bf16.msrb.mxu3 %v4467_v57 }
 0x56c   :  { %2682 = vmatpush.bf16.msrb.mxu0 %v4470_v2  ;;  %2695 = vmatpush.bf16.msrb.mxu1 %v4474_v4 }
 0x56d   :  { %2708 = vmatpush.bf16.msrb.mxu2 %v4476_v5  ;;  %2721 = vmatpush.bf16.msrb.mxu3 %v4479_v12 }
 0x570   :  { %2683 = vmatpush.bf16.msrb.mxu0 %v4482_v19  ;;  %2696 = vmatpush.bf16.msrb.mxu1 %v4486_v21 }
 0x571   :  { %2709 = vmatpush.bf16.msrb.mxu2 %v4488_v22  ;;  %2722 = vmatpush.bf16.msrb.mxu3 %v6048_v31 }
 0x573   :  { %2684 = vmatmul.bf16.vlgmr.msrb.gmra.mxu0 %v2501_v59  ;;  %2697 = vmatmul.bf16.vlgmr.msrb.gmra.mxu1 %v2501_v59 }
 0x574   :  { %2774 = vmatpush.bf16.msra.mxu0 %v6049_v53  ;;  %2787 = vmatpush.bf16.msra.mxu1 %v6050_v7 }
 0x575   :  { %2710 = vmatmul.bf16.vlgmr.msrb.gmra.mxu2 %v2501_v59  ;;  %2723 = vmatmul.bf16.vlgmr.msrb.gmra.mxu3 %v2501_v59  ;;  %v6388_v59 = vld [vmem:[#allocation36_spill] sm:$0xff] }
 0x576   :  { %2800 = vmatpush.bf16.msra.mxu2 %v6051_v61  ;;  %2813 = vmatpush.bf16.msra.mxu3 %v6372_v39 }
 0x578   :  { %2775 = vmatpush.bf16.msra.mxu0 %v6373_v24  ;;  %2788 = vmatpush.bf16.msra.mxu1 %v6374_v28 }
 0x57a   :  { %2801 = vmatpush.bf16.msra.mxu2 %v6375_v14  ;;  %2814 = vmatpush.bf16.msra.mxu3 %v6376_v17 }
 0x57c   :  { %2776 = vmatpush.bf16.msra.mxu0 %v6377_v47  ;;  %2789 = vmatpush.bf16.msra.mxu1 %v6378_v32  ;;  %v6434_v47 = vld [vmem:[#allocation17_spill] sm:$0xff] }
 0x57e   :  { %2802 = vmatpush.bf16.msra.mxu2 %v6379_v62  ;;  %2815 = vmatpush.bf16.msra.mxu3 %v6380_v15 }
 0x580   :  { %2777 = vmatpush.bf16.msra.mxu0 %v6381_v38  ;;  %2790 = vmatpush.bf16.msra.mxu1 %v6382_v16 }
 0x582   :  { %2803 = vmatpush.bf16.msra.mxu2 %v6383_v40  ;;  %2816 = vmatpush.bf16.msra.mxu3 %v6384_v56 }
 0x584   :  { %2778 = vmatpush.bf16.msra.mxu0 %v6385_v23  ;;  %2791 = vmatpush.bf16.msra.mxu1 %v6386_v6 }
 0x586   :  { %2804 = vmatpush.bf16.msra.mxu2 %v6387_v18  ;;  %2817 = vmatpush.bf16.msra.mxu3 %v6388_v59  ;;  %v6398_v18 = vld [vmem:[#allocation49_spill] sm:$0xff] }
 0x587   :  { %v6399_v59 = vld [vmem:[#allocation53_spill] sm:$0xff] }
 0x588   :  { %2779 = vmatpush.bf16.msra.mxu0 %v6389_v43  ;;  %2792 = vmatpush.bf16.msra.mxu1 %v6390_v34  ;;  %v6400_v43 = vld [vmem:[#allocation57_spill] sm:$0xff]  ;;  %v6401_v34 = vld [vmem:[#allocation50_spill] sm:$0xff] }
 0x58a   :  { %2805 = vmatpush.bf16.msra.mxu2 %v6391_v44  ;;  %2818 = vmatpush.bf16.msra.mxu3 %v6392_v33  ;;  %v6402_v44 = vld [vmem:[#allocation51_spill] sm:$0xff]  ;;  %v6403_v33 = vld [vmem:[#allocation58_spill] sm:$0xff] }
 0x58c   :  { %2780 = vmatpush.bf16.msra.mxu0 %v6393_v11  ;;  %2793 = vmatpush.bf16.msra.mxu1 %v6394_v27  ;;  %v6404_v11 = vld [vmem:[#allocation59_spill] sm:$0xff]  ;;  %v6405_v27 = vld [vmem:[#allocation60_spill] sm:$0xff] }
 0x58e   :  { %2806 = vmatpush.bf16.msra.mxu2 %v6395_v1  ;;  %2819 = vmatpush.bf16.msra.mxu3 %v6396_v46  ;;  %v6406_v1 = vld [vmem:[#allocation61_spill] sm:$0xff]  ;;  %v6407_v46 = vld [vmem:[#allocation62_spill] sm:$0xff] }
 0x590   :  { %2781 = vmatpush.bf16.msra.mxu0 %v6397_v30  ;;  %2794 = vmatpush.bf16.msra.mxu1 %v6398_v18  ;;  %v6408_v30 = vld [vmem:[#allocation63_spill] sm:$0xff]  ;;  %v6409_v18 = vld [vmem:[#allocation64_spill] sm:$0xff] }
 0x592   :  { %2807 = vmatpush.bf16.msra.mxu2 %v6401_v34  ;;  %2820 = vmatpush.bf16.msra.mxu3 %v6402_v44  ;;  %v6412_v34 = vld [vmem:[#allocation67_spill] sm:$0xff]  ;;  %v6413_v44 = vld [vmem:[#allocation68_spill] sm:$0xff] }
 0x594   :  { %2826 = vmatpush.bf16.msrb.mxu0 %v6399_v59  ;;  %2839 = vmatpush.bf16.msrb.mxu1 %v6400_v43  ;;  %v6410_v59 = vld [vmem:[#allocation65_spill] sm:$0xff]  ;;  %v6411_v43 = vld [vmem:[#allocation66_spill] sm:$0xff] }
 0x596   :  { %2852 = vmatpush.bf16.msrb.mxu2 %v6403_v33  ;;  %2865 = vmatpush.bf16.msrb.mxu3 %v6404_v11  ;;  %v6414_v33 = vld [vmem:[#allocation69_spill] sm:$0xff]  ;;  %v6415_v11 = vld [vmem:[#allocation70_spill] sm:$0xff] }
 0x598   :  { %2827 = vmatpush.bf16.msrb.mxu0 %v6405_v27  ;;  %2840 = vmatpush.bf16.msrb.mxu1 %v6406_v1  ;;  %v6416_v27 = vld [vmem:[#allocation71_spill] sm:$0xff]  ;;  %v6417_v1 = vld [vmem:[#allocation72_spill] sm:$0xff] }
 0x59a   :  { %2853 = vmatpush.bf16.msrb.mxu2 %v6407_v46  ;;  %2866 = vmatpush.bf16.msrb.mxu3 %v6408_v30  ;;  %v6418_v46 = vld [vmem:[#allocation73_spill] sm:$0xff]  ;;  %v6419_v30 = vld [vmem:[#allocation74_spill] sm:$0xff] }
 0x59c   :  { %2828 = vmatpush.bf16.msrb.mxu0 %v6409_v18  ;;  %2841 = vmatpush.bf16.msrb.mxu1 %v6410_v59  ;;  %v6420_v18 = vld [vmem:[#allocation75_spill] sm:$0xff]  ;;  %v6421_v59 = vld [vmem:[#allocation76_spill] sm:$0xff] }
 0x59e   :  { %2854 = vmatpush.bf16.msrb.mxu2 %v6411_v43  ;;  %2867 = vmatpush.bf16.msrb.mxu3 %v6412_v34  ;;  %v6422_v43 = vld [vmem:[#allocation77_spill] sm:$0xff]  ;;  %v6423_v34 = vld [vmem:[#allocation78_spill] sm:$0xff] }
 0x5a0   :  { %2829 = vmatpush.bf16.msrb.mxu0 %v6413_v44  ;;  %2842 = vmatpush.bf16.msrb.mxu1 %v6414_v33  ;;  %v6424_v44 = vld [vmem:[#allocation79_spill] sm:$0xff]  ;;  %v6425_v33 = vld [vmem:[#allocation80_spill] sm:$0xff] }
 0x5a2   :  { %2855 = vmatpush.bf16.msrb.mxu2 %v6415_v11  ;;  %2868 = vmatpush.bf16.msrb.mxu3 %v6416_v27  ;;  %v6426_v11 = vld [vmem:[#allocation81_spill] sm:$0xff]  ;;  %v6427_v27 = vld [vmem:[#allocation82_spill] sm:$0xff] }
 0x5a4   :  { %2830 = vmatpush.bf16.msrb.mxu0 %v6417_v1  ;;  %2843 = vmatpush.bf16.msrb.mxu1 %v6418_v46  ;;  %v6428_v1 = vld [vmem:[#allocation83_spill] sm:$0xff]  ;;  %v6429_v46 = vld [vmem:[#allocation84_spill] sm:$0xff] }
 0x5a6   :  { %2856 = vmatpush.bf16.msrb.mxu2 %v6419_v30  ;;  %2869 = vmatpush.bf16.msrb.mxu3 %v6420_v18  ;;  %v6430_v30 = vld [vmem:[#allocation85_spill] sm:$0xff]  ;;  %v6431_v18 = vld [vmem:[#allocation86_spill] sm:$0xff] }
 0x5a8   :  { %2831 = vmatpush.bf16.msrb.mxu0 %v6421_v59  ;;  %2844 = vmatpush.bf16.msrb.mxu1 %v6422_v43  ;;  %v6432_v59 = vld [vmem:[#allocation87_spill] sm:$0xff] }
 0x5aa   :  { %2857 = vmatpush.bf16.msrb.mxu2 %v6423_v34  ;;  %2870 = vmatpush.bf16.msrb.mxu3 %v6424_v44 }
 0x5ac   :  { %2832 = vmatpush.bf16.msrb.mxu0 %v6425_v33  ;;  %2845 = vmatpush.bf16.msrb.mxu1 %v6426_v11 }
 0x5ae   :  { %2858 = vmatpush.bf16.msrb.mxu2 %v6427_v27  ;;  %2871 = vmatpush.bf16.msrb.mxu3 %v6428_v1 }
 0x5b0   :  { %2833 = vmatpush.bf16.msrb.mxu0 %v6429_v46  ;;  %2846 = vmatpush.bf16.msrb.mxu1 %v6430_v30 }
 0x5b2   :  { %2859 = vmatpush.bf16.msrb.mxu2 %v6431_v18  ;;  %2872 = vmatpush.bf16.msrb.mxu3 %v6432_v59  ;;  %v6433_v59 = vld [vmem:[#allocation16_spill] sm:$0xff] }
 0x5cf   :  { %v2511_v43 = vpop.f32.mrf.mxu0  ;;  %v2524_v34 = vpop.f32.mrf.mxu1 }
 0x5d6   :  { %v2537_v6 = vpop.f32.mrf.mxu2  ;;  %v5585_v44 = vpop.f32.mrf.mxu3 }
 0x5d7   :  { %v2513_v33 = vpop.f32.mrf.mxu0  ;;  %v2526_v23 = vpop.f32.mrf.mxu1 }
 0x5de   :  { %v2539_v11 = vpop.f32.mrf.mxu2  ;;  %v2552_v56 = vpop.f32.mrf.mxu3 }
 0x5df   :  { %v2563_v27 = vpop.f32.mrf.mxu0  ;;  %v2576_v40 = vpop.f32.mrf.mxu1 }
 0x5e0   :  { %v2564_v30 = vadd.f32 %v2563_v27, %v2511_v43  ;;  %v2577_v15 = vadd.f32 %v2576_v40, %v2524_v34 }
 0x5e2   :  { %v2606_v32 = vadd.f32 %v2564_v30, %v6433_v59  ;;  %v2607_v17 = vadd.f32 %v2577_v15, %v6434_v47 }
 0x5e4   :  { %v3835_v33 = vmul.f32 -1.442695, %v2606_v32  ;;  %v3836_v23 = vmul.f32 -1.442695, %v2607_v17 }
 0x5e6   :  { %v2589_v1 = vpop.f32.mrf.mxu2  ;;  %v2602_v16 = vpop.f32.mrf.mxu3  ;;  %4111 = vpow2.f32 %v3835_v33 }
 0x5e7   :  { %v2565_v46 = vpop.f32.mrf.mxu0  ;;  %v2578_v38 = vpop.f32.mrf.mxu1  ;;  %4113 = vpow2.f32 %v3836_v23  ;;  %v2590_v30 = vadd.f32 %v2589_v1, %v2537_v6 }
 0x5ec   :  { %v4112_v32 = vpop.eup %4111 }
 0x5ed   :  { %v4114_v17 = vpop.eup %4113  ;;  %v5593_v23 = vadd.f32 1.0, %v4112_v32 }
 0x5ee   :  { %v2591_v18 = vpop.f32.mrf.mxu2  ;;  %v2604_v62 = vpop.f32.mrf.mxu3 }
 0x5ef   :  { %v6435_v62 = vld [vmem:[#allocation55_spill] sm:$0xff]  ;;  %vm2627_vm6 = vweird.f32 %v5593_v23 }
 0x5f0   :  { %v2685_v14 = vpop.f32.mrf.mxu0  ;;  %v2698_v28 = vpop.f32.mrf.mxu1  ;;  %v436_v18 = vrot.slane %v6435_v62, 4 }
 0x5f1   :  { %v2732_v11 = vrot.slane %v2698_v28, 6 }
 0x5f3   :  { %v2735_v40 = vsel %vm405_vm0, %v2685_v14, %v2732_v11 }
 0x5f8   :  { %v2711_v56 = vpop.f32.mrf.mxu2  ;;  %v2724_v24 = vpop.f32.mrf.mxu3 }
 0x5f9   :  { %v2733_v39 = vrot.slane %v2711_v56, 4  ;;  %v2734_v46 = vrot.slane %v2724_v24, 2  ;;  %v2687_v38 = vpop.f32.mrf.mxu0  ;;  %v2700_v43 = vpop.f32.mrf.mxu1  ;;  %v2620_v24 = vadd.f32 1.0, %v4114_v17  ;;  %v6436_v56 = vld [vmem:[#allocation18_spill] sm:$0xff] }
 0x5fa   :  { %v2608_v38 = vadd.f32 %v2590_v30, %v6436_v56 }
 0x5fb   :  { %v2736_v34 = vsel %vm407_vm1, %v2733_v39, %v2734_v46  ;;  %vm2642_vm5 = vweird.f32 %v2620_v24 }
 0x5fc   :  { %v2737_v15 = vsel %vm409_vm4, %v2735_v40, %v2736_v34  ;;  %v3837_v39 = vmul.f32 -1.442695, %v2608_v38  ;;  %v2603_v38 = vadd.f32 %v2602_v16, %v5585_v44  ;;  %v2648_v44 = vand.u32 2147483648, %v2620_v24 }
 0x5fd   :  { %v2739_v27 = vadd.f32 %v2737_v15, %v436_v18 }
 0x5ff   :  { %v3838_v28 = vmul.f32 -1.442695, %v2739_v27  ;;  %v2760_v18 = vrot.slane %v2739_v27, 6 }
 0x600   :  { %v2713_v33 = vpop.f32.mrf.mxu2  ;;  %v2726_v47 = vpop.f32.mrf.mxu3 }
 0x601   :  { %4115 = vpow2.f32 %v3838_v28 }
 0x602   :  { %4117 = vrcp.f32 %v5593_v23 }
 0x603   :  { %4119 = vrcp.f32 %v2620_v24 }
 0x607   :  { %v4116_v14 = vpop.eup %4115 }
 0x608   :  { %v2743_v11 = vadd.f32 1.0, %v4116_v14  ;;  %v4118_v46 = vpop.eup %4117 }
 0x609   :  { %v4120_v43 = vpop.eup %4119  ;;  %v2623_v6 = vmul.f32 %v4118_v46, %v5593_v23  ;;  %vm2628_vm3 = vweird.f32 %v4118_v46 }
 0x60a   :  { %4121 = vrcp.f32 %v2743_v11  ;;  %v2638_v1 = vmul.f32 %v4120_v43, %v2620_v24  ;;  %v2755_v17 = vand.u32 2147483648, %v2743_v11  ;;  %v2753_v33 = vand.u32 2147483647, %v2743_v11  ;;  %vm2629_vm8 = vmor %vm2627_vm6, %vm2628_vm3 }
 0x60b   :  { %4123 = vpow2.f32 %v3837_v39  ;;  %v2624_v34 = vsub.f32 1.0, %v2623_v6  ;;  %vm2749_vm13 = vweird.f32 %v2743_v11  ;;  %vm2643_vm2 = vweird.f32 %v4120_v43 }
 0x60c   :  { %v2639_v15 = vsub.f32 1.0, %v2638_v1  ;;  %4125 = vtanh.f32 %v2760_v18  ;;  %v2756_v59 = vor.u32 1.1754944e-38, %v2755_v17  ;;  %vm2754_vm15 = vcmp.eq.f32.partialorder %v2753_v33, 8.507059e+37  ;;  %vm5605_vm7 = vmor %vm2642_vm5, %vm2643_vm2 }
 0x60d   :  { %v2625_v39 = vmul.f32 %v4118_v46, %v2624_v34  ;;  %v2609_v6 = vadd.f32 %v2603_v38, %v4920_v54  ;;  %v2649_v38 = vor.u32 1.1754944e-38, %v2648_v44 }
 0x60e   :  { %v2640_v14 = vmul.f32 %v4120_v43, %v2639_v15 }
 0x610   :  { %v4122_v47 = vpop.eup %4121 }
 0x611   :  { %v2745_v40 = vmul.f32 %v4122_v47, %v2743_v11  ;;  %v4124_v62 = vpop.eup %4123  ;;  %vm2750_vm12 = vweird.f32 %v4122_v47  ;;  %v2633_v11 = vand.u32 2147483648, %v5593_v23 }
 0x612   :  { %v5598_v28 = vadd.f32 1.0, %v4124_v62  ;;  %vm2751_vm14 = vmor %vm2749_vm13, %vm2750_vm12  ;;  %v2641_v62 = vadd.f32 %v4120_v43, %v2640_v14  ;;  %v4126_v16 = vpop.eup %4125 }
 0x613   :  { %v2746_v32 = vsub.f32 1.0, %v2745_v40  ;;  %v2626_v40 = vadd.f32 %v4118_v46, %v2625_v39  ;;  %v2634_v14 = vor.u32 1.1754944e-38, %v2633_v11 }
 0x614   :  { %4127 = vrcp.f32 %v5598_v28  ;;  %vm2657_vm12 = vweird.f32 %v5598_v28  ;;  %v2661_v11 = vand.u32 2147483647, %v5598_v28 }
 0x615   :  { %v2747_v30 = vmul.f32 %v4122_v47, %v2746_v32  ;;  %4129 = vtanh.f32 %v2609_v6  ;;  %v2630_v17 = vsel %vm2629_vm8, %v4118_v46, %v2626_v40 }
 0x617   :  { %v2748_v56 = vadd.f32 %v4122_v47, %v2747_v30  ;;  %v2645_v30 = vsel %vm5605_vm7, %v4120_v43, %v2641_v62 }
 0x619   :  { %v2752_v27 = vsel %vm2751_vm14, %v4122_v47, %v2748_v56  ;;  %v2631_v56 = vand.u32 2147483647, %v5593_v23  ;;  %v2646_v47 = vand.u32 2147483647, %v2620_v24  ;;  %vm2662_vm14 = vcmp.eq.f32.partialorder %v2661_v11, 8.507059e+37  ;;  %v6493_v11 = vld [vmem:[#allocation81_spill] sm:$0xff] }
 0x61a   :  { %v2757_v1 = vsel %vm2754_vm15, %v2756_v59, %v2752_v27  ;;  %v4128_v15 = vpop.eup %4127 }
 0x61b   :  { %v2764_v32 = vrot.slane %v2757_v1, 2  ;;  %v2767_v34 = vmul.f32 %v4126_v16, %v2757_v1  ;;  %vm2632_vm9 = vcmp.eq.f32.partialorder %v2631_v56, 8.507059e+37  ;;  %vm2647_vm10 = vcmp.eq.f32.partialorder %v2646_v47, 8.507059e+37  ;;  %v4130_v39 = vpop.eup %4129  ;;  %v6470_v56 = vld [vmem:[#allocation58_spill] sm:$0xff]  ;;  %v6471_v47 = vld [vmem:[#allocation59_spill] sm:$0xff] }
 0x61c   :  { %v2653_v23 = vmul.f32 %v4128_v15, %v5598_v28  ;;  %v2635_v24 = vsel %vm2632_vm9, %v2634_v14, %v2630_v17  ;;  %v2770_v40 = vrot.slane %v2757_v1, 4  ;;  %vm2658_vm11 = vweird.f32 %v4128_v15  ;;  %v6475_v17 = vld [vmem:[#allocation63_spill] sm:$0xff]  ;;  %v6478_v14 = vld [vmem:[#allocation66_spill] sm:$0xff] }
 0x61d   :  { %v2766_v59 = vmul.f32 %v2764_v32, %v5478_v42  ;;  %v2650_v42 = vsel %vm2647_vm10, %v2649_v38, %v2645_v30  ;;  %v2669_v6 = vmul.f32 %v4130_v39, %v2635_v24  ;;  %v2663_v1 = vand.u32 2147483648, %v5598_v28  ;;  %vm2659_vm13 = vmor %vm2657_vm12, %vm2658_vm11  ;;  %v6469_v28 = vld [vmem:[#allocation51_spill] sm:$0xff]  ;;  %v6476_v30 = vld [vmem:[#allocation64_spill] sm:$0xff] }
 0x61e   :  { %v2668_v27 = vmul.f32 %v2650_v42, %v5483_v58  ;;  %v2654_v46 = vsub.f32 1.0, %v2653_v23  ;;  %v6477_v38 = vld [vmem:[#allocation65_spill] sm:$0xff]  ;;  %v6479_v23 = vld [vmem:[#allocation67_spill] sm:$0xff]  ;;  %v6480_v24 = vld [vmem:[#allocation68_spill] sm:$0xff] }
 0x61f   :  { %v5613_v33 = vadd.f32 %v2767_v34, %v2766_v59  ;;  %v6472_v59 = vld [vmem:[#allocation60_spill] sm:$0xff]  ;;  %v6473_v34 = vld [vmem:[#allocation61_spill] sm:$0xff]  ;;  %v6482_v39 = vld [vmem:[#allocation70_spill] sm:$0xff] }
 0x620   :  { %v5618_v62 = vadd.f32 %v2669_v6, %v2668_v27  ;;  %v2655_v16 = vmul.f32 %v4128_v15, %v2654_v46  ;;  %v6481_v42 = vld [vmem:[#allocation69_spill] sm:$0xff]  ;;  %v6483_v27 = vld [vmem:[#allocation71_spill] sm:$0xff]  ;;  %v6484_v6 = vld [vmem:[#allocation72_spill] sm:$0xff] }
 0x621   :  { %4131 = vtanh.f32 %v5613_v33  ;;  %v6485_v46 = vld [vmem:[#allocation73_spill] sm:$0xff] }
 0x622   :  { %4133 = vtanh.f32 %v5618_v62  ;;  %v2656_v58 = vadd.f32 %v4128_v15, %v2655_v16  ;;  %v6489_v16 = vld [vmem:[#allocation77_spill] sm:$0xff] }
 0x627   :  { %v4132_v32 = vpop.eup %4131 }
 0x628   :  { %v2772_v43 = vmul.f32 %v4132_v32, %v2770_v40  ;;  %v4134_v18 = vpop.eup %4133  ;;  %v6486_v40 = vld [vmem:[#allocation74_spill] sm:$0xff]  ;;  %v6487_v32 = vld [vmem:[#allocation75_spill] sm:$0xff] }
 0x62a   :  { %v2773_v44 = vpack.c.bf16 %v2772_v43, %v2772_v43  ;;  %v6488_v43 = vld [vmem:[#allocation76_spill] sm:$0xff] }
 0x62c   :  { %2782 = vmatmul.bf16.vlgmr.msra.gmra.mxu0 %v2773_v44  ;;  %2795 = vmatmul.bf16.vlgmr.msra.gmra.mxu1 %v2773_v44 }
 0x62d   :  { %2808 = vmatmul.bf16.vlgmr.msra.gmra.mxu2 %v2773_v44  ;;  %2821 = vmatmul.bf16.vlgmr.msra.gmra.mxu3 %v2773_v44 }
 0x62e   :  { %2948 = vmatpush.bf16.msra.mxu0 %v4386_v45  ;;  %2961 = vmatpush.bf16.msra.mxu1 %v4391_v51  ;;  %v2660_v45 = vsel %vm2659_vm13, %v4128_v15, %v2656_v58  ;;  %v2664_v51 = vor.u32 1.1754944e-38, %v2663_v1  ;;  %v6474_v15 = vld [vmem:[#allocation62_spill] sm:$0xff]  ;;  %v6491_v58 = vld [vmem:[#allocation79_spill] sm:$0xff]  ;;  %v6492_v1 = vld [vmem:[#allocation80_spill] sm:$0xff] }
 0x62f   :  { %2974 = vmatpush.bf16.msra.mxu2 %v4393_v52  ;;  %2987 = vmatpush.bf16.msra.mxu3 %v4398_v55 }
 0x630   :  { %v2665_v52 = vsel %vm2662_vm14, %v2664_v51, %v2660_v45  ;;  %v6494_v45 = vld [vmem:[#allocation82_spill] sm:$0xff]  ;;  %v6496_v51 = vld [vmem:[#allocation84_spill] sm:$0xff] }
 0x631   :  { %v2672_v55 = vmul.f32 %v4134_v18, %v2665_v52  ;;  %v6495_v18 = vld [vmem:[#allocation83_spill] sm:$0xff]  ;;  %v6497_v52 = vld [vmem:[#allocation85_spill] sm:$0xff] }
 0x632   :  { %2949 = vmatpush.bf16.msra.mxu0 %v4410_v60  ;;  %2962 = vmatpush.bf16.msra.mxu1 %v4414_v63  ;;  %v6439_v63 = vld [vmem:[#allocation20_spill] sm:$0xff] }
 0x633   :  { %2975 = vmatpush.bf16.msra.mxu2 %v4416_v0  ;;  %2988 = vmatpush.bf16.msra.mxu3 %v4419_v3  ;;  %v2673_v60 = vpack.c.bf16 %v2672_v55, %v2672_v55  ;;  %v6440_v0 = vld [vmem:[#allocation21_spill] sm:$0xff]  ;;  %v6441_v3 = vld [vmem:[#allocation22_spill] sm:$0xff] }
 0x634   :  { %v6498_v55 = vld [vmem:[#allocation86_spill] sm:$0xff] }
 0x636   :  { %2950 = vmatpush.bf16.msra.mxu0 %v4422_v8  ;;  %2963 = vmatpush.bf16.msra.mxu1 %v4426_v9  ;;  %v6442_v8 = vld [vmem:[#allocation23_spill] sm:$0xff]  ;;  %v6443_v9 = vld [vmem:[#allocation24_spill] sm:$0xff] }
 0x637   :  { %2976 = vmatpush.bf16.msra.mxu2 %v4428_v10  ;;  %2989 = vmatpush.bf16.msra.mxu3 %v4431_v13  ;;  %v6444_v10 = vld [vmem:[#allocation25_spill] sm:$0xff]  ;;  %v6445_v13 = vld [vmem:[#allocation26_spill] sm:$0xff] }
 0x63a   :  { %2951 = vmatpush.bf16.msra.mxu0 %v4434_v20  ;;  %2964 = vmatpush.bf16.msra.mxu1 %v4439_v25  ;;  %v6446_v20 = vld [vmem:[#allocation27_spill] sm:$0xff]  ;;  %v6447_v25 = vld [vmem:[#allocation28_spill] sm:$0xff] }
 0x63b   :  { %2977 = vmatpush.bf16.msra.mxu2 %v4441_v26  ;;  %2990 = vmatpush.bf16.msra.mxu3 %v4443_v29  ;;  %v6448_v26 = vld [vmem:[#allocation29_spill] sm:$0xff]  ;;  %v6449_v29 = vld [vmem:[#allocation30_spill] sm:$0xff] }
 0x63c   :  { %2834 = vmatmul.bf16.vlgmr.msrb.gmra.mxu0 %v2673_v60  ;;  %2847 = vmatmul.bf16.vlgmr.msrb.gmra.mxu1 %v2673_v60 }
 0x63d   :  { %2860 = vmatmul.bf16.vlgmr.msrb.gmra.mxu2 %v2673_v60  ;;  %2873 = vmatmul.bf16.vlgmr.msrb.gmra.mxu3 %v2673_v60  ;;  %v6499_v60 = vld [vmem:[#allocation87_spill] sm:$0xff] }
 0x63e   :  { %2952 = vmatpush.bf16.msra.mxu0 %v4446_v35  ;;  %2965 = vmatpush.bf16.msra.mxu1 %v4450_v36  ;;  %v6450_v35 = vld [vmem:[#allocation31_spill] sm:$0xff]  ;;  %v6451_v36 = vld [vmem:[#allocation32_spill] sm:$0xff] }
 0x63f   :  { %2978 = vmatpush.bf16.msra.mxu2 %v4452_v37  ;;  %2991 = vmatpush.bf16.msra.mxu3 %v4455_v41  ;;  %v6452_v37 = vld [vmem:[#allocation33_spill] sm:$0xff]  ;;  %v6453_v41 = vld [vmem:[#allocation34_spill] sm:$0xff] }
 0x642   :  { %2953 = vmatpush.bf16.msra.mxu0 %v4458_v48  ;;  %2966 = vmatpush.bf16.msra.mxu1 %v4462_v49  ;;  %v6454_v48 = vld [vmem:[#allocation35_spill] sm:$0xff]  ;;  %v6455_v49 = vld [vmem:[#allocation36_spill] sm:$0xff] }
 0x643   :  { %2979 = vmatpush.bf16.msra.mxu2 %v4464_v50  ;;  %2992 = vmatpush.bf16.msra.mxu3 %v4467_v57  ;;  %v6456_v50 = vld [vmem:[#allocation37_spill] sm:$0xff]  ;;  %v6457_v57 = vld [vmem:[#allocation38_spill] sm:$0xff] }
 0x646   :  { %2954 = vmatpush.bf16.msra.mxu0 %v4470_v2  ;;  %2967 = vmatpush.bf16.msra.mxu1 %v4474_v4  ;;  %v6458_v2 = vld [vmem:[#allocation39_spill] sm:$0xff]  ;;  %v6459_v4 = vld [vmem:[#allocation40_spill] sm:$0xff] }
 0x647   :  { %2980 = vmatpush.bf16.msra.mxu2 %v4476_v5  ;;  %2993 = vmatpush.bf16.msra.mxu3 %v4479_v12  ;;  %v6460_v5 = vld [vmem:[#allocation44_spill] sm:$0xff]  ;;  %v6461_v12 = vld [vmem:[#allocation45_spill] sm:$0xff] }
 0x64a   :  { %2955 = vmatpush.bf16.msra.mxu0 %v4482_v19  ;;  %2968 = vmatpush.bf16.msra.mxu1 %v4486_v21  ;;  %v6462_v19 = vld [vmem:[#allocation46_spill] sm:$0xff]  ;;  %v6463_v21 = vld [vmem:[#allocation47_spill] sm:$0xff] }
 0x64b   :  { %2981 = vmatpush.bf16.msra.mxu2 %v4488_v22  ;;  %2994 = vmatpush.bf16.msra.mxu3 %v6048_v31  ;;  %v6464_v22 = vld [vmem:[#allocation48_spill] sm:$0xff]  ;;  %v6465_v31 = vld [vmem:[#allocation49_spill] sm:$0xff] }
 0x64d   :  { %2956 = vmatmul.bf16.vlgmr.msra.gmra.mxu0 %v2773_v44  ;;  %2969 = vmatmul.bf16.vlgmr.msra.gmra.mxu1 %v2773_v44 }
 0x64e   :  { %3046 = vmatpush.bf16.msrb.mxu0 %v6049_v53  ;;  %3059 = vmatpush.bf16.msrb.mxu1 %v6050_v7  ;;  %v6466_v53 = vld [vmem:[#allocation53_spill] sm:$0xff] }
 0x64f   :  { %2982 = vmatmul.bf16.vlgmr.msra.gmra.mxu2 %v2773_v44  ;;  %2995 = vmatmul.bf16.vlgmr.msra.gmra.mxu3 %v2773_v44  ;;  %v6467_v7 = vld [vmem:[#allocation57_spill] sm:$0xff]  ;;  %v6490_v44 = vld [vmem:[#allocation78_spill] sm:$0xff] }
 0x650   :  { %3072 = vmatpush.bf16.msrb.mxu2 %v6051_v61  ;;  %3085 = vmatpush.bf16.msrb.mxu3 %v6439_v63  ;;  %v6468_v61 = vld [vmem:[#allocation50_spill] sm:$0xff] }
 0x652   :  { %3047 = vmatpush.bf16.msrb.mxu0 %v6440_v0  ;;  %3060 = vmatpush.bf16.msrb.mxu1 %v6441_v3 }
 0x654   :  { %3073 = vmatpush.bf16.msrb.mxu2 %v6442_v8  ;;  %3086 = vmatpush.bf16.msrb.mxu3 %v6443_v9 }
 0x656   :  { %3048 = vmatpush.bf16.msrb.mxu0 %v6444_v10  ;;  %3061 = vmatpush.bf16.msrb.mxu1 %v6445_v13 }
 0x658   :  { %3074 = vmatpush.bf16.msrb.mxu2 %v6446_v20  ;;  %3087 = vmatpush.bf16.msrb.mxu3 %v6447_v25 }
 0x65a   :  { %3049 = vmatpush.bf16.msrb.mxu0 %v6448_v26  ;;  %3062 = vmatpush.bf16.msrb.mxu1 %v6449_v29 }
 0x65c   :  { %3075 = vmatpush.bf16.msrb.mxu2 %v6450_v35  ;;  %3088 = vmatpush.bf16.msrb.mxu3 %v6451_v36 }
 0x65e   :  { %3050 = vmatpush.bf16.msrb.mxu0 %v6452_v37  ;;  %3063 = vmatpush.bf16.msrb.mxu1 %v6453_v41 }
 0x660   :  { %3076 = vmatpush.bf16.msrb.mxu2 %v6454_v48  ;;  %3089 = vmatpush.bf16.msrb.mxu3 %v6455_v49 }
 0x662   :  { %3051 = vmatpush.bf16.msrb.mxu0 %v6456_v50  ;;  %3064 = vmatpush.bf16.msrb.mxu1 %v6457_v57  ;;  %v6500_v57 = vld [vmem:[#allocation16_spill] sm:$0xff] }
 0x664   :  { %3077 = vmatpush.bf16.msrb.mxu2 %v6458_v2  ;;  %3090 = vmatpush.bf16.msrb.mxu3 %v6459_v4  ;;  %v6501_v4 = vld [vmem:[#allocation17_spill] sm:$0xff] }
 0x666   :  { %3052 = vmatpush.bf16.msrb.mxu0 %v6460_v5  ;;  %3065 = vmatpush.bf16.msrb.mxu1 %v6461_v12 }
 0x668   :  { %3078 = vmatpush.bf16.msrb.mxu2 %v6462_v19  ;;  %3091 = vmatpush.bf16.msrb.mxu3 %v6463_v21 }
 0x66a   :  { %3053 = vmatpush.bf16.msrb.mxu0 %v6464_v22  ;;  %3066 = vmatpush.bf16.msrb.mxu1 %v6465_v31 }
 0x66c   :  { %3079 = vmatpush.bf16.msrb.mxu2 %v6468_v61  ;;  %3092 = vmatpush.bf16.msrb.mxu3 %v6469_v28 }
 0x66e   :  { %3098 = vmatpush.bf16.msra.mxu0 %v6466_v53  ;;  %3111 = vmatpush.bf16.msra.mxu1 %v6467_v7 }
 0x670   :  { %3124 = vmatpush.bf16.msra.mxu2 %v6470_v56  ;;  %3137 = vmatpush.bf16.msra.mxu3 %v6471_v47 }
 0x672   :  { %3099 = vmatpush.bf16.msra.mxu0 %v6472_v59  ;;  %3112 = vmatpush.bf16.msra.mxu1 %v6473_v34  ;;  %v6502_v34 = vld [vmem:[#allocation56_spill] sm:$0xff] }
 0x674   :  { %3125 = vmatpush.bf16.msra.mxu2 %v6474_v15  ;;  %3138 = vmatpush.bf16.msra.mxu3 %v6475_v17  ;;  %v440_v15 = vrot.slane %v6502_v34, 6 }
 0x676   :  { %3100 = vmatpush.bf16.msra.mxu0 %v6476_v30  ;;  %3113 = vmatpush.bf16.msra.mxu1 %v6477_v38 }
 0x678   :  { %3126 = vmatpush.bf16.msra.mxu2 %v6478_v14  ;;  %3139 = vmatpush.bf16.msra.mxu3 %v6479_v23 }
 0x67a   :  { %3101 = vmatpush.bf16.msra.mxu0 %v6480_v24  ;;  %3114 = vmatpush.bf16.msra.mxu1 %v6481_v42 }
 0x67c   :  { %3127 = vmatpush.bf16.msra.mxu2 %v6482_v39  ;;  %3140 = vmatpush.bf16.msra.mxu3 %v6483_v27 }
 0x67e   :  { %3102 = vmatpush.bf16.msra.mxu0 %v6484_v6  ;;  %3115 = vmatpush.bf16.msra.mxu1 %v6485_v46 }
 0x680   :  { %3128 = vmatpush.bf16.msra.mxu2 %v6486_v40  ;;  %3141 = vmatpush.bf16.msra.mxu3 %v6487_v32  ;;  %v6503_v40 = vld [vmem:[#allocation18_spill] sm:$0xff] }
 0x682   :  { %3103 = vmatpush.bf16.msra.mxu0 %v6488_v43  ;;  %3116 = vmatpush.bf16.msra.mxu1 %v6489_v16 }
 0x684   :  { %3129 = vmatpush.bf16.msra.mxu2 %v6490_v44  ;;  %3142 = vmatpush.bf16.msra.mxu3 %v6491_v58 }
 0x686   :  { %3104 = vmatpush.bf16.msra.mxu0 %v6492_v1  ;;  %3117 = vmatpush.bf16.msra.mxu1 %v6493_v11 }
 0x688   :  { %3130 = vmatpush.bf16.msra.mxu2 %v6494_v45  ;;  %3143 = vmatpush.bf16.msra.mxu3 %v6495_v18 }
 0x68a   :  { %3105 = vmatpush.bf16.msra.mxu0 %v6496_v51  ;;  %3118 = vmatpush.bf16.msra.mxu1 %v6497_v52 }
 0x68c   :  { %3131 = vmatpush.bf16.msra.mxu2 %v6498_v55  ;;  %3144 = vmatpush.bf16.msra.mxu3 %v6499_v60 }
 0x6a9   :  { %v2783_v63 = vpop.f32.mrf.mxu0  ;;  %v2796_v0 = vpop.f32.mrf.mxu1 }
 0x6b0   :  { %v2809_v3 = vpop.f32.mrf.mxu2  ;;  %v5720_v8 = vpop.f32.mrf.mxu3 }
 0x6b1   :  { %v2785_v9 = vpop.f32.mrf.mxu0  ;;  %v2798_v10 = vpop.f32.mrf.mxu1 }
 0x6b8   :  { %v2811_v13 = vpop.f32.mrf.mxu2  ;;  %v2824_v20 = vpop.f32.mrf.mxu3 }
 0x6b9   :  { %v2835_v25 = vpop.f32.mrf.mxu0  ;;  %v2848_v26 = vpop.f32.mrf.mxu1 }
 0x6ba   :  { %v2836_v41 = vadd.f32 %v2835_v25, %v2783_v63  ;;  %v2849_v48 = vadd.f32 %v2848_v26, %v2796_v0 }
 0x6bc   :  { %v2878_v2 = vadd.f32 %v2836_v41, %v6500_v57  ;;  %v2879_v5 = vadd.f32 %v2849_v48, %v6501_v4 }
 0x6be   :  { %v3839_v21 = vmul.f32 -1.442695, %v2878_v2  ;;  %v3840_v22 = vmul.f32 -1.442695, %v2879_v5 }
 0x6c0   :  { %v2861_v29 = vpop.f32.mrf.mxu2  ;;  %v2874_v35 = vpop.f32.mrf.mxu3  ;;  %4135 = vpow2.f32 %v3839_v21 }
 0x6c1   :  { %v2837_v36 = vpop.f32.mrf.mxu0  ;;  %v2850_v37 = vpop.f32.mrf.mxu1  ;;  %4137 = vpow2.f32 %v3840_v22  ;;  %v2862_v42 = vadd.f32 %v2861_v29, %v2809_v3  ;;  %v2875_v20 = vadd.f32 %v2874_v35, %v5720_v8 }
 0x6c3   :  { %v2880_v32 = vadd.f32 %v2862_v42, %v6503_v40  ;;  %v2881_v41 = vadd.f32 %v2875_v20, %v4920_v54  ;;  %v3225_v20 = vld [vmem:[%s5825_s7 + $0x40] sm:$0xff] }
 0x6c5   :  { %v3841_v16 = vmul.f32 -1.442695, %v2880_v32 }
 0x6c6   :  { %v4136_v14 = vpop.eup %4135 }
 0x6c7   :  { %v4138_v23 = vpop.eup %4137  ;;  %v5728_v6 = vadd.f32 1.0, %v4136_v14 }
 0x6c8   :  { %v2863_v49 = vpop.f32.mrf.mxu2  ;;  %v2876_v50 = vpop.f32.mrf.mxu3  ;;  %v2892_v46 = vadd.f32 1.0, %v4138_v23 }
 0x6c9   :  { %vm2899_vm6 = vweird.f32 %v5728_v6  ;;  %v2905_v5 = vand.u32 2147483648, %v5728_v6 }
 0x6ca   :  { %v2957_v12 = vpop.f32.mrf.mxu0  ;;  %v2970_v19 = vpop.f32.mrf.mxu1  ;;  %vm2914_vm5 = vweird.f32 %v2892_v46  ;;  %v2920_v35 = vand.u32 2147483648, %v2892_v46  ;;  %v2918_v21 = vand.u32 2147483647, %v2892_v46 }
 0x6cb   :  { %v3004_v31 = vrot.slane %v2970_v19, 6  ;;  %v2903_v19 = vand.u32 2147483647, %v5728_v6 }
 0x6cc   :  { %vm2919_vm10 = vcmp.eq.f32.partialorder %v2918_v21, 8.507059e+37 }
 0x6cd   :  { %v3007_v59 = vsel %vm405_vm0, %v2957_v12, %v3004_v31  ;;  %vm2904_vm9 = vcmp.eq.f32.partialorder %v2903_v19, 8.507059e+37  ;;  %v3221_v12 = vld [vmem:[%s5825_s7 + $0x20] sm:$0xff]  ;;  %v3220_v19 = vld [vmem:[%s5825_s7 + $0x18] sm:$0xff] }
 0x6d2   :  { %v2983_v53 = vpop.f32.mrf.mxu2  ;;  %v2996_v7 = vpop.f32.mrf.mxu3 }
 0x6d3   :  { %v3005_v61 = vrot.slane %v2983_v53, 4  ;;  %v3006_v28 = vrot.slane %v2996_v7, 2  ;;  %v2959_v56 = vpop.f32.mrf.mxu0  ;;  %v2972_v47 = vpop.f32.mrf.mxu1 }
 0x6d4   :  { %v2921_v56 = vor.u32 1.1754944e-38, %v2920_v35  ;;  %v2906_v47 = vor.u32 1.1754944e-38, %v2905_v5 }
 0x6d5   :  { %v3008_v17 = vsel %vm407_vm1, %v3005_v61, %v3006_v28 }
 0x6d6   :  { %v3009_v30 = vsel %vm409_vm4, %v3007_v59, %v3008_v17 }
 0x6d7   :  { %v3011_v38 = vadd.f32 %v3009_v30, %v440_v15 }
 0x6d9   :  { %v3842_v24 = vmul.f32 -1.442695, %v3011_v38  ;;  %v3032_v55 = vrot.slane %v3011_v38, 6 }
 0x6da   :  { %v2985_v39 = vpop.f32.mrf.mxu2  ;;  %v2998_v27 = vpop.f32.mrf.mxu3 }
 0x6db   :  { %4139 = vpow2.f32 %v3842_v24 }
 0x6dc   :  { %4141 = vrcp.f32 %v5728_v6 }
 0x6dd   :  { %4143 = vrcp.f32 %v2892_v46 }
 0x6e1   :  { %v4140_v43 = vpop.eup %4139 }
 0x6e2   :  { %v3015_v44 = vadd.f32 1.0, %v4140_v43  ;;  %v4142_v58 = vpop.eup %4141 }
 0x6e3   :  { %v4144_v1 = vpop.eup %4143  ;;  %v2895_v11 = vmul.f32 %v4142_v58, %v5728_v6  ;;  %vm2900_vm3 = vweird.f32 %v4142_v58 }
 0x6e4   :  { %4145 = vrcp.f32 %v3015_v44  ;;  %v2910_v45 = vmul.f32 %v4144_v1, %v2892_v46  ;;  %v3027_v3 = vand.u32 2147483648, %v3015_v44  ;;  %v3025_v13 = vand.u32 2147483647, %v3015_v44  ;;  %vm2901_vm8 = vmor %vm2899_vm6, %vm2900_vm3 }
 0x6e5   :  { %4147 = vpow2.f32 %v3841_v16  ;;  %v2896_v60 = vsub.f32 1.0, %v2895_v11  ;;  %vm3021_vm1 = vweird.f32 %v3015_v44  ;;  %vm2915_vm2 = vweird.f32 %v4144_v1 }
 0x6e6   :  { %v2911_v63 = vsub.f32 1.0, %v2910_v45  ;;  %4149 = vtanh.f32 %v3032_v55  ;;  %v3028_v36 = vor.u32 1.1754944e-38, %v3027_v3  ;;  %vm3026_vm15 = vcmp.eq.f32.partialorder %v3025_v13, 8.507059e+37  ;;  %vm5740_vm7 = vmor %vm2914_vm5, %vm2915_vm2  ;;  %v3229_v55 = vld [vmem:[%s5825_s7 + $0x60] sm:$0xff]  ;;  %v3226_v13 = vld [vmem:[%s5825_s7 + $0x48] sm:$0xff] }
 0x6e7   :  { %v2897_v26 = vmul.f32 %v4142_v58, %v2896_v60 }
 0x6e8   :  { %v2912_v25 = vmul.f32 %v4144_v1, %v2911_v63 }
 0x6e9   :  { %v2898_v49 = vadd.f32 %v4142_v58, %v2897_v26 }
 0x6ea   :  { %v4146_v18 = vpop.eup %4145  ;;  %v2913_v50 = vadd.f32 %v4144_v1, %v2912_v25 }
 0x6eb   :  { %v3017_v51 = vmul.f32 %v4146_v18, %v3015_v44  ;;  %v4148_v52 = vpop.eup %4147  ;;  %vm3022_vm0 = vweird.f32 %v4146_v18  ;;  %v2902_v7 = vsel %vm2901_vm8, %v4142_v58, %v2898_v49  ;;  %v3223_v49 = vld [vmem:[%s5825_s7 + $0x30] sm:$0xff] }
 0x6ec   :  { %v5733_v9 = vadd.f32 1.0, %v4148_v52  ;;  %vm3023_vm4 = vmor %vm3021_vm1, %vm3022_vm0  ;;  %v4150_v8 = vpop.eup %4149  ;;  %v2917_v61 = vsel %vm5740_vm7, %v4144_v1, %v2913_v50  ;;  %v2907_v34 = vsel %vm2904_vm9, %v2906_v47, %v2902_v7  ;;  %v3230_v52 = vld [vmem:[%s5825_s7 + $0x68] sm:$0xff] }
 0x6ed   :  { %v3018_v0 = vsub.f32 1.0, %v3017_v51  ;;  %v2922_v15 = vsel %vm2919_vm10, %v2921_v56, %v2917_v61  ;;  %v3231_v51 = vld [vmem:[%s5825_s7 + $0x70] sm:$0xff]  ;;  %v3218_v61 = vld [vmem:[%s5825_s7 + $0x8] sm:$0xff]  ;;  %v3217_v56 = vld [vmem:[%s5825_s7] sm:$0xff] }
 0x6ee   :  { %4151 = vrcp.f32 %v5733_v9  ;;  %v2935_v46 = vand.u32 2147483648, %v5733_v9  ;;  %vm2929_vm12 = vweird.f32 %v5733_v9 }
 0x6ef   :  { %v3019_v10 = vmul.f32 %v4146_v18, %v3018_v0  ;;  %4153 = vtanh.f32 %v2881_v41 }
 0x6f0   :  { %v2936_v16 = vor.u32 1.1754944e-38, %v2935_v46 }
 0x6f1   :  { %v3020_v29 = vadd.f32 %v4146_v18, %v3019_v10  ;;  %v3227_v10 = vld [vmem:[%s5825_s7 + $0x50] sm:$0xff] }
 0x6f3   :  { %v3024_v37 = vsel %vm3023_vm4, %v4146_v18, %v3020_v29  ;;  %v3232_v18 = vld [vmem:[%s5825_s7 + $0x78] sm:$0xff] }
 0x6f4   :  { %v3029_v48 = vsel %vm3026_vm15, %v3028_v36, %v3024_v37  ;;  %v4152_v53 = vpop.eup %4151  ;;  %v3224_v37 = vld [vmem:[%s5825_s7 + $0x38] sm:$0xff] }
 0x6f5   :  { %v3036_v2 = vrot.slane %v3029_v48, 2  ;;  %v3039_v31 = vmul.f32 %v4150_v8, %v3029_v48  ;;  %v2925_v59 = vmul.f32 %v4152_v53, %v5733_v9  ;;  %v4154_v17 = vpop.eup %4153  ;;  %v3042_v14 = vrot.slane %v3029_v48, 4  ;;  %v3222_v8 = vld [vmem:[%s5825_s7 + $0x28] sm:$0xff] }
 0x6f6   :  { %v2941_v30 = vmul.f32 %v4154_v17, %v2907_v34  ;;  %vm2930_vm11 = vweird.f32 %v4152_v53 }
 0x6f7   :  { %v3038_v22 = vmul.f32 %v3036_v2, %v5613_v33  ;;  %v2940_v33 = vmul.f32 %v2922_v15, %v5618_v62  ;;  %v2926_v38 = vsub.f32 1.0, %v2925_v59  ;;  %v2933_v62 = vand.u32 2147483647, %v5733_v9  ;;  %vm2931_vm13 = vmor %vm2929_vm12, %vm2930_vm11  ;;  %v3228_v9 = vld [vmem:[%s5825_s7 + $0x58] sm:$0xff] }
 0x6f8   :  { %vm3257_vm11 = vcmask 9216  }
 0x6f9   :  { %v3040_v28 = vadd.f32 %v3039_v31, %v3038_v22  ;;  %v5750_v42 = vadd.f32 %v2941_v30, %v2940_v33  ;;  %v2927_v39 = vmul.f32 %v4152_v53, %v2926_v38  ;;  %vm2934_vm14 = vcmp.eq.f32.partialorder %v2933_v62, 8.507059e+37 }
 0x6fb   :  { %4155 = vtanh.f32 %v3040_v28  ;;  %v2928_v6 = vadd.f32 %v4152_v53, %v2927_v39 }
 0x6fc   :  { %4157 = vtanh.f32 %v5750_v42 }
 0x6fd   :  { %v2932_v32 = vsel %vm2931_vm13, %v4152_v53, %v2928_v6  ;;  %v3219_v53 = vld [vmem:[%s5825_s7 + $0x10] sm:$0xff] }
 0x6fe   :  { %v2937_v44 = vsel %vm2934_vm14, %v2936_v16, %v2932_v32 }
 0x701   :  { %v4156_v23 = vpop.eup %4155 }
 0x702   :  { %v3044_v24 = vmul.f32 %v4156_v23, %v3042_v14  ;;  %v4158_v43 = vpop.eup %4157 }
 0x703   :  { %v2944_v58 = vmul.f32 %v4158_v43, %v2937_v44 }
 0x704   :  { %v3045_v27 = vpack.c.bf16 %v3044_v24, %v3044_v24 }
 0x705   :  { %v2945_v1 = vpack.c.bf16 %v2944_v58, %v2944_v58 }
 0x706   :  { %3054 = vmatmul.bf16.vlgmr.msrb.gmra.mxu0 %v3045_v27  ;;  %3067 = vmatmul.bf16.vlgmr.msrb.gmra.mxu1 %v3045_v27 }
 0x707   :  { %3080 = vmatmul.bf16.vlgmr.msrb.gmra.mxu2 %v3045_v27  ;;  %3093 = vmatmul.bf16.vlgmr.msrb.gmra.mxu3 %v3045_v27 }
 0x708   :  { %3237 = vmatpush.msrb.mxu0 %v3232_v18 }
 0x70a   :  { %3238 = vmatpush.msrb.mxu0 %v3231_v51 }
 0x70c   :  { %3239 = vmatpush.msrb.mxu0 %v3230_v52 }
 0x70e   :  { %3240 = vmatpush.msrb.mxu0 %v3229_v55 }
 0x710   :  { %3241 = vmatpush.msrb.mxu0 %v3228_v9 }
 0x712   :  { %3242 = vmatpush.msrb.mxu0 %v3227_v10 }
 0x714   :  { %3243 = vmatpush.msrb.mxu0 %v3226_v13 }
 0x716   :  { %3106 = vmatmul.bf16.vlgmr.msra.gmra.mxu0 %v2945_v1  ;;  %3119 = vmatmul.bf16.vlgmr.msra.gmra.mxu1 %v2945_v1 }
 0x717   :  { %3132 = vmatmul.bf16.vlgmr.msra.gmra.mxu2 %v2945_v1  ;;  %3145 = vmatmul.bf16.vlgmr.msra.gmra.mxu3 %v2945_v1 }
 0x718   :  { %3244 = vmatpush.msrb.mxu0 %v3225_v20 }
 0x71a   :  { %3245 = vmatpush.msrb.mxu0 %v3224_v37 }
 0x71c   :  { %3246 = vmatpush.msrb.mxu0 %v3223_v49 }
 0x71e   :  { %3247 = vmatpush.msrb.mxu0 %v3222_v8 }
 0x720   :  { %3248 = vmatpush.msrb.mxu0 %v3221_v12 }
 0x722   :  { %3249 = vmatpush.msrb.mxu0 %v3220_v19 }
 0x724   :  { %3250 = vmatpush.msrb.mxu0 %v3219_v53 }
 0x726   :  { %3251 = vmatpush.msrb.mxu0 %v3218_v61 }
 0x728   :  { %3252 = vmatpush.msrb.mxu0 %v3217_v56 }
 0x783   :  { %v3055_v11 = vpop.f32.mrf.mxu0  ;;  %v3068_v45 = vpop.f32.mrf.mxu1 }
 0x78a   :  { %v3081_v60 = vpop.f32.mrf.mxu2  ;;  %v3094_v63 = vpop.f32.mrf.mxu3 }
 0x78b   :  { %v3057_v0 = vpop.f32.mrf.mxu0  ;;  %v3070_v3 = vpop.f32.mrf.mxu1 }
 0x792   :  { %v3083_v25 = vpop.f32.mrf.mxu2  ;;  %v3096_v26 = vpop.f32.mrf.mxu3 }
 0x793   :  { %v3107_v29 = vpop.f32.mrf.mxu0  ;;  %v3120_v36 = vpop.f32.mrf.mxu1 }
 0x794   :  { %v3108_v41 = vadd.f32 %v3107_v29, %v3055_v11  ;;  %v3121_v48 = vadd.f32 %v3120_v36, %v3068_v45 }
 0x796   :  { %v3150_v50 = vadd.f32 %v3108_v41, %v6500_v57  ;;  %v3151_v2 = vadd.f32 %v3121_v48, %v6501_v4 }
 0x798   :  { %v3843_v35 = vmul.f32 -1.442695, %v3150_v50  ;;  %v3844_v5 = vmul.f32 -1.442695, %v3151_v2  ;;  %v3982_v50 = vld [vmem:[%s5826_s8] ss:$0 sm:$0xff] }
 0x799   :  { %s4314_s8 = smov [#allocation11]  }
 0x79a   :  { %4159 = vpow2.f32 %v3843_v35  ;;  %v3133_v57 = vpop.f32.mrf.mxu2  ;;  %v3146_v21 = vpop.f32.mrf.mxu3  ;;  %s3288_s27 = sshll.u32 %s4314_s8, 4  ;;  %s3289_s27 = int_to_ptr.vmem [resolvable:$true] %s3288_s27 }
 0x79b   :  { %4161 = vpow2.f32 %v3844_v5  ;;  %v3134_v4 = vadd.f32 %v3133_v57, %v3081_v60  ;;  %v3109_v22 = vpop.f32.mrf.mxu0  ;;  %v3122_v31 = vpop.f32.mrf.mxu1 }
 0x79d   :  { %v3152_v7 = vadd.f32 %v3134_v4, %v6503_v40  ;;  %v3147_v40 = vadd.f32 %v3146_v21, %v3094_v63 }
 0x79f   :  { %v3845_v28 = vmul.f32 -1.442695, %v3152_v7  ;;  %v3153_v23 = vadd.f32 %v3147_v40, %v4920_v54 }
 0x7a0   :  { %v4160_v47 = vpop.eup %4159 }
 0x7a1   :  { %v4162_v59 = vpop.eup %4161  ;;  %v3163_v34 = vadd.f32 1.0, %v4160_v47  ;;  %4163 = vpow2.f32 %v3845_v28 }
 0x7a2   :  { %v3164_v15 = vadd.f32 1.0, %v4162_v59  ;;  %v3135_v17 = vpop.f32.mrf.mxu2  ;;  %v3148_v33 = vpop.f32.mrf.mxu3 }
 0x7a3   :  { %4165 = vrcp.f32 %v3163_v34  ;;  %v3177_v62 = vand.u32 2147483648, %v3163_v34  ;;  %v3175_v16 = vand.u32 2147483647, %v3163_v34  ;;  %vm3171_vm4 = vweird.f32 %v3163_v34 }
 0x7a4   :  { %4167 = vrcp.f32 %v3164_v15  ;;  %v3192_v32 = vand.u32 2147483648, %v3164_v15  ;;  %v3190_v58 = vand.u32 2147483647, %v3164_v15  ;;  %vm3186_vm15 = vweird.f32 %v3164_v15 }
 0x7a5   :  { %v3178_v45 = vor.u32 1.1754944e-38, %v3177_v62  ;;  %vm3176_vm5 = vcmp.eq.f32.partialorder %v3175_v16, 8.507059e+37 }
 0x7a6   :  { %v3193_v51 = vor.u32 1.1754944e-38, %v3192_v32  ;;  %vm3191_vm6 = vcmp.eq.f32.partialorder %v3190_v58, 8.507059e+37 }
 0x7a7   :  { %v4164_v30 = vpop.eup %4163 }
 0x7a8   :  { %v3165_v38 = vadd.f32 1.0, %v4164_v30 }
 0x7a9   :  { %v4166_v14 = vpop.eup %4165 }
 0x7aa   :  { %v4168_v24 = vpop.eup %4167  ;;  %v3167_v39 = vmul.f32 %v4166_v14, %v3163_v34  ;;  %4169 = vrcp.f32 %v3165_v38  ;;  %vm3172_vm0 = vweird.f32 %v4166_v14  ;;  %v3207_v26 = vand.u32 2147483648, %v3165_v38 }
 0x7ab   :  { %v3182_v27 = vmul.f32 %v4168_v24, %v3164_v15  ;;  %4171 = vtanh.f32 %v3153_v23  ;;  %vm3187_vm1 = vweird.f32 %v4168_v24  ;;  %vm3173_vm2 = vmor %vm3171_vm4, %vm3172_vm0  ;;  %vm3201_vm8 = vweird.f32 %v3165_v38 }
 0x7ac   :  { %v3168_v6 = vsub.f32 1.0, %v3167_v39  ;;  %vm3188_vm3 = vmor %vm3186_vm15, %vm3187_vm1  ;;  %v3205_v29 = vand.u32 2147483647, %v3165_v38  ;;  %v3208_v37 = vor.u32 1.1754944e-38, %v3207_v26 }
 0x7ad   :  { %v3183_v46 = vsub.f32 1.0, %v3182_v27 }
 0x7ae   :  { %v3169_v43 = vmul.f32 %v4166_v14, %v3168_v6  ;;  %vm3206_vm10 = vcmp.eq.f32.partialorder %v3205_v29, 8.507059e+37 }
 0x7af   :  { %v3184_v44 = vmul.f32 %v4168_v24, %v3183_v46 }
 0x7b0   :  { %v4170_v1 = vpop.eup %4169  ;;  %v3170_v11 = vadd.f32 %v4166_v14, %v3169_v43 }
 0x7b1   :  { %v3197_v54 = vmul.f32 %v4170_v1, %v3165_v38  ;;  %v3185_v18 = vadd.f32 %v4168_v24, %v3184_v44  ;;  %v4172_v55 = vpop.eup %4171  ;;  %vm3202_vm7 = vweird.f32 %v4170_v1 }
 0x7b2   :  { %v3174_v52 = vsel %vm3173_vm2, %v4166_v14, %v3170_v11  ;;  %vm3203_vm9 = vmor %vm3201_vm8, %vm3202_vm7 }
 0x7b3   :  { %v3198_v60 = vsub.f32 1.0, %v3197_v54  ;;  %v3179_v63 = vsel %vm3176_vm5, %v3178_v45, %v3174_v52  ;;  %v3189_v0 = vsel %vm3188_vm3, %v4168_v24, %v3185_v18 }
 0x7b4   :  { %v3194_v3 = vsel %vm3191_vm6, %v3193_v51, %v3189_v0  ;;  %v3213_v9 = vmul.f32 %v4172_v55, %v3179_v63 }
 0x7b5   :  { %v3199_v10 = vmul.f32 %v4170_v1, %v3198_v60  ;;  %v3212_v13 = vmul.f32 %v3194_v3, %v5750_v42 }
 0x7b7   :  { %v3214_v20 = vadd.f32 %v3213_v9, %v3212_v13  ;;  %v3200_v25 = vadd.f32 %v4170_v1, %v3199_v10 }
 0x7b9   :  { %4173 = vtanh.f32 %v3214_v20  ;;  %v3204_v36 = vsel %vm3203_vm9, %v4170_v1, %v3200_v25 }
 0x7ba   :  { %v3209_v48 = vsel %vm3206_vm10, %v3208_v37, %v3204_v36 }
 0x7bf   :  { %v4174_v41 = vpop.eup %4173 }
 0x7c0   :  { %v3216_v49 = vmul.f32 %v4174_v41, %v3209_v48 }
 0x7c2   :  { %3253 = vmatmul.f32.vlgmr.msrb.gmra.mxu0 %v3216_v49 }
 0x83f   :  { %v3254_v42 = vpop.f32.mrf.mxu0 }
 0x840   :  { %v3255_v2 = vadd.f32 %v3982_v50, %v3254_v42 }
 0x842   :  { %v3258_v8 = vsel %vm3257_vm11, %v3255_v2, -inf }
 0x843   :  { %3259 = vmax.xlane.f32.xlu0 %v3258_v8 }
 0x8b6   :  { %v3260_v35 = vpop.xlane.xlu0 %3259 }
 0x8b7   :  { %v3261_v5 = vsub.f32 %v3255_v2, %v3260_v35 }
 0x8b9   :  { %v3262_v12 = vmul.f32 1.442695, %v3261_v5 }
 0x8bb   :  { %4175 = vpow2.f32 %v3262_v12 }
 0x8c1   :  { %v4176_v19 = vpop.eup %4175 }
 0x8c2   :  { %v3264_v57 = vsel %vm3257_vm11, %v4176_v19, 0.0 }
 0x8c3   :  { %3265 = vadd.xlane.f32.xlu0 %v3264_v57 }
 0x936   :  { %v3266_v21 = vpop.xlane.xlu0 %3265 }
 0x937   :  { %4177 = vrcp.f32 %v3266_v21  ;;  %v3278_v53 = vand.u32 2147483648, %v3266_v21  ;;  %v3276_v61 = vand.u32 2147483647, %v3266_v21  ;;  %vm3272_vm13 = vweird.f32 %v3266_v21 }
 0x939   :  { %v3279_v56 = vor.u32 1.1754944e-38, %v3278_v53  ;;  %vm3277_vm0 = vcmp.eq.f32.partialorder %v3276_v61, 8.507059e+37 }
 0x93d   :  { %v4178_v4 = vpop.eup %4177 }
 0x93e   :  { %v3268_v22 = vmul.f32 %v4178_v4, %v3266_v21  ;;  %vm3273_vm12 = vweird.f32 %v4178_v4 }
 0x93f   :  { %vm3274_vm14 = vmor %vm3272_vm13, %vm3273_vm12 }
 0x940   :  { %v3269_v31 = vsub.f32 1.0, %v3268_v22 }
 0x942   :  { %v3270_v7 = vmul.f32 %v4178_v4, %v3269_v31 }
 0x944   :  { %v3271_v28 = vadd.f32 %v4178_v4, %v3270_v7 }
 0x946   :  { %v3275_v47 = vsel %vm3274_vm14, %v4178_v4, %v3271_v28 }
 0x947   :  { %v3280_v59 = vsel %vm3277_vm0, %v3279_v56, %v3275_v47 }
 0x948   :  { %v3281_v34 = vmul.f32 %v4176_v19, %v3280_v59 }
 0x94a   :  { %3282 = vst.msk [vmem:[#allocation11] sm:$0x3] %vm3257_vm11, %v3281_v34 }
 0x94b   :  { %3293 = dma.vmem_to_hbm [thread:$0]  %s3289_s27, 32, %s3291_s4, [#allocation5]  }
 0x94c   :  { %4305 = dma.done.wait [#allocation5], 32  }
 0x94d   :  { %4306 = vsyncadd [#allocation5], 4294967264 }
 0x94e   :  { %3298 = vsyncpa [#allocation4], 1 }
 0x94f   :  { %3299 = vsyncpa [#allocation7], 1 }
 0x950   :  { %3300 = vsyncpa [#allocation10], 1 }
 0x951   :  { %3301 = vsyncpa [#allocation5], 1 }

</bundles_post_ra>
